<compile_context>
chip_gen: v5e
topology: v5e:2x2
jax: 0.10.0
libtpu: 0.0.40
codegen_flags: <defaults>
</compile_context>

<pallas_src>
import functools

import jax
import jax.numpy as jnp
from jax.experimental import pallas as pl
from jax.experimental.pallas import tpu as pltpu

BN_EPS = 1e-5
LRELU_SLOPE = 0.1
LANE = 128  # lane width: all channel dims are padded to this

# Mirrors the pickled architecture format: list of (convs, type),
# each conv = (out_channels, kernel_size, stride, padding).
ARCH = [
    ([(8, 3, 1, 1)], "maxpool"),
    ([(16, 3, 1, 1)], "maxpool"),
    ([(16, 3, 1, 1), (16, 3, 1, 1)], "residual"),
    ([(32, 3, 1, 1)], None),
]


# ---------------------------------------------------------------------------
# small helpers
# ---------------------------------------------------------------------------
def _round_up(x, m):
    return ((x + m - 1) // m) * m


def _pick_tile(dim, cap, step):
    """Largest multiple of `step` <= cap that divides dim (falls back to dim)."""
    t = min(dim, cap)
    while t > step and dim % t:
        t -= step
    return t if (t > 0 and dim % t == 0) else dim


def _pick_k_tile(K):
    for t in (512, 384, 256, 128):
        if K % t == 0:
            return t
    return K


# ---------------------------------------------------------------------------
# Pallas kernels
# ---------------------------------------------------------------------------
def _conv_mm_kernel(x_ref, w_ref, b_ref, y_ref, sum_ref, sq_ref, acc_ref):
    """Tiled (patches @ weight) + bias; also emits per-tile BN partial stats."""
    k = pl.program_id(1)

    @pl.when(k == 0)
    def _():
        acc_ref[...] = jnp.zeros_like(acc_ref)

    acc_ref[...] += jnp.dot(x_ref[...], w_ref[...],
                            preferred_element_type=jnp.float32)

    @pl.when(k == pl.num_programs(1) - 1)
    def _():
        y = acc_ref[...] + b_ref[...]                      # f32
        y_ref[...] = y.astype(y_ref.dtype)
        s = jnp.sum(y, axis=0, keepdims=True)              # (1, Npad)
        ss = jnp.sum(y * y, axis=0, keepdims=True)
        sum_ref[...] = s[None]                             # (1, 1, Npad)
        sq_ref[...] = ss[None]


def _bn_act_kernel(*refs, use_res, m_total):
    """out = [residual +] lrelu(gamma * (y - mean) * rsqrt(var + eps) + beta)."""
    if use_res:
        y_ref, sum_ref, sq_ref, gamma_ref, beta_ref, res_ref, o_ref = refs
    else:
        y_ref, sum_ref, sq_ref, gamma_ref, beta_ref, o_ref = refs
        res_ref = None

    inv_m = 1.0 / float(m_total)
    s = jnp.sum(sum_ref[...], axis=0)                      # (1, Npad)
    ss = jnp.sum(sq_ref[...], axis=0)
    mean = s * inv_m
    var = jnp.maximum(ss * inv_m - mean * mean, 0.0)       # biased var (training BN)

    y = y_ref[...].astype(jnp.float32)
    out = (y - mean) * jax.lax.rsqrt(var + BN_EPS)
    out = out * gamma_ref[...] + beta_ref[...]
    out = jnp.where(out > 0, out, LRELU_SLOPE * out)       # LeakyReLU(0.1)
    if use_res:
        out = out + res_ref[...].astype(jnp.float32)       # residual AFTER lrelu
    o_ref[...] = out.astype(o_ref.dtype)


def _pool_kernel(x_ref, o_ref, *, p1, p2, lane, op):
    """x: (tb, p1, Wout, p2*lane); reduce the p1 pages and the p2 lane groups."""
    x = x_ref[...].astype(jnp.float32)
    acc = x[:, 0]
    for i in range(1, p1):
        acc = jnp.maximum(acc, x[:, i]) if op == "max" else acc + x[:, i]
    out = acc[:, :, :lane]
    for j in range(1, p2):
        blk = acc[:, :, j * lane:(j + 1) * lane]
        out = jnp.maximum(out, blk) if op == "max" else out + blk
    if op == "avg":
        out = out * (1.0 / (p1 * p2))
    o_ref[...] = out.astype(o_ref.dtype)


def _fc_head_kernel(x_ref, w1_ref, b1_ref, w2_ref, b2_ref, o_ref):
    """Fused fc1 + LeakyReLU + fc2 (whole head fits VMEM)."""
    h = jnp.dot(x_ref[...], w1_ref[...], preferred_element_type=jnp.float32)
    h = h + b1_ref[...]
    h = jnp.where(h > 0, h, LRELU_SLOPE * h)
    o = jnp.dot(h.astype(w2_ref.dtype), w2_ref[...],
                preferred_element_type=jnp.float32)
    o_ref[...] = (o + b2_ref[...]).astype(o_ref.dtype)


# ---------------------------------------------------------------------------
# pallas_call wrappers
# ---------------------------------------------------------------------------
def conv_matmul(patches, wm, b):
    """patches: (M, K) bf16, wm: (K, Npad) bf16, b: (1, Npad) f32."""
    M, K = patches.shape
    Npad = wm.shape[1]
    tm = _pick_tile(M, 256, 16)
    tk = _pick_k_tile(K)
    mt, kt = M // tm, K // tk

    y, sums, sqs = pl.pallas_call(
        _conv_mm_kernel,
        out_shape=(jax.ShapeDtypeStruct((M, Npad), jnp.bfloat16),
                   jax.ShapeDtypeStruct((mt, 1, Npad), jnp.float32),
                   jax.ShapeDtypeStruct((mt, 1, Npad), jnp.float32)),
        grid=(mt, kt),
        in_specs=[pl.BlockSpec((tm, tk), lambda m, k: (m, k)),
                  pl.BlockSpec((tk, Npad), lambda m, k: (k, 0)),
                  pl.BlockSpec((1, Npad), lambda m, k: (0, 0))],
        out_specs=(pl.BlockSpec((tm, Npad), lambda m, k: (m, 0)),
                   pl.BlockSpec((1, 1, Npad), lambda m, k: (m, 0, 0)),
                   pl.BlockSpec((1, 1, Npad), lambda m, k: (m, 0, 0))),
        scratch_shapes=[pltpu.VMEM((tm, Npad), jnp.float32)],
        compiler_params=pltpu.CompilerParams(
            dimension_semantics=("parallel", "arbitrary"),
            vmem_limit_bytes=32 * 1024 * 1024),
    )(patches, wm, b)
    return y, sums, sqs


def bn_lrelu(y, sums, sqs, gamma, beta, residual2d=None):
    M, Npad = y.shape
    mt = sums.shape[0]
    tm = _pick_tile(M, 256, 16)
    use_res = residual2d is not None

    inputs = [y, sums, sqs, gamma, beta]
    in_specs = [pl.BlockSpec((tm, Npad), lambda m: (m, 0)),
                pl.BlockSpec((mt, 1, Npad), lambda m: (0, 0, 0)),
                pl.BlockSpec((mt, 1, Npad), lambda m: (0, 0, 0)),
                pl.BlockSpec((1, Npad), lambda m: (0, 0)),
                pl.BlockSpec((1, Npad), lambda m: (0, 0))]
    if use_res:
        inputs.append(residual2d)
        in_specs.append(pl.BlockSpec((tm, Npad), lambda m: (m, 0)))

    kernel = functools.partial(_bn_act_kernel, use_res=use_res, m_total=M)
    return pl.pallas_call(
        kernel,
        out_shape=jax.ShapeDtypeStruct((M, Npad), jnp.bfloat16),
        grid=(M // tm,),
        in_specs=in_specs,
        out_specs=pl.BlockSpec((tm, Npad), lambda m: (m, 0)),
        compiler_params=pltpu.CompilerParams(dimension_semantics=("parallel",)),
    )(*inputs)


def _pool_call(xv, p1, p2, lane, op):
    """xv: (M2, p1, Wout, p2*lane) -> (M2, Wout, lane)."""
    M2, _, Wout, _ = xv.shape
    tb = _pick_tile(M2, 256, 1)
    kernel = functools.partial(_pool_kernel, p1=p1, p2=p2, lane=lane, op=op)
    return pl.pallas_call(
        kernel,
        out_shape=jax.ShapeDtypeStruct((M2, Wout, lane), xv.dtype),
        grid=(M2 // tb,),
        in_specs=[pl.BlockSpec((tb, p1, Wout, p2 * lane), lambda i: (i, 0, 0, 0))],
        out_specs=pl.BlockSpec((tb, Wout, lane), lambda i: (i, 0, 0)),
        compiler_params=pltpu.CompilerParams(dimension_semantics=("parallel",)),
    )(xv)


def fc_head(x, fc1, fc2):
    w1, b1 = fc1
    w2, b2 = fc2
    n_rows = x.shape[0]
    outpad = w2.shape[1]
    # whole head (K=hidden=128-padded) fits VMEM trivially -> single fused call
    return pl.pallas_call(
        _fc_head_kernel,
        out_shape=jax.ShapeDtypeStruct((n_rows, outpad), jnp.float32),
    )(x, w1, b1, w2, b2)


# ---------------------------------------------------------------------------
# JAX glue (layout plumbing only — pure reshapes / pads, no HBM transposes)
# ---------------------------------------------------------------------------
def _im2col(x, ksize, stride, padding):
    """x: (N, H, W, Cpad) -> (N*Ho*Wo, ksize*ksize*Cpad) patches (bf16)."""
    N, H, W, C = x.shape
    xp = jnp.pad(x, ((0, 0), (padding, padding), (padding, padding), (0, 0)))
    Ho = (H + 2 * padding - ksize) // stride + 1
    Wo = (W + 2 * padding - ksize) // stride + 1
    cols = []
    for i in range(ksize):
        for j in range(ksize):
            cols.append(xp[:, i:i + stride * Ho:stride, j:j + stride * Wo:stride, :])
    patches = jnp.concatenate(cols, axis=-1)       # (N, Ho, Wo, k*k*Cpad)
    return patches.reshape(N * Ho * Wo, ksize * ksize * C), Ho, Wo


def conv_layer(x, layer_params, ksize, stride, padding, residual=None):
    """One Convlayer (Conv2d + training BatchNorm2d + LeakyReLU), opt. residual."""
    wm, b, gamma, beta = layer_params              # wm: (k*k*LANE, LANE) bf16
    N = x.shape[0]
    patches, Ho, Wo = _im2col(x, ksize, stride, padding)
    y, sums, sqs = conv_matmul(patches, wm, b)
    res2d = residual.reshape(-1, residual.shape[-1]) if residual is not None else None
    out = bn_lrelu(y, sums, sqs, gamma, beta, res2d)
    return out.reshape(N, Ho, Wo, wm.shape[1])


def max_pool_2x2(x):
    N, H, W, C = x.shape
    Ho, Wo = H // 2, W // 2
    xv = x.reshape(N * Ho, 2, Wo, 2 * C)           # pure dim-split reshape
    return _pool_call(xv, 2, 2, C, "max").reshape(N, Ho, Wo, C)


def adaptive_avg_pool(x, S):
    N, H, W, C = x.shape
    assert H % S == 0 and W % S == 0, "demo assumes divisible pooling windows"
    wh, ww = H // S, W // S
    xv = x.reshape(N * S, wh, S, ww * C)           # pure dim-split reshape
    return _pool_call(xv, wh, ww, C, "avg").reshape(N, S, S, C)


def yolo_forward(x_nchw, params, *, S, B, C):
    x = jnp.transpose(x_nchw, (0, 2, 3, 1))        # NCHW -> NHWC (boundary only)
    N, _, _, cin = x.shape
    x = jnp.pad(x, ((0, 0), (0, 0), (0, 0), (0, LANE - cin)))   # lane-pad channels
    x = x.astype(jnp.bfloat16)

    idx = 0
    for convs, btype in ARCH:
        if btype == "residual":
            res_in = x
            for li, (cout, k, s, p) in enumerate(convs):
                r = res_in if li == len(convs) - 1 else None
                x = conv_layer(x, params["darknet"][idx], k, s, p, residual=r)
                idx += 1
        else:
            for (cout, k, s, p) in convs:
                x = conv_layer(x, params["darknet"][idx], k, s, p)
                idx += 1
            if btype == "maxpool":
                x = max_pool_2x2(x)

    x = adaptive_avg_pool(x, S)                    # (N, S, S, LANE)

    # torch.flatten(NCHW, start_dim=1): slice lane padding, channel-major flatten
    cout_last = ARCH[-1][0][-1][0]
    x = x[..., :cout_last]
    x = jnp.transpose(x, (0, 3, 1, 2)).reshape(N, -1).astype(jnp.bfloat16)

    out = fc_head(x, params["fc1"], params["fc2"])
    out_dim = S * S * (B * 5 + C)
    return out[:, :out_dim]


# ---------------------------------------------------------------------------
# Deterministic parameter init (synthetic, not a checkpoint) — pre-padded/typed
# ---------------------------------------------------------------------------
def init_params(key, in_channels, S, B, C, hidden=64):
    params = {"darknet": []}
    keys = iter(jax.random.split(key, 64))
    n_in = in_channels
    for convs, _ in ARCH:
        for (cout, k, s, p) in convs:
            w = jax.random.normal(next(keys), (k, k, n_in, cout), jnp.float32) * 0.1
            b = jax.random.normal(next(keys), (cout,), jnp.float32) * 0.1
            # lane-pad to 128 (zeros), pre-reshape weight to a (K, Npad) matrix
            wp = jnp.zeros((k, k, LANE, LANE), jnp.float32)
            wp = wp.at[:, :, :n_in, :cout].set(w)
            wm = wp.reshape(k * k * LANE, LANE).astype(jnp.bfloat16)
            bp = jnp.zeros((1, LANE), jnp.float32).at[0, :cout].set(b)
            gamma = jnp.ones((1, LANE), jnp.float32)
            beta = jnp.zeros((1, LANE), jnp.float32)
            params["darknet"].append((wm, bp, gamma, beta))
            n_in = cout

    # TODO(synk): reference FC sizes are 1024*S*S and 4096; scaled down here.
    fc_in = n_in * S * S
    out_dim = S * S * (B * 5 + C)
    hpad = _round_up(hidden, LANE)
    opad = _round_up(out_dim, LANE)
    w1 = jax.random.normal(next(keys), (fc_in, hidden), jnp.float32) * 0.05
    w2 = jax.random.normal(next(keys), (hidden, out_dim), jnp.float32) * 0.05
    w1p = jnp.zeros((fc_in, hpad), jnp.float32).at[:, :hidden].set(w1).astype(jnp.bfloat16)
    b1p = jnp.zeros((1, hpad), jnp.float32)
    w2p = jnp.zeros((hpad, opad), jnp.float32).at[:hidden, :out_dim].set(w2).astype(jnp.bfloat16)
    b2p = jnp.zeros((1, opad), jnp.float32)
    params["fc1"] = (w1p, b1p)
    params["fc2"] = (w2p, b2p)
    return params


if __name__ == "__main__":
    key = jax.random.PRNGKey(0)
    kx, kp = jax.random.split(key)

    N, Cin, H, W = 2, 4, 16, 16
    S, B, C = 2, 2, 4

    x = jax.random.normal(kx, (N, Cin, H, W), jnp.float32)
    params = init_params(kp, Cin, S, B, C)

    fwd = jax.jit(functools.partial(yolo_forward, S=S, B=B, C=C))
    out = fwd(x, params)
    jax.block_until_ready(out)

    assert out.shape == (N, S * S * (B * 5 + C)), out.shape
    assert bool(jnp.all(jnp.isfinite(out)))
    print("KERNEL_OK")
</pallas_src>

<mosaic_0001>
module attributes {stable_mosaic.version = 11 : i64} {
  func.func @_conv_mm_kernel(%arg0: i32, %arg1: i32, %arg2: memref<256x384xbf16, #tpu.memory_space<vmem>>, %arg3: memref<384x128xbf16, #tpu.memory_space<vmem>>, %arg4: memref<1x128xf32, #tpu.memory_space<vmem>>, %arg5: memref<256x128xbf16, #tpu.memory_space<vmem>>, %arg6: memref<1x1x128xf32, #tpu.memory_space<vmem>>, %arg7: memref<1x1x128xf32, #tpu.memory_space<vmem>>, %arg8: memref<256x128xf32, #tpu.memory_space<vmem>>) attributes {dimension_semantics = [#tpu.dimension_semantics<parallel>, #tpu.dimension_semantics<arbitrary>], iteration_bounds = array<i64: 2, 3>, scalar_prefetch = 0 : i64, scratch_operands = 1 : i64, tpu.core_type = #tpu.core_type<tc>, window_params = [{transform_indices = @transform_0, window_bounds = array<i64: 256, 384>}, {transform_indices = @transform_1, window_bounds = array<i64: 384, 128>}, {pipeline_mode = #tpu.pipeline_mode<synchronous>, transform_indices = @transform_2, window_bounds = array<i64: 1, 128>}, {transform_indices = @transform_3, window_bounds = array<i64: 256, 128>}, {transform_indices = @transform_4, window_bounds = array<i64: 1, 1, 128>}, {transform_indices = @transform_5, window_bounds = array<i64: 1, 1, 128>}]} {
    %c0_i32 = arith.constant 0 : i32
    %0 = arith.cmpi eq, %arg1, %c0_i32 : i32
    %1 = arith.extui %0 : i1 to i32
    %c0_i32_0 = arith.constant 0 : i32
    %2 = arith.cmpi ne, %1, %c0_i32_0 : i32
    scf.if %2 {
      %cst_9 = arith.constant 0.000000e+00 : f32
      %12 = vector.broadcast %cst_9 : f32 to vector<256x128xf32>
      %c0_10 = arith.constant 0 : index
      %c0_11 = arith.constant 0 : index
      %13 = vector.load %arg8[%c0_10, %c0_11] : memref<256x128xf32, #tpu.memory_space<vmem>>, vector<256x128xf32>
      tpu.vector_store %arg8[%c0_10, %c0_11], %12 {strides = array<i32>} : memref<256x128xf32, #tpu.memory_space<vmem>>, vector<256x128xf32>,
    } else {
    }
    %c0 = arith.constant 0 : index
    %c0_1 = arith.constant 0 : index
    %3 = vector.load %arg8[%c0, %c0_1] : memref<256x128xf32, #tpu.memory_space<vmem>>, vector<256x128xf32>
    %c0_2 = arith.constant 0 : index
    %c0_3 = arith.constant 0 : index
    %4 = vector.load %arg2[%c0_2, %c0_3] : memref<256x384xbf16, #tpu.memory_space<vmem>>, vector<256x384xbf16>
    %c0_4 = arith.constant 0 : index
    %c0_5 = arith.constant 0 : index
    %5 = vector.load %arg3[%c0_4, %c0_5] : memref<384x128xbf16, #tpu.memory_space<vmem>>, vector<384x128xbf16>
    %cst = arith.constant dense<0.000000e+00> : vector<256x128xf32>
    %6 = tpu.matmul %4, %5, %cst {dimension_numbers = #tpu.dot_dimension_numbers<[1], [0], [0], [1], [0, 0, 1, 1], [], []>} : vector<256x384xbf16>, vector<384x128xbf16>, vector<256x128xf32> -> vector<256x128xf32>
    %7 = arith.addf %3, %6 : vector<256x128xf32>
    %c0_6 = arith.constant 0 : index
    %c0_7 = arith.constant 0 : index
    %8 = vector.load %arg8[%c0_6, %c0_7] : memref<256x128xf32, #tpu.memory_space<vmem>>, vector<256x128xf32>
    tpu.vector_store %arg8[%c0_6, %c0_7], %7 {strides = array<i32>} : memref<256x128xf32, #tpu.memory_space<vmem>>, vector<256x128xf32>,
    %c2_i32 = arith.constant 2 : i32
    %9 = arith.cmpi eq, %arg1, %c2_i32 : i32
    %10 = arith.extui %9 : i1 to i32
    %c0_i32_8 = arith.constant 0 : i32
    %11 = arith.cmpi ne, %10, %c0_i32_8 : i32
    scf.if %11 {
      %c0_9 = arith.constant 0 : index
      %c0_10 = arith.constant 0 : index
      %12 = vector.load %arg8[%c0_9, %c0_10] : memref<256x128xf32, #tpu.memory_space<vmem>>, vector<256x128xf32>
      %c0_11 = arith.constant 0 : index
      %c0_12 = arith.constant 0 : index
      %13 = vector.load %arg4[%c0_11, %c0_12] : memref<1x128xf32, #tpu.memory_space<vmem>>, vector<1x128xf32>
      %14 = vector.broadcast %13 : vector<1x128xf32> to vector<256x128xf32>
      %15 = arith.addf %12, %14 : vector<256x128xf32>
      %16 = arith.truncf %15 : vector<256x128xf32> to vector<256x128xbf16>
      %c0_13 = arith.constant 0 : index
      %c0_14 = arith.constant 0 : index
      %17 = vector.load %arg5[%c0_13, %c0_14] : memref<256x128xbf16, #tpu.memory_space<vmem>>, vector<256x128xbf16>
      tpu.vector_store %arg5[%c0_13, %c0_14], %16 {strides = array<i32>} : memref<256x128xbf16, #tpu.memory_space<vmem>>, vector<256x128xbf16>,
      %cst_15 = arith.constant dense<0.000000e+00> : vector<128xf32>
      %18 = vector.multi_reduction <add>, %15, %cst_15 [0] : vector<256x128xf32> to vector<128xf32>
      %19 = vector.shape_cast %18 : vector<128xf32> to vector<1x128xf32>
      %20 = arith.mulf %15, %15 : vector<256x128xf32>
      %cst_16 = arith.constant dense<0.000000e+00> : vector<128xf32>
      %21 = vector.multi_reduction <add>, %20, %cst_16 [0] : vector<256x128xf32> to vector<128xf32>
      %22 = vector.shape_cast %21 : vector<128xf32> to vector<1x128xf32>
      %23 = vector.shape_cast %19 : vector<1x128xf32> to vector<1x1x128xf32>
      %c0_17 = arith.constant 0 : index
      %c0_18 = arith.constant 0 : index
      %c0_19 = arith.constant 0 : index
      %24 = vector.load %arg6[%c0_17, %c0_18, %c0_19] : memref<1x1x128xf32, #tpu.memory_space<vmem>>, vector<1x1x128xf32>
      tpu.vector_store %arg6[%c0_17, %c0_18, %c0_19], %23 {strides = array<i32>} : memref<1x1x128xf32, #tpu.memory_space<vmem>>, vector<1x1x128xf32>,
      %25 = vector.shape_cast %22 : vector<1x128xf32> to vector<1x1x128xf32>
      %c0_20 = arith.constant 0 : index
      %c0_21 = arith.constant 0 : index
      %c0_22 = arith.constant 0 : index
      %26 = vector.load %arg7[%c0_20, %c0_21, %c0_22] : memref<1x1x128xf32, #tpu.memory_space<vmem>>, vector<1x1x128xf32>
      tpu.vector_store %arg7[%c0_20, %c0_21, %c0_22], %25 {strides = array<i32>} : memref<1x1x128xf32, #tpu.memory_space<vmem>>, vector<1x1x128xf32>,
    } else {
    }
    return
  }
  func.func @transform_0(%arg0: i32, %arg1: i32) -> (i32, i32) {
    %c0_i32 = arith.constant 0 : i32
    return %arg0, %arg1 : i32, i32
  }
  func.func @transform_1(%arg0: i32, %arg1: i32) -> (i32, i32) {
    %c0_i32 = arith.constant 0 : i32
    %c0_i32_0 = arith.constant 0 : i32
    return %arg1, %c0_i32 : i32, i32
  }
  func.func @transform_2(%arg0: i32, %arg1: i32) -> (i32, i32) {
    %c0_i32 = arith.constant 0 : i32
    %c0_i32_0 = arith.constant 0 : i32
    %c0_i32_1 = arith.constant 0 : i32
    return %c0_i32, %c0_i32_0 : i32, i32
  }
  func.func @transform_3(%arg0: i32, %arg1: i32) -> (i32, i32) {
    %c0_i32 = arith.constant 0 : i32
    %c0_i32_0 = arith.constant 0 : i32
    return %arg0, %c0_i32 : i32, i32
  }
  func.func @transform_4(%arg0: i32, %arg1: i32) -> (i32, i32, i32) {
    %c0_i32 = arith.constant 0 : i32
    %c0_i32_0 = arith.constant 0 : i32
    %c0_i32_1 = arith.constant 0 : i32
    return %arg0, %c0_i32, %c0_i32_0 : i32, i32, i32
  }
  func.func @transform_5(%arg0: i32, %arg1: i32) -> (i32, i32, i32) {
    %c0_i32 = arith.constant 0 : i32
    %c0_i32_0 = arith.constant 0 : i32
    %c0_i32_1 = arith.constant 0 : i32
    return %arg0, %c0_i32, %c0_i32_0 : i32, i32, i32
  }
}

module attributes {stable_mosaic.version = 11 : i64} {
  func.func @_bn_act_kernel(%arg0: i32, %arg1: memref<256x128xbf16, #tpu.memory_space<vmem>>, %arg2: memref<2x1x128xf32, #tpu.memory_space<vmem>>, %arg3: memref<2x1x128xf32, #tpu.memory_space<vmem>>, %arg4: memref<1x128xf32, #tpu.memory_space<vmem>>, %arg5: memref<1x128xf32, #tpu.memory_space<vmem>>, %arg6: memref<256x128xbf16, #tpu.memory_space<vmem>>) attributes {dimension_semantics = [#tpu.dimension_semantics<parallel>], iteration_bounds = array<i64: 2>, scalar_prefetch = 0 : i64, scratch_operands = 0 : i64, tpu.core_type = #tpu.core_type<tc>, window_params = [{transform_indices = @transform_0, window_bounds = array<i64: 256, 128>}, {pipeline_mode = #tpu.pipeline_mode<synchronous>, transform_indices = @transform_1, window_bounds = array<i64: 2, 1, 128>}, {pipeline_mode = #tpu.pipeline_mode<synchronous>, transform_indices = @transform_2, window_bounds = array<i64: 2, 1, 128>}, {pipeline_mode = #tpu.pipeline_mode<synchronous>, transform_indices = @transform_3, window_bounds = array<i64: 1, 128>}, {pipeline_mode = #tpu.pipeline_mode<synchronous>, transform_indices = @transform_4, window_bounds = array<i64: 1, 128>}, {transform_indices = @transform_5, window_bounds = array<i64: 256, 128>}]} {
    %c0 = arith.constant 0 : index
    %c0_0 = arith.constant 0 : index
    %c0_1 = arith.constant 0 : index
    %0 = vector.load %arg2[%c0, %c0_0, %c0_1] : memref<2x1x128xf32, #tpu.memory_space<vmem>>, vector<2x1x128xf32>
    %cst = arith.constant dense<0.000000e+00> : vector<1x128xf32>
    %1 = vector.multi_reduction <add>, %0, %cst [0] : vector<2x1x128xf32> to vector<1x128xf32>
    %c0_2 = arith.constant 0 : index
    %c0_3 = arith.constant 0 : index
    %c0_4 = arith.constant 0 : index
    %2 = vector.load %arg3[%c0_2, %c0_3, %c0_4] : memref<2x1x128xf32, #tpu.memory_space<vmem>>, vector<2x1x128xf32>
    %cst_5 = arith.constant dense<0.000000e+00> : vector<1x128xf32>
    %3 = vector.multi_reduction <add>, %2, %cst_5 [0] : vector<2x1x128xf32> to vector<1x128xf32>
    %cst_6 = arith.constant 0.001953125 : f32
    %4 = vector.broadcast %cst_6 : f32 to vector<1x128xf32>
    %5 = arith.mulf %1, %4 : vector<1x128xf32>
    %cst_7 = arith.constant 0.001953125 : f32
    %6 = vector.broadcast %cst_7 : f32 to vector<1x128xf32>
    %7 = arith.mulf %3, %6 : vector<1x128xf32>
    %8 = arith.mulf %5, %5 : vector<1x128xf32>
    %9 = arith.subf %7, %8 : vector<1x128xf32>
    %cst_8 = arith.constant 0.000000e+00 : f32
    %10 = vector.broadcast %cst_8 : f32 to vector<1x128xf32>
    %11 = arith.maximumf %9, %10 : vector<1x128xf32>
    %c0_9 = arith.constant 0 : index
    %c0_10 = arith.constant 0 : index
    %12 = vector.load %arg1[%c0_9, %c0_10] : memref<256x128xbf16, #tpu.memory_space<vmem>>, vector<256x128xbf16>
    %13 = arith.extf %12 : vector<256x128xbf16> to vector<256x128xf32>
    %14 = vector.broadcast %5 : vector<1x128xf32> to vector<256x128xf32>
    %15 = arith.subf %13, %14 : vector<256x128xf32>
    %cst_11 = arith.constant 9.99999974E-6 : f32
    %16 = vector.broadcast %cst_11 : f32 to vector<1x128xf32>
    %17 = arith.addf %11, %16 : vector<1x128xf32>
    %18 = math.rsqrt %17 : vector<1x128xf32>
    %19 = vector.broadcast %18 : vector<1x128xf32> to vector<256x128xf32>
    %20 = arith.mulf %15, %19 : vector<256x128xf32>
    %c0_12 = arith.constant 0 : index
    %c0_13 = arith.constant 0 : index
    %21 = vector.load %arg4[%c0_12, %c0_13] : memref<1x128xf32, #tpu.memory_space<vmem>>, vector<1x128xf32>
    %22 = vector.broadcast %21 : vector<1x128xf32> to vector<256x128xf32>
    %23 = arith.mulf %20, %22 : vector<256x128xf32>
    %c0_14 = arith.constant 0 : index
    %c0_15 = arith.constant 0 : index
    %24 = vector.load %arg5[%c0_14, %c0_15] : memref<1x128xf32, #tpu.memory_space<vmem>>, vector<1x128xf32>
    %25 = vector.broadcast %24 : vector<1x128xf32> to vector<256x128xf32>
    %26 = arith.addf %23, %25 : vector<256x128xf32>
    %cst_16 = arith.constant 0.000000e+00 : f32
    %27 = vector.broadcast %cst_16 : f32 to vector<256x128xf32>
    %28 = arith.cmpf ogt, %26, %27 : vector<256x128xf32>
    %cst_17 = arith.constant 1.000000e-01 : f32
    %29 = vector.broadcast %cst_17 : f32 to vector<256x128xf32>
    %30 = arith.mulf %29, %26 : vector<256x128xf32>
    %31 = arith.select %28, %26, %30 : vector<256x128xi1>, vector<256x128xf32>
    %32 = arith.truncf %31 : vector<256x128xf32> to vector<256x128xbf16>
    %c0_18 = arith.constant 0 : index
    %c0_19 = arith.constant 0 : index
    %33 = vector.load %arg6[%c0_18, %c0_19] : memref<256x128xbf16, #tpu.memory_space<vmem>>, vector<256x128xbf16>
    tpu.vector_store %arg6[%c0_18, %c0_19], %32 {strides = array<i32>} : memref<256x128xbf16, #tpu.memory_space<vmem>>, vector<256x128xbf16>,
    return
  }
  func.func @transform_0(%arg0: i32) -> (i32, i32) {
    %c0_i32 = arith.constant 0 : i32
    %c0_i32_0 = arith.constant 0 : i32
    return %arg0, %c0_i32 : i32, i32
  }
  func.func @transform_1(%arg0: i32) -> (i32, i32, i32) {
    %c0_i32 = arith.constant 0 : i32
    %c0_i32_0 = arith.constant 0 : i32
    %c0_i32_1 = arith.constant 0 : i32
    %c0_i32_2 = arith.constant 0 : i32
    return %c0_i32, %c0_i32_0, %c0_i32_1 : i32, i32, i32
  }
  func.func @transform_2(%arg0: i32) -> (i32, i32, i32) {
    %c0_i32 = arith.constant 0 : i32
    %c0_i32_0 = arith.constant 0 : i32
    %c0_i32_1 = arith.constant 0 : i32
    %c0_i32_2 = arith.constant 0 : i32
    return %c0_i32, %c0_i32_0, %c0_i32_1 : i32, i32, i32
  }
  func.func @transform_3(%arg0: i32) -> (i32, i32) {
    %c0_i32 = arith.constant 0 : i32
    %c0_i32_0 = arith.constant 0 : i32
    %c0_i32_1 = arith.constant 0 : i32
    return %c0_i32, %c0_i32_0 : i32, i32
  }
  func.func @transform_4(%arg0: i32) -> (i32, i32) {
    %c0_i32 = arith.constant 0 : i32
    %c0_i32_0 = arith.constant 0 : i32
    %c0_i32_1 = arith.constant 0 : i32
    return %c0_i32, %c0_i32_0 : i32, i32
  }
  func.func @transform_5(%arg0: i32) -> (i32, i32) {
    %c0_i32 = arith.constant 0 : i32
    %c0_i32_0 = arith.constant 0 : i32
    return %arg0, %c0_i32 : i32, i32
  }
}

module attributes {stable_mosaic.version = 11 : i64} {
  func.func @_pool_kernel(%arg0: i32, %arg1: memref<16x2x8x256xbf16, #tpu.memory_space<vmem>>, %arg2: memref<16x8x128xbf16, #tpu.memory_space<vmem>>) attributes {dimension_semantics = [#tpu.dimension_semantics<parallel>], iteration_bounds = array<i64: 1>, scalar_prefetch = 0 : i64, scratch_operands = 0 : i64, tpu.core_type = #tpu.core_type<tc>, window_params = [{transform_indices = @transform_0, window_bounds = array<i64: 16, 2, 8, 256>}, {transform_indices = @transform_1, window_bounds = array<i64: 16, 8, 128>}]} {
    %c0 = arith.constant 0 : index
    %c0_0 = arith.constant 0 : index
    %c0_1 = arith.constant 0 : index
    %c0_2 = arith.constant 0 : index
    %0 = vector.load %arg1[%c0, %c0_0, %c0_1, %c0_2] : memref<16x2x8x256xbf16, #tpu.memory_space<vmem>>, vector<16x2x8x256xbf16>
    %1 = arith.extf %0 : vector<16x2x8x256xbf16> to vector<16x2x8x256xf32>
    %2 = vector.extract_strided_slice %1 {offsets = [0, 0, 0, 0], sizes = [16, 1, 8, 256], strides = [1, 1, 1, 1]} : vector<16x2x8x256xf32> to vector<16x1x8x256xf32>
    %3 = vector.shape_cast %2 : vector<16x1x8x256xf32> to vector<16x8x256xf32>
    %4 = vector.extract_strided_slice %1 {offsets = [0, 1, 0, 0], sizes = [16, 1, 8, 256], strides = [1, 1, 1, 1]} : vector<16x2x8x256xf32> to vector<16x1x8x256xf32>
    %5 = vector.shape_cast %4 : vector<16x1x8x256xf32> to vector<16x8x256xf32>
    %6 = arith.maximumf %3, %5 : vector<16x8x256xf32>
    %7 = vector.extract_strided_slice %6 {offsets = [0, 0, 0], sizes = [16, 8, 128], strides = [1, 1, 1]} : vector<16x8x256xf32> to vector<16x8x128xf32>
    %8 = vector.extract_strided_slice %6 {offsets = [0, 0, 128], sizes = [16, 8, 128], strides = [1, 1, 1]} : vector<16x8x256xf32> to vector<16x8x128xf32>
    %9 = arith.maximumf %7, %8 : vector<16x8x128xf32>
    %10 = arith.truncf %9 : vector<16x8x128xf32> to vector<16x8x128xbf16>
    %c0_3 = arith.constant 0 : index
    %c0_4 = arith.constant 0 : index
    %c0_5 = arith.constant 0 : index
    %11 = vector.load %arg2[%c0_3, %c0_4, %c0_5] : memref<16x8x128xbf16, #tpu.memory_space<vmem>>, vector<16x8x128xbf16>
    tpu.vector_store %arg2[%c0_3, %c0_4, %c0_5], %10 {strides = array<i32>} : memref<16x8x128xbf16, #tpu.memory_space<vmem>>, vector<16x8x128xbf16>,
    return
  }
  func.func @transform_0(%arg0: i32) -> (i32, i32, i32, i32) {
    %c0_i32 = arith.constant 0 : i32
    %c0_i32_0 = arith.constant 0 : i32
    %c0_i32_1 = arith.constant 0 : i32
    %c0_i32_2 = arith.constant 0 : i32
    return %arg0, %c0_i32, %c0_i32_0, %c0_i32_1 : i32, i32, i32, i32
  }
  func.func @transform_1(%arg0: i32) -> (i32, i32, i32) {
    %c0_i32 = arith.constant 0 : i32
    %c0_i32_0 = arith.constant 0 : i32
    %c0_i32_1 = arith.constant 0 : i32
    return %arg0, %c0_i32, %c0_i32_0 : i32, i32, i32
  }
}

module attributes {stable_mosaic.version = 11 : i64} {
  func.func @_conv_mm_kernel(%arg0: i32, %arg1: i32, %arg2: memref<128x384xbf16, #tpu.memory_space<vmem>>, %arg3: memref<384x128xbf16, #tpu.memory_space<vmem>>, %arg4: memref<1x128xf32, #tpu.memory_space<vmem>>, %arg5: memref<128x128xbf16, #tpu.memory_space<vmem>>, %arg6: memref<1x1x128xf32, #tpu.memory_space<vmem>>, %arg7: memref<1x1x128xf32, #tpu.memory_space<vmem>>, %arg8: memref<128x128xf32, #tpu.memory_space<vmem>>) attributes {dimension_semantics = [#tpu.dimension_semantics<parallel>, #tpu.dimension_semantics<arbitrary>], iteration_bounds = array<i64: 1, 3>, scalar_prefetch = 0 : i64, scratch_operands = 1 : i64, tpu.core_type = #tpu.core_type<tc>, window_params = [{transform_indices = @transform_0, window_bounds = array<i64: 128, 384>}, {transform_indices = @transform_1, window_bounds = array<i64: 384, 128>}, {pipeline_mode = #tpu.pipeline_mode<synchronous>, transform_indices = @transform_2, window_bounds = array<i64: 1, 128>}, {transform_indices = @transform_3, window_bounds = array<i64: 128, 128>}, {transform_indices = @transform_4, window_bounds = array<i64: 1, 1, 128>}, {transform_indices = @transform_5, window_bounds = array<i64: 1, 1, 128>}]} {
    %c0_i32 = arith.constant 0 : i32
    %0 = arith.cmpi eq, %arg1, %c0_i32 : i32
    %1 = arith.extui %0 : i1 to i32
    %c0_i32_0 = arith.constant 0 : i32
    %2 = arith.cmpi ne, %1, %c0_i32_0 : i32
    scf.if %2 {
      %cst_9 = arith.constant 0.000000e+00 : f32
      %12 = vector.broadcast %cst_9 : f32 to vector<128x128xf32>
      %c0_10 = arith.constant 0 : index
      %c0_11 = arith.constant 0 : index
      %13 = vector.load %arg8[%c0_10, %c0_11] : memref<128x128xf32, #tpu.memory_space<vmem>>, vector<128x128xf32>
      tpu.vector_store %arg8[%c0_10, %c0_11], %12 {strides = array<i32>} : memref<128x128xf32, #tpu.memory_space<vmem>>, vector<128x128xf32>,
    } else {
    }
    %c0 = arith.constant 0 : index
    %c0_1 = arith.constant 0 : index
    %3 = vector.load %arg8[%c0, %c0_1] : memref<128x128xf32, #tpu.memory_space<vmem>>, vector<128x128xf32>
    %c0_2 = arith.constant 0 : index
    %c0_3 = arith.constant 0 : index
    %4 = vector.load %arg2[%c0_2, %c0_3] : memref<128x384xbf16, #tpu.memory_space<vmem>>, vector<128x384xbf16>
    %c0_4 = arith.constant 0 : index
    %c0_5 = arith.constant 0 : index
    %5 = vector.load %arg3[%c0_4, %c0_5] : memref<384x128xbf16, #tpu.memory_space<vmem>>, vector<384x128xbf16>
    %cst = arith.constant dense<0.000000e+00> : vector<128x128xf32>
    %6 = tpu.matmul %4, %5, %cst {dimension_numbers = #tpu.dot_dimension_numbers<[1], [0], [0], [1], [0, 0, 1, 1], [], []>} : vector<128x384xbf16>, vector<384x128xbf16>, vector<128x128xf32> -> vector<128x128xf32>
    %7 = arith.addf %3, %6 : vector<128x128xf32>
    %c0_6 = arith.constant 0 : index
    %c0_7 = arith.constant 0 : index
    %8 = vector.load %arg8[%c0_6, %c0_7] : memref<128x128xf32, #tpu.memory_space<vmem>>, vector<128x128xf32>
    tpu.vector_store %arg8[%c0_6, %c0_7], %7 {strides = array<i32>} : memref<128x128xf32, #tpu.memory_space<vmem>>, vector<128x128xf32>,
    %c2_i32 = arith.constant 2 : i32
    %9 = arith.cmpi eq, %arg1, %c2_i32 : i32
    %10 = arith.extui %9 : i1 to i32
    %c0_i32_8 = arith.constant 0 : i32
    %11 = arith.cmpi ne, %10, %c0_i32_8 : i32
    scf.if %11 {
      %c0_9 = arith.constant 0 : index
      %c0_10 = arith.constant 0 : index
      %12 = vector.load %arg8[%c0_9, %c0_10] : memref<128x128xf32, #tpu.memory_space<vmem>>, vector<128x128xf32>
      %c0_11 = arith.constant 0 : index
      %c0_12 = arith.constant 0 : index
      %13 = vector.load %arg4[%c0_11, %c0_12] : memref<1x128xf32, #tpu.memory_space<vmem>>, vector<1x128xf32>
      %14 = vector.broadcast %13 : vector<1x128xf32> to vector<128x128xf32>
      %15 = arith.addf %12, %14 : vector<128x128xf32>
      %16 = arith.truncf %15 : vector<128x128xf32> to vector<128x128xbf16>
      %c0_13 = arith.constant 0 : index
      %c0_14 = arith.constant 0 : index
      %17 = vector.load %arg5[%c0_13, %c0_14] : memref<128x128xbf16, #tpu.memory_space<vmem>>, vector<128x128xbf16>
      tpu.vector_store %arg5[%c0_13, %c0_14], %16 {strides = array<i32>} : memref<128x128xbf16, #tpu.memory_space<vmem>>, vector<128x128xbf16>,
      %cst_15 = arith.constant dense<0.000000e+00> : vector<128xf32>
      %18 = vector.multi_reduction <add>, %15, %cst_15 [0] : vector<128x128xf32> to vector<128xf32>
      %19 = vector.shape_cast %18 : vector<128xf32> to vector<1x128xf32>
      %20 = arith.mulf %15, %15 : vector<128x128xf32>
      %cst_16 = arith.constant dense<0.000000e+00> : vector<128xf32>
      %21 = vector.multi_reduction <add>, %20, %cst_16 [0] : vector<128x128xf32> to vector<128xf32>
      %22 = vector.shape_cast %21 : vector<128xf32> to vector<1x128xf32>
      %23 = vector.shape_cast %19 : vector<1x128xf32> to vector<1x1x128xf32>
      %c0_17 = arith.constant 0 : index
      %c0_18 = arith.constant 0 : index
      %c0_19 = arith.constant 0 : index
      %24 = vector.load %arg6[%c0_17, %c0_18, %c0_19] : memref<1x1x128xf32, #tpu.memory_space<vmem>>, vector<1x1x128xf32>
      tpu.vector_store %arg6[%c0_17, %c0_18, %c0_19], %23 {strides = array<i32>} : memref<1x1x128xf32, #tpu.memory_space<vmem>>, vector<1x1x128xf32>,
      %25 = vector.shape_cast %22 : vector<1x128xf32> to vector<1x1x128xf32>
      %c0_20 = arith.constant 0 : index
      %c0_21 = arith.constant 0 : index
      %c0_22 = arith.constant 0 : index
      %26 = vector.load %arg7[%c0_20, %c0_21, %c0_22] : memref<1x1x128xf32, #tpu.memory_space<vmem>>, vector<1x1x128xf32>
      tpu.vector_store %arg7[%c0_20, %c0_21, %c0_22], %25 {strides = array<i32>} : memref<1x1x128xf32, #tpu.memory_space<vmem>>, vector<1x1x128xf32>,
    } else {
    }
    return
  }
  func.func @transform_0(%arg0: i32, %arg1: i32) -> (i32, i32) {
    %c0_i32 = arith.constant 0 : i32
    return %arg0, %arg1 : i32, i32
  }
  func.func @transform_1(%arg0: i32, %arg1: i32) -> (i32, i32) {
    %c0_i32 = arith.constant 0 : i32
    %c0_i32_0 = arith.constant 0 : i32
    return %arg1, %c0_i32 : i32, i32
  }
  func.func @transform_2(%arg0: i32, %arg1: i32) -> (i32, i32) {
    %c0_i32 = arith.constant 0 : i32
    %c0_i32_0 = arith.constant 0 : i32
    %c0_i32_1 = arith.constant 0 : i32
    return %c0_i32, %c0_i32_0 : i32, i32
  }
  func.func @transform_3(%arg0: i32, %arg1: i32) -> (i32, i32) {
    %c0_i32 = arith.constant 0 : i32
    %c0_i32_0 = arith.constant 0 : i32
    return %arg0, %c0_i32 : i32, i32
  }
  func.func @transform_4(%arg0: i32, %arg1: i32) -> (i32, i32, i32) {
    %c0_i32 = arith.constant 0 : i32
    %c0_i32_0 = arith.constant 0 : i32
    %c0_i32_1 = arith.constant 0 : i32
    return %arg0, %c0_i32, %c0_i32_0 : i32, i32, i32
  }
  func.func @transform_5(%arg0: i32, %arg1: i32) -> (i32, i32, i32) {
    %c0_i32 = arith.constant 0 : i32
    %c0_i32_0 = arith.constant 0 : i32
    %c0_i32_1 = arith.constant 0 : i32
    return %arg0, %c0_i32, %c0_i32_0 : i32, i32, i32
  }
}

module attributes {stable_mosaic.version = 11 : i64} {
  func.func @_bn_act_kernel(%arg0: i32, %arg1: memref<128x128xbf16, #tpu.memory_space<vmem>>, %arg2: memref<1x1x128xf32, #tpu.memory_space<vmem>>, %arg3: memref<1x1x128xf32, #tpu.memory_space<vmem>>, %arg4: memref<1x128xf32, #tpu.memory_space<vmem>>, %arg5: memref<1x128xf32, #tpu.memory_space<vmem>>, %arg6: memref<128x128xbf16, #tpu.memory_space<vmem>>) attributes {dimension_semantics = [#tpu.dimension_semantics<parallel>], iteration_bounds = array<i64: 1>, scalar_prefetch = 0 : i64, scratch_operands = 0 : i64, tpu.core_type = #tpu.core_type<tc>, window_params = [{transform_indices = @transform_0, window_bounds = array<i64: 128, 128>}, {pipeline_mode = #tpu.pipeline_mode<synchronous>, transform_indices = @transform_1, window_bounds = array<i64: 1, 1, 128>}, {pipeline_mode = #tpu.pipeline_mode<synchronous>, transform_indices = @transform_2, window_bounds = array<i64: 1, 1, 128>}, {pipeline_mode = #tpu.pipeline_mode<synchronous>, transform_indices = @transform_3, window_bounds = array<i64: 1, 128>}, {pipeline_mode = #tpu.pipeline_mode<synchronous>, transform_indices = @transform_4, window_bounds = array<i64: 1, 128>}, {transform_indices = @transform_5, window_bounds = array<i64: 128, 128>}]} {
    %c0 = arith.constant 0 : index
    %c0_0 = arith.constant 0 : index
    %c0_1 = arith.constant 0 : index
    %0 = vector.load %arg2[%c0, %c0_0, %c0_1] : memref<1x1x128xf32, #tpu.memory_space<vmem>>, vector<1x1x128xf32>
    %cst = arith.constant dense<0.000000e+00> : vector<1x128xf32>
    %1 = vector.multi_reduction <add>, %0, %cst [0] : vector<1x1x128xf32> to vector<1x128xf32>
    %c0_2 = arith.constant 0 : index
    %c0_3 = arith.constant 0 : index
    %c0_4 = arith.constant 0 : index
    %2 = vector.load %arg3[%c0_2, %c0_3, %c0_4] : memref<1x1x128xf32, #tpu.memory_space<vmem>>, vector<1x1x128xf32>
    %cst_5 = arith.constant dense<0.000000e+00> : vector<1x128xf32>
    %3 = vector.multi_reduction <add>, %2, %cst_5 [0] : vector<1x1x128xf32> to vector<1x128xf32>
    %cst_6 = arith.constant 7.812500e-03 : f32
    %4 = vector.broadcast %cst_6 : f32 to vector<1x128xf32>
    %5 = arith.mulf %1, %4 : vector<1x128xf32>
    %cst_7 = arith.constant 7.812500e-03 : f32
    %6 = vector.broadcast %cst_7 : f32 to vector<1x128xf32>
    %7 = arith.mulf %3, %6 : vector<1x128xf32>
    %8 = arith.mulf %5, %5 : vector<1x128xf32>
    %9 = arith.subf %7, %8 : vector<1x128xf32>
    %cst_8 = arith.constant 0.000000e+00 : f32
    %10 = vector.broadcast %cst_8 : f32 to vector<1x128xf32>
    %11 = arith.maximumf %9, %10 : vector<1x128xf32>
    %c0_9 = arith.constant 0 : index
    %c0_10 = arith.constant 0 : index
    %12 = vector.load %arg1[%c0_9, %c0_10] : memref<128x128xbf16, #tpu.memory_space<vmem>>, vector<128x128xbf16>
    %13 = arith.extf %12 : vector<128x128xbf16> to vector<128x128xf32>
    %14 = vector.broadcast %5 : vector<1x128xf32> to vector<128x128xf32>
    %15 = arith.subf %13, %14 : vector<128x128xf32>
    %cst_11 = arith.constant 9.99999974E-6 : f32
    %16 = vector.broadcast %cst_11 : f32 to vector<1x128xf32>
    %17 = arith.addf %11, %16 : vector<1x128xf32>
    %18 = math.rsqrt %17 : vector<1x128xf32>
    %19 = vector.broadcast %18 : vector<1x128xf32> to vector<128x128xf32>
    %20 = arith.mulf %15, %19 : vector<128x128xf32>
    %c0_12 = arith.constant 0 : index
    %c0_13 = arith.constant 0 : index
    %21 = vector.load %arg4[%c0_12, %c0_13] : memref<1x128xf32, #tpu.memory_space<vmem>>, vector<1x128xf32>
    %22 = vector.broadcast %21 : vector<1x128xf32> to vector<128x128xf32>
    %23 = arith.mulf %20, %22 : vector<128x128xf32>
    %c0_14 = arith.constant 0 : index
    %c0_15 = arith.constant 0 : index
    %24 = vector.load %arg5[%c0_14, %c0_15] : memref<1x128xf32, #tpu.memory_space<vmem>>, vector<1x128xf32>
    %25 = vector.broadcast %24 : vector<1x128xf32> to vector<128x128xf32>
    %26 = arith.addf %23, %25 : vector<128x128xf32>
    %cst_16 = arith.constant 0.000000e+00 : f32
    %27 = vector.broadcast %cst_16 : f32 to vector<128x128xf32>
    %28 = arith.cmpf ogt, %26, %27 : vector<128x128xf32>
    %cst_17 = arith.constant 1.000000e-01 : f32
    %29 = vector.broadcast %cst_17 : f32 to vector<128x128xf32>
    %30 = arith.mulf %29, %26 : vector<128x128xf32>
    %31 = arith.select %28, %26, %30 : vector<128x128xi1>, vector<128x128xf32>
    %32 = arith.truncf %31 : vector<128x128xf32> to vector<128x128xbf16>
    %c0_18 = arith.constant 0 : index
    %c0_19 = arith.constant 0 : index
    %33 = vector.load %arg6[%c0_18, %c0_19] : memref<128x128xbf16, #tpu.memory_space<vmem>>, vector<128x128xbf16>
    tpu.vector_store %arg6[%c0_18, %c0_19], %32 {strides = array<i32>} : memref<128x128xbf16, #tpu.memory_space<vmem>>, vector<128x128xbf16>,
    return
  }
  func.func @transform_0(%arg0: i32) -> (i32, i32) {
    %c0_i32 = arith.constant 0 : i32
    %c0_i32_0 = arith.constant 0 : i32
    return %arg0, %c0_i32 : i32, i32
  }
  func.func @transform_1(%arg0: i32) -> (i32, i32, i32) {
    %c0_i32 = arith.constant 0 : i32
    %c0_i32_0 = arith.constant 0 : i32
    %c0_i32_1 = arith.constant 0 : i32
    %c0_i32_2 = arith.constant 0 : i32
    return %c0_i32, %c0_i32_0, %c0_i32_1 : i32, i32, i32
  }
  func.func @transform_2(%arg0: i32) -> (i32, i32, i32) {
    %c0_i32 = arith.constant 0 : i32
    %c0_i32_0 = arith.constant 0 : i32
    %c0_i32_1 = arith.constant 0 : i32
    %c0_i32_2 = arith.constant 0 : i32
    return %c0_i32, %c0_i32_0, %c0_i32_1 : i32, i32, i32
  }
  func.func @transform_3(%arg0: i32) -> (i32, i32) {
    %c0_i32 = arith.constant 0 : i32
    %c0_i32_0 = arith.constant 0 : i32
    %c0_i32_1 = arith.constant 0 : i32
    return %c0_i32, %c0_i32_0 : i32, i32
  }
  func.func @transform_4(%arg0: i32) -> (i32, i32) {
    %c0_i32 = arith.constant 0 : i32
    %c0_i32_0 = arith.constant 0 : i32
    %c0_i32_1 = arith.constant 0 : i32
    return %c0_i32, %c0_i32_0 : i32, i32
  }
  func.func @transform_5(%arg0: i32) -> (i32, i32) {
    %c0_i32 = arith.constant 0 : i32
    %c0_i32_0 = arith.constant 0 : i32
    return %arg0, %c0_i32 : i32, i32
  }
}

module attributes {stable_mosaic.version = 11 : i64} {
  func.func @_pool_kernel(%arg0: i32, %arg1: memref<8x2x4x256xbf16, #tpu.memory_space<vmem>>, %arg2: memref<8x4x128xbf16, #tpu.memory_space<vmem>>) attributes {dimension_semantics = [#tpu.dimension_semantics<parallel>], iteration_bounds = array<i64: 1>, scalar_prefetch = 0 : i64, scratch_operands = 0 : i64, tpu.core_type = #tpu.core_type<tc>, window_params = [{transform_indices = @transform_0, window_bounds = array<i64: 8, 2, 4, 256>}, {transform_indices = @transform_1, window_bounds = array<i64: 8, 4, 128>}]} {
    %c0 = arith.constant 0 : index
    %c0_0 = arith.constant 0 : index
    %c0_1 = arith.constant 0 : index
    %c0_2 = arith.constant 0 : index
    %0 = vector.load %arg1[%c0, %c0_0, %c0_1, %c0_2] : memref<8x2x4x256xbf16, #tpu.memory_space<vmem>>, vector<8x2x4x256xbf16>
    %1 = arith.extf %0 : vector<8x2x4x256xbf16> to vector<8x2x4x256xf32>
    %2 = vector.extract_strided_slice %1 {offsets = [0, 0, 0, 0], sizes = [8, 1, 4, 256], strides = [1, 1, 1, 1]} : vector<8x2x4x256xf32> to vector<8x1x4x256xf32>
    %3 = vector.shape_cast %2 : vector<8x1x4x256xf32> to vector<8x4x256xf32>
    %4 = vector.extract_strided_slice %1 {offsets = [0, 1, 0, 0], sizes = [8, 1, 4, 256], strides = [1, 1, 1, 1]} : vector<8x2x4x256xf32> to vector<8x1x4x256xf32>
    %5 = vector.shape_cast %4 : vector<8x1x4x256xf32> to vector<8x4x256xf32>
    %6 = arith.maximumf %3, %5 : vector<8x4x256xf32>
    %7 = vector.extract_strided_slice %6 {offsets = [0, 0, 0], sizes = [8, 4, 128], strides = [1, 1, 1]} : vector<8x4x256xf32> to vector<8x4x128xf32>
    %8 = vector.extract_strided_slice %6 {offsets = [0, 0, 128], sizes = [8, 4, 128], strides = [1, 1, 1]} : vector<8x4x256xf32> to vector<8x4x128xf32>
    %9 = arith.maximumf %7, %8 : vector<8x4x128xf32>
    %10 = arith.truncf %9 : vector<8x4x128xf32> to vector<8x4x128xbf16>
    %c0_3 = arith.constant 0 : index
    %c0_4 = arith.constant 0 : index
    %c0_5 = arith.constant 0 : index
    %11 = vector.load %arg2[%c0_3, %c0_4, %c0_5] : memref<8x4x128xbf16, #tpu.memory_space<vmem>>, vector<8x4x128xbf16>
    tpu.vector_store %arg2[%c0_3, %c0_4, %c0_5], %10 {strides = array<i32>} : memref<8x4x128xbf16, #tpu.memory_space<vmem>>, vector<8x4x128xbf16>,
    return
  }
  func.func @transform_0(%arg0: i32) -> (i32, i32, i32, i32) {
    %c0_i32 = arith.constant 0 : i32
    %c0_i32_0 = arith.constant 0 : i32
    %c0_i32_1 = arith.constant 0 : i32
    %c0_i32_2 = arith.constant 0 : i32
    return %arg0, %c0_i32, %c0_i32_0, %c0_i32_1 : i32, i32, i32, i32
  }
  func.func @transform_1(%arg0: i32) -> (i32, i32, i32) {
    %c0_i32 = arith.constant 0 : i32
    %c0_i32_0 = arith.constant 0 : i32
    %c0_i32_1 = arith.constant 0 : i32
    return %arg0, %c0_i32, %c0_i32_0 : i32, i32, i32
  }
}

module attributes {stable_mosaic.version = 11 : i64} {
  func.func @_bn_act_kernel(%arg0: i32, %arg1: memref<32x128xbf16, #tpu.memory_space<vmem>>, %arg2: memref<1x1x128xf32, #tpu.memory_space<vmem>>, %arg3: memref<1x1x128xf32, #tpu.memory_space<vmem>>, %arg4: memref<1x128xf32, #tpu.memory_space<vmem>>, %arg5: memref<1x128xf32, #tpu.memory_space<vmem>>, %arg6: memref<32x128xbf16, #tpu.memory_space<vmem>>) attributes {dimension_semantics = [#tpu.dimension_semantics<parallel>], iteration_bounds = array<i64: 1>, scalar_prefetch = 0 : i64, scratch_operands = 0 : i64, tpu.core_type = #tpu.core_type<tc>, window_params = [{transform_indices = @transform_0, window_bounds = array<i64: 32, 128>}, {pipeline_mode = #tpu.pipeline_mode<synchronous>, transform_indices = @transform_1, window_bounds = array<i64: 1, 1, 128>}, {pipeline_mode = #tpu.pipeline_mode<synchronous>, transform_indices = @transform_2, window_bounds = array<i64: 1, 1, 128>}, {pipeline_mode = #tpu.pipeline_mode<synchronous>, transform_indices = @transform_3, window_bounds = array<i64: 1, 128>}, {pipeline_mode = #tpu.pipeline_mode<synchronous>, transform_indices = @transform_4, window_bounds = array<i64: 1, 128>}, {transform_indices = @transform_5, window_bounds = array<i64: 32, 128>}]} {
    %c0 = arith.constant 0 : index
    %c0_0 = arith.constant 0 : index
    %c0_1 = arith.constant 0 : index
    %0 = vector.load %arg2[%c0, %c0_0, %c0_1] : memref<1x1x128xf32, #tpu.memory_space<vmem>>, vector<1x1x128xf32>
    %cst = arith.constant dense<0.000000e+00> : vector<1x128xf32>
    %1 = vector.multi_reduction <add>, %0, %cst [0] : vector<1x1x128xf32> to vector<1x128xf32>
    %c0_2 = arith.constant 0 : index
    %c0_3 = arith.constant 0 : index
    %c0_4 = arith.constant 0 : index
    %2 = vector.load %arg3[%c0_2, %c0_3, %c0_4] : memref<1x1x128xf32, #tpu.memory_space<vmem>>, vector<1x1x128xf32>
    %cst_5 = arith.constant dense<0.000000e+00> : vector<1x128xf32>
    %3 = vector.multi_reduction <add>, %2, %cst_5 [0] : vector<1x1x128xf32> to vector<1x128xf32>
    %cst_6 = arith.constant 3.125000e-02 : f32
    %4 = vector.broadcast %cst_6 : f32 to vector<1x128xf32>
    %5 = arith.mulf %1, %4 : vector<1x128xf32>
    %cst_7 = arith.constant 3.125000e-02 : f32
    %6 = vector.broadcast %cst_7 : f32 to vector<1x128xf32>
    %7 = arith.mulf %3, %6 : vector<1x128xf32>
    %8 = arith.mulf %5, %5 : vector<1x128xf32>
    %9 = arith.subf %7, %8 : vector<1x128xf32>
    %cst_8 = arith.constant 0.000000e+00 : f32
    %10 = vector.broadcast %cst_8 : f32 to vector<1x128xf32>
    %11 = arith.maximumf %9, %10 : vector<1x128xf32>
    %c0_9 = arith.constant 0 : index
    %c0_10 = arith.constant 0 : index
    %12 = vector.load %arg1[%c0_9, %c0_10] : memref<32x128xbf16, #tpu.memory_space<vmem>>, vector<32x128xbf16>
    %13 = arith.extf %12 : vector<32x128xbf16> to vector<32x128xf32>
    %14 = vector.broadcast %5 : vector<1x128xf32> to vector<32x128xf32>
    %15 = arith.subf %13, %14 : vector<32x128xf32>
    %cst_11 = arith.constant 9.99999974E-6 : f32
    %16 = vector.broadcast %cst_11 : f32 to vector<1x128xf32>
    %17 = arith.addf %11, %16 : vector<1x128xf32>
    %18 = math.rsqrt %17 : vector<1x128xf32>
    %19 = vector.broadcast %18 : vector<1x128xf32> to vector<32x128xf32>
    %20 = arith.mulf %15, %19 : vector<32x128xf32>
    %c0_12 = arith.constant 0 : index
    %c0_13 = arith.constant 0 : index
    %21 = vector.load %arg4[%c0_12, %c0_13] : memref<1x128xf32, #tpu.memory_space<vmem>>, vector<1x128xf32>
    %22 = vector.broadcast %21 : vector<1x128xf32> to vector<32x128xf32>
    %23 = arith.mulf %20, %22 : vector<32x128xf32>
    %c0_14 = arith.constant 0 : index
    %c0_15 = arith.constant 0 : index
    %24 = vector.load %arg5[%c0_14, %c0_15] : memref<1x128xf32, #tpu.memory_space<vmem>>, vector<1x128xf32>
    %25 = vector.broadcast %24 : vector<1x128xf32> to vector<32x128xf32>
    %26 = arith.addf %23, %25 : vector<32x128xf32>
    %cst_16 = arith.constant 0.000000e+00 : f32
    %27 = vector.broadcast %cst_16 : f32 to vector<32x128xf32>
    %28 = arith.cmpf ogt, %26, %27 : vector<32x128xf32>
    %cst_17 = arith.constant 1.000000e-01 : f32
    %29 = vector.broadcast %cst_17 : f32 to vector<32x128xf32>
    %30 = arith.mulf %29, %26 : vector<32x128xf32>
    %31 = arith.select %28, %26, %30 : vector<32x128xi1>, vector<32x128xf32>
    %32 = arith.truncf %31 : vector<32x128xf32> to vector<32x128xbf16>
    %c0_18 = arith.constant 0 : index
    %c0_19 = arith.constant 0 : index
    %33 = vector.load %arg6[%c0_18, %c0_19] : memref<32x128xbf16, #tpu.memory_space<vmem>>, vector<32x128xbf16>
    tpu.vector_store %arg6[%c0_18, %c0_19], %32 {strides = array<i32>} : memref<32x128xbf16, #tpu.memory_space<vmem>>, vector<32x128xbf16>,
    return
  }
  func.func @transform_0(%arg0: i32) -> (i32, i32) {
    %c0_i32 = arith.constant 0 : i32
    %c0_i32_0 = arith.constant 0 : i32
    return %arg0, %c0_i32 : i32, i32
  }
  func.func @transform_1(%arg0: i32) -> (i32, i32, i32) {
    %c0_i32 = arith.constant 0 : i32
    %c0_i32_0 = arith.constant 0 : i32
    %c0_i32_1 = arith.constant 0 : i32
    %c0_i32_2 = arith.constant 0 : i32
    return %c0_i32, %c0_i32_0, %c0_i32_1 : i32, i32, i32
  }
  func.func @transform_2(%arg0: i32) -> (i32, i32, i32) {
    %c0_i32 = arith.constant 0 : i32
    %c0_i32_0 = arith.constant 0 : i32
    %c0_i32_1 = arith.constant 0 : i32
    %c0_i32_2 = arith.constant 0 : i32
    return %c0_i32, %c0_i32_0, %c0_i32_1 : i32, i32, i32
  }
  func.func @transform_3(%arg0: i32) -> (i32, i32) {
    %c0_i32 = arith.constant 0 : i32
    %c0_i32_0 = arith.constant 0 : i32
    %c0_i32_1 = arith.constant 0 : i32
    return %c0_i32, %c0_i32_0 : i32, i32
  }
  func.func @transform_4(%arg0: i32) -> (i32, i32) {
    %c0_i32 = arith.constant 0 : i32
    %c0_i32_0 = arith.constant 0 : i32
    %c0_i32_1 = arith.constant 0 : i32
    return %c0_i32, %c0_i32_0 : i32, i32
  }
  func.func @transform_5(%arg0: i32) -> (i32, i32) {
    %c0_i32 = arith.constant 0 : i32
    %c0_i32_0 = arith.constant 0 : i32
    return %arg0, %c0_i32 : i32, i32
  }
}

module attributes {stable_mosaic.version = 11 : i64} {
  func.func @_conv_mm_kernel(%arg0: i32, %arg1: i32, %arg2: memref<32x384xbf16, #tpu.memory_space<vmem>>, %arg3: memref<384x128xbf16, #tpu.memory_space<vmem>>, %arg4: memref<1x128xf32, #tpu.memory_space<vmem>>, %arg5: memref<32x128xbf16, #tpu.memory_space<vmem>>, %arg6: memref<1x1x128xf32, #tpu.memory_space<vmem>>, %arg7: memref<1x1x128xf32, #tpu.memory_space<vmem>>, %arg8: memref<32x128xf32, #tpu.memory_space<vmem>>) attributes {dimension_semantics = [#tpu.dimension_semantics<parallel>, #tpu.dimension_semantics<arbitrary>], iteration_bounds = array<i64: 1, 3>, scalar_prefetch = 0 : i64, scratch_operands = 1 : i64, tpu.core_type = #tpu.core_type<tc>, window_params = [{transform_indices = @transform_0, window_bounds = array<i64: 32, 384>}, {transform_indices = @transform_1, window_bounds = array<i64: 384, 128>}, {pipeline_mode = #tpu.pipeline_mode<synchronous>, transform_indices = @transform_2, window_bounds = array<i64: 1, 128>}, {transform_indices = @transform_3, window_bounds = array<i64: 32, 128>}, {transform_indices = @transform_4, window_bounds = array<i64: 1, 1, 128>}, {transform_indices = @transform_5, window_bounds = array<i64: 1, 1, 128>}]} {
    %c0_i32 = arith.constant 0 : i32
    %0 = arith.cmpi eq, %arg1, %c0_i32 : i32
    %1 = arith.extui %0 : i1 to i32
    %c0_i32_0 = arith.constant 0 : i32
    %2 = arith.cmpi ne, %1, %c0_i32_0 : i32
    scf.if %2 {
      %cst_9 = arith.constant 0.000000e+00 : f32
      %12 = vector.broadcast %cst_9 : f32 to vector<32x128xf32>
      %c0_10 = arith.constant 0 : index
      %c0_11 = arith.constant 0 : index
      %13 = vector.load %arg8[%c0_10, %c0_11] : memref<32x128xf32, #tpu.memory_space<vmem>>, vector<32x128xf32>
      tpu.vector_store %arg8[%c0_10, %c0_11], %12 {strides = array<i32>} : memref<32x128xf32, #tpu.memory_space<vmem>>, vector<32x128xf32>,
    } else {
    }
    %c0 = arith.constant 0 : index
    %c0_1 = arith.constant 0 : index
    %3 = vector.load %arg8[%c0, %c0_1] : memref<32x128xf32, #tpu.memory_space<vmem>>, vector<32x128xf32>
    %c0_2 = arith.constant 0 : index
    %c0_3 = arith.constant 0 : index
    %4 = vector.load %arg2[%c0_2, %c0_3] : memref<32x384xbf16, #tpu.memory_space<vmem>>, vector<32x384xbf16>
    %c0_4 = arith.constant 0 : index
    %c0_5 = arith.constant 0 : index
    %5 = vector.load %arg3[%c0_4, %c0_5] : memref<384x128xbf16, #tpu.memory_space<vmem>>, vector<384x128xbf16>
    %cst = arith.constant dense<0.000000e+00> : vector<32x128xf32>
    %6 = tpu.matmul %4, %5, %cst {dimension_numbers = #tpu.dot_dimension_numbers<[1], [0], [0], [1], [0, 0, 1, 1], [], []>} : vector<32x384xbf16>, vector<384x128xbf16>, vector<32x128xf32> -> vector<32x128xf32>
    %7 = arith.addf %3, %6 : vector<32x128xf32>
    %c0_6 = arith.constant 0 : index
    %c0_7 = arith.constant 0 : index
    %8 = vector.load %arg8[%c0_6, %c0_7] : memref<32x128xf32, #tpu.memory_space<vmem>>, vector<32x128xf32>
    tpu.vector_store %arg8[%c0_6, %c0_7], %7 {strides = array<i32>} : memref<32x128xf32, #tpu.memory_space<vmem>>, vector<32x128xf32>,
    %c2_i32 = arith.constant 2 : i32
    %9 = arith.cmpi eq, %arg1, %c2_i32 : i32
    %10 = arith.extui %9 : i1 to i32
    %c0_i32_8 = arith.constant 0 : i32
    %11 = arith.cmpi ne, %10, %c0_i32_8 : i32
    scf.if %11 {
      %c0_9 = arith.constant 0 : index
      %c0_10 = arith.constant 0 : index
      %12 = vector.load %arg8[%c0_9, %c0_10] : memref<32x128xf32, #tpu.memory_space<vmem>>, vector<32x128xf32>
      %c0_11 = arith.constant 0 : index
      %c0_12 = arith.constant 0 : index
      %13 = vector.load %arg4[%c0_11, %c0_12] : memref<1x128xf32, #tpu.memory_space<vmem>>, vector<1x128xf32>
      %14 = vector.broadcast %13 : vector<1x128xf32> to vector<32x128xf32>
      %15 = arith.addf %12, %14 : vector<32x128xf32>
      %16 = arith.truncf %15 : vector<32x128xf32> to vector<32x128xbf16>
      %c0_13 = arith.constant 0 : index
      %c0_14 = arith.constant 0 : index
      %17 = vector.load %arg5[%c0_13, %c0_14] : memref<32x128xbf16, #tpu.memory_space<vmem>>, vector<32x128xbf16>
      tpu.vector_store %arg5[%c0_13, %c0_14], %16 {strides = array<i32>} : memref<32x128xbf16, #tpu.memory_space<vmem>>, vector<32x128xbf16>,
      %cst_15 = arith.constant dense<0.000000e+00> : vector<128xf32>
      %18 = vector.multi_reduction <add>, %15, %cst_15 [0] : vector<32x128xf32> to vector<128xf32>
      %19 = vector.shape_cast %18 : vector<128xf32> to vector<1x128xf32>
      %20 = arith.mulf %15, %15 : vector<32x128xf32>
      %cst_16 = arith.constant dense<0.000000e+00> : vector<128xf32>
      %21 = vector.multi_reduction <add>, %20, %cst_16 [0] : vector<32x128xf32> to vector<128xf32>
      %22 = vector.shape_cast %21 : vector<128xf32> to vector<1x128xf32>
      %23 = vector.shape_cast %19 : vector<1x128xf32> to vector<1x1x128xf32>
      %c0_17 = arith.constant 0 : index
      %c0_18 = arith.constant 0 : index
      %c0_19 = arith.constant 0 : index
      %24 = vector.load %arg6[%c0_17, %c0_18, %c0_19] : memref<1x1x128xf32, #tpu.memory_space<vmem>>, vector<1x1x128xf32>
      tpu.vector_store %arg6[%c0_17, %c0_18, %c0_19], %23 {strides = array<i32>} : memref<1x1x128xf32, #tpu.memory_space<vmem>>, vector<1x1x128xf32>,
      %25 = vector.shape_cast %22 : vector<1x128xf32> to vector<1x1x128xf32>
      %c0_20 = arith.constant 0 : index
      %c0_21 = arith.constant 0 : index
      %c0_22 = arith.constant 0 : index
      %26 = vector.load %arg7[%c0_20, %c0_21, %c0_22] : memref<1x1x128xf32, #tpu.memory_space<vmem>>, vector<1x1x128xf32>
      tpu.vector_store %arg7[%c0_20, %c0_21, %c0_22], %25 {strides = array<i32>} : memref<1x1x128xf32, #tpu.memory_space<vmem>>, vector<1x1x128xf32>,
    } else {
    }
    return
  }
  func.func @transform_0(%arg0: i32, %arg1: i32) -> (i32, i32) {
    %c0_i32 = arith.constant 0 : i32
    return %arg0, %arg1 : i32, i32
  }
  func.func @transform_1(%arg0: i32, %arg1: i32) -> (i32, i32) {
    %c0_i32 = arith.constant 0 : i32
    %c0_i32_0 = arith.constant 0 : i32
    return %arg1, %c0_i32 : i32, i32
  }
  func.func @transform_2(%arg0: i32, %arg1: i32) -> (i32, i32) {
    %c0_i32 = arith.constant 0 : i32
    %c0_i32_0 = arith.constant 0 : i32
    %c0_i32_1 = arith.constant 0 : i32
    return %c0_i32, %c0_i32_0 : i32, i32
  }
  func.func @transform_3(%arg0: i32, %arg1: i32) -> (i32, i32) {
    %c0_i32 = arith.constant 0 : i32
    %c0_i32_0 = arith.constant 0 : i32
    return %arg0, %c0_i32 : i32, i32
  }
  func.func @transform_4(%arg0: i32, %arg1: i32) -> (i32, i32, i32) {
    %c0_i32 = arith.constant 0 : i32
    %c0_i32_0 = arith.constant 0 : i32
    %c0_i32_1 = arith.constant 0 : i32
    return %arg0, %c0_i32, %c0_i32_0 : i32, i32, i32
  }
  func.func @transform_5(%arg0: i32, %arg1: i32) -> (i32, i32, i32) {
    %c0_i32 = arith.constant 0 : i32
    %c0_i32_0 = arith.constant 0 : i32
    %c0_i32_1 = arith.constant 0 : i32
    return %arg0, %c0_i32, %c0_i32_0 : i32, i32, i32
  }
}

module attributes {stable_mosaic.version = 11 : i64} {
  func.func @_bn_act_kernel(%arg0: i32, %arg1: memref<32x128xbf16, #tpu.memory_space<vmem>>, %arg2: memref<1x1x128xf32, #tpu.memory_space<vmem>>, %arg3: memref<1x1x128xf32, #tpu.memory_space<vmem>>, %arg4: memref<1x128xf32, #tpu.memory_space<vmem>>, %arg5: memref<1x128xf32, #tpu.memory_space<vmem>>, %arg6: memref<32x128xbf16, #tpu.memory_space<vmem>>, %arg7: memref<32x128xbf16, #tpu.memory_space<vmem>>) attributes {dimension_semantics = [#tpu.dimension_semantics<parallel>], iteration_bounds = array<i64: 1>, scalar_prefetch = 0 : i64, scratch_operands = 0 : i64, tpu.core_type = #tpu.core_type<tc>, window_params = [{transform_indices = @transform_0, window_bounds = array<i64: 32, 128>}, {pipeline_mode = #tpu.pipeline_mode<synchronous>, transform_indices = @transform_1, window_bounds = array<i64: 1, 1, 128>}, {pipeline_mode = #tpu.pipeline_mode<synchronous>, transform_indices = @transform_2, window_bounds = array<i64: 1, 1, 128>}, {pipeline_mode = #tpu.pipeline_mode<synchronous>, transform_indices = @transform_3, window_bounds = array<i64: 1, 128>}, {pipeline_mode = #tpu.pipeline_mode<synchronous>, transform_indices = @transform_4, window_bounds = array<i64: 1, 128>}, {transform_indices = @transform_5, window_bounds = array<i64: 32, 128>}, {transform_indices = @transform_6, window_bounds = array<i64: 32, 128>}]} {
    %c0 = arith.constant 0 : index
    %c0_0 = arith.constant 0 : index
    %c0_1 = arith.constant 0 : index
    %0 = vector.load %arg2[%c0, %c0_0, %c0_1] : memref<1x1x128xf32, #tpu.memory_space<vmem>>, vector<1x1x128xf32>
    %cst = arith.constant dense<0.000000e+00> : vector<1x128xf32>
    %1 = vector.multi_reduction <add>, %0, %cst [0] : vector<1x1x128xf32> to vector<1x128xf32>
    %c0_2 = arith.constant 0 : index
    %c0_3 = arith.constant 0 : index
    %c0_4 = arith.constant 0 : index
    %2 = vector.load %arg3[%c0_2, %c0_3, %c0_4] : memref<1x1x128xf32, #tpu.memory_space<vmem>>, vector<1x1x128xf32>
    %cst_5 = arith.constant dense<0.000000e+00> : vector<1x128xf32>
    %3 = vector.multi_reduction <add>, %2, %cst_5 [0] : vector<1x1x128xf32> to vector<1x128xf32>
    %cst_6 = arith.constant 3.125000e-02 : f32
    %4 = vector.broadcast %cst_6 : f32 to vector<1x128xf32>
    %5 = arith.mulf %1, %4 : vector<1x128xf32>
    %cst_7 = arith.constant 3.125000e-02 : f32
    %6 = vector.broadcast %cst_7 : f32 to vector<1x128xf32>
    %7 = arith.mulf %3, %6 : vector<1x128xf32>
    %8 = arith.mulf %5, %5 : vector<1x128xf32>
    %9 = arith.subf %7, %8 : vector<1x128xf32>
    %cst_8 = arith.constant 0.000000e+00 : f32
    %10 = vector.broadcast %cst_8 : f32 to vector<1x128xf32>
    %11 = arith.maximumf %9, %10 : vector<1x128xf32>
    %c0_9 = arith.constant 0 : index
    %c0_10 = arith.constant 0 : index
    %12 = vector.load %arg1[%c0_9, %c0_10] : memref<32x128xbf16, #tpu.memory_space<vmem>>, vector<32x128xbf16>
    %13 = arith.extf %12 : vector<32x128xbf16> to vector<32x128xf32>
    %14 = vector.broadcast %5 : vector<1x128xf32> to vector<32x128xf32>
    %15 = arith.subf %13, %14 : vector<32x128xf32>
    %cst_11 = arith.constant 9.99999974E-6 : f32
    %16 = vector.broadcast %cst_11 : f32 to vector<1x128xf32>
    %17 = arith.addf %11, %16 : vector<1x128xf32>
    %18 = math.rsqrt %17 : vector<1x128xf32>
    %19 = vector.broadcast %18 : vector<1x128xf32> to vector<32x128xf32>
    %20 = arith.mulf %15, %19 : vector<32x128xf32>
    %c0_12 = arith.constant 0 : index
    %c0_13 = arith.constant 0 : index
    %21 = vector.load %arg4[%c0_12, %c0_13] : memref<1x128xf32, #tpu.memory_space<vmem>>, vector<1x128xf32>
    %22 = vector.broadcast %21 : vector<1x128xf32> to vector<32x128xf32>
    %23 = arith.mulf %20, %22 : vector<32x128xf32>
    %c0_14 = arith.constant 0 : index
    %c0_15 = arith.constant 0 : index
    %24 = vector.load %arg5[%c0_14, %c0_15] : memref<1x128xf32, #tpu.memory_space<vmem>>, vector<1x128xf32>
    %25 = vector.broadcast %24 : vector<1x128xf32> to vector<32x128xf32>
    %26 = arith.addf %23, %25 : vector<32x128xf32>
    %cst_16 = arith.constant 0.000000e+00 : f32
    %27 = vector.broadcast %cst_16 : f32 to vector<32x128xf32>
    %28 = arith.cmpf ogt, %26, %27 : vector<32x128xf32>
    %cst_17 = arith.constant 1.000000e-01 : f32
    %29 = vector.broadcast %cst_17 : f32 to vector<32x128xf32>
    %30 = arith.mulf %29, %26 : vector<32x128xf32>
    %31 = arith.select %28, %26, %30 : vector<32x128xi1>, vector<32x128xf32>
    %c0_18 = arith.constant 0 : index
    %c0_19 = arith.constant 0 : index
    %32 = vector.load %arg6[%c0_18, %c0_19] : memref<32x128xbf16, #tpu.memory_space<vmem>>, vector<32x128xbf16>
    %33 = arith.extf %32 : vector<32x128xbf16> to vector<32x128xf32>
    %34 = arith.addf %31, %33 : vector<32x128xf32>
    %35 = arith.truncf %34 : vector<32x128xf32> to vector<32x128xbf16>
    %c0_20 = arith.constant 0 : index
    %c0_21 = arith.constant 0 : index
    %36 = vector.load %arg7[%c0_20, %c0_21] : memref<32x128xbf16, #tpu.memory_space<vmem>>, vector<32x128xbf16>
    tpu.vector_store %arg7[%c0_20, %c0_21], %35 {strides = array<i32>} : memref<32x128xbf16, #tpu.memory_space<vmem>>, vector<32x128xbf16>,
    return
  }
  func.func @transform_0(%arg0: i32) -> (i32, i32) {
    %c0_i32 = arith.constant 0 : i32
    %c0_i32_0 = arith.constant 0 : i32
    return %arg0, %c0_i32 : i32, i32
  }
  func.func @transform_1(%arg0: i32) -> (i32, i32, i32) {
    %c0_i32 = arith.constant 0 : i32
    %c0_i32_0 = arith.constant 0 : i32
    %c0_i32_1 = arith.constant 0 : i32
    %c0_i32_2 = arith.constant 0 : i32
    return %c0_i32, %c0_i32_0, %c0_i32_1 : i32, i32, i32
  }
  func.func @transform_2(%arg0: i32) -> (i32, i32, i32) {
    %c0_i32 = arith.constant 0 : i32
    %c0_i32_0 = arith.constant 0 : i32
    %c0_i32_1 = arith.constant 0 : i32
    %c0_i32_2 = arith.constant 0 : i32
    return %c0_i32, %c0_i32_0, %c0_i32_1 : i32, i32, i32
  }
  func.func @transform_3(%arg0: i32) -> (i32, i32) {
    %c0_i32 = arith.constant 0 : i32
    %c0_i32_0 = arith.constant 0 : i32
    %c0_i32_1 = arith.constant 0 : i32
    return %c0_i32, %c0_i32_0 : i32, i32
  }
  func.func @transform_4(%arg0: i32) -> (i32, i32) {
    %c0_i32 = arith.constant 0 : i32
    %c0_i32_0 = arith.constant 0 : i32
    %c0_i32_1 = arith.constant 0 : i32
    return %c0_i32, %c0_i32_0 : i32, i32
  }
  func.func @transform_5(%arg0: i32) -> (i32, i32) {
    %c0_i32 = arith.constant 0 : i32
    %c0_i32_0 = arith.constant 0 : i32
    return %arg0, %c0_i32 : i32, i32
  }
  func.func @transform_6(%arg0: i32) -> (i32, i32) {
    %c0_i32 = arith.constant 0 : i32
    %c0_i32_0 = arith.constant 0 : i32
    return %arg0, %c0_i32 : i32, i32
  }
}

module attributes {stable_mosaic.version = 11 : i64} {
  func.func @_pool_kernel(%arg0: i32, %arg1: memref<4x2x2x256xbf16, #tpu.memory_space<vmem>>, %arg2: memref<4x2x128xbf16, #tpu.memory_space<vmem>>) attributes {dimension_semantics = [#tpu.dimension_semantics<parallel>], iteration_bounds = array<i64: 1>, scalar_prefetch = 0 : i64, scratch_operands = 0 : i64, tpu.core_type = #tpu.core_type<tc>, window_params = [{transform_indices = @transform_0, window_bounds = array<i64: 4, 2, 2, 256>}, {transform_indices = @transform_1, window_bounds = array<i64: 4, 2, 128>}]} {
    %c0 = arith.constant 0 : index
    %c0_0 = arith.constant 0 : index
    %c0_1 = arith.constant 0 : index
    %c0_2 = arith.constant 0 : index
    %0 = vector.load %arg1[%c0, %c0_0, %c0_1, %c0_2] : memref<4x2x2x256xbf16, #tpu.memory_space<vmem>>, vector<4x2x2x256xbf16>
    %1 = arith.extf %0 : vector<4x2x2x256xbf16> to vector<4x2x2x256xf32>
    %2 = vector.extract_strided_slice %1 {offsets = [0, 0, 0, 0], sizes = [4, 1, 2, 256], strides = [1, 1, 1, 1]} : vector<4x2x2x256xf32> to vector<4x1x2x256xf32>
    %3 = vector.shape_cast %2 : vector<4x1x2x256xf32> to vector<4x2x256xf32>
    %4 = vector.extract_strided_slice %1 {offsets = [0, 1, 0, 0], sizes = [4, 1, 2, 256], strides = [1, 1, 1, 1]} : vector<4x2x2x256xf32> to vector<4x1x2x256xf32>
    %5 = vector.shape_cast %4 : vector<4x1x2x256xf32> to vector<4x2x256xf32>
    %6 = arith.addf %3, %5 : vector<4x2x256xf32>
    %7 = vector.extract_strided_slice %6 {offsets = [0, 0, 0], sizes = [4, 2, 128], strides = [1, 1, 1]} : vector<4x2x256xf32> to vector<4x2x128xf32>
    %8 = vector.extract_strided_slice %6 {offsets = [0, 0, 128], sizes = [4, 2, 128], strides = [1, 1, 1]} : vector<4x2x256xf32> to vector<4x2x128xf32>
    %9 = arith.addf %7, %8 : vector<4x2x128xf32>
    %cst = arith.constant 2.500000e-01 : f32
    %10 = vector.broadcast %cst : f32 to vector<4x2x128xf32>
    %11 = arith.mulf %9, %10 : vector<4x2x128xf32>
    %12 = arith.truncf %11 : vector<4x2x128xf32> to vector<4x2x128xbf16>
    %c0_3 = arith.constant 0 : index
    %c0_4 = arith.constant 0 : index
    %c0_5 = arith.constant 0 : index
    %13 = vector.load %arg2[%c0_3, %c0_4, %c0_5] : memref<4x2x128xbf16, #tpu.memory_space<vmem>>, vector<4x2x128xbf16>
    tpu.vector_store %arg2[%c0_3, %c0_4, %c0_5], %12 {strides = array<i32>} : memref<4x2x128xbf16, #tpu.memory_space<vmem>>, vector<4x2x128xbf16>,
    return
  }
  func.func @transform_0(%arg0: i32) -> (i32, i32, i32, i32) {
    %c0_i32 = arith.constant 0 : i32
    %c0_i32_0 = arith.constant 0 : i32
    %c0_i32_1 = arith.constant 0 : i32
    %c0_i32_2 = arith.constant 0 : i32
    return %arg0, %c0_i32, %c0_i32_0, %c0_i32_1 : i32, i32, i32, i32
  }
  func.func @transform_1(%arg0: i32) -> (i32, i32, i32) {
    %c0_i32 = arith.constant 0 : i32
    %c0_i32_0 = arith.constant 0 : i32
    %c0_i32_1 = arith.constant 0 : i32
    return %arg0, %c0_i32, %c0_i32_0 : i32, i32, i32
  }
}

module attributes {stable_mosaic.version = 11 : i64} {
  func.func @_fc_head_kernel(%arg0: memref<2x128xbf16, #tpu.memory_space<vmem>>, %arg1: memref<128x128xbf16, #tpu.memory_space<vmem>>, %arg2: memref<1x128xf32, #tpu.memory_space<vmem>>, %arg3: memref<128x128xbf16, #tpu.memory_space<vmem>>, %arg4: memref<1x128xf32, #tpu.memory_space<vmem>>, %arg5: memref<2x128xf32, #tpu.memory_space<vmem>>) attributes {dimension_semantics = [], scalar_prefetch = 0 : i64, scratch_operands = 0 : i64, tpu.core_type = #tpu.core_type<tc>} {
    %c0 = arith.constant 0 : index
    %c0_0 = arith.constant 0 : index
    %0 = vector.load %arg0[%c0, %c0_0] : memref<2x128xbf16, #tpu.memory_space<vmem>>, vector<2x128xbf16>
    %c0_1 = arith.constant 0 : index
    %c0_2 = arith.constant 0 : index
    %1 = vector.load %arg1[%c0_1, %c0_2] : memref<128x128xbf16, #tpu.memory_space<vmem>>, vector<128x128xbf16>
    %cst = arith.constant dense<0.000000e+00> : vector<2x128xf32>
    %2 = tpu.matmul %0, %1, %cst {dimension_numbers = #tpu.dot_dimension_numbers<[1], [0], [0], [1], [0, 0, 1, 1], [], []>} : vector<2x128xbf16>, vector<128x128xbf16>, vector<2x128xf32> -> vector<2x128xf32>
    %c0_3 = arith.constant 0 : index
    %c0_4 = arith.constant 0 : index
    %3 = vector.load %arg2[%c0_3, %c0_4] : memref<1x128xf32, #tpu.memory_space<vmem>>, vector<1x128xf32>
    %4 = vector.broadcast %3 : vector<1x128xf32> to vector<2x128xf32>
    %5 = arith.addf %2, %4 : vector<2x128xf32>
    %cst_5 = arith.constant 0.000000e+00 : f32
    %6 = vector.broadcast %cst_5 : f32 to vector<2x128xf32>
    %7 = arith.cmpf ogt, %5, %6 : vector<2x128xf32>
    %cst_6 = arith.constant 1.000000e-01 : f32
    %8 = vector.broadcast %cst_6 : f32 to vector<2x128xf32>
    %9 = arith.mulf %8, %5 : vector<2x128xf32>
    %10 = arith.select %7, %5, %9 : vector<2x128xi1>, vector<2x128xf32>
    %11 = arith.truncf %10 : vector<2x128xf32> to vector<2x128xbf16>
    %c0_7 = arith.constant 0 : index
    %c0_8 = arith.constant 0 : index
    %12 = vector.load %arg3[%c0_7, %c0_8] : memref<128x128xbf16, #tpu.memory_space<vmem>>, vector<128x128xbf16>
    %cst_9 = arith.constant dense<0.000000e+00> : vector<2x128xf32>
    %13 = tpu.matmul %11, %12, %cst_9 {dimension_numbers = #tpu.dot_dimension_numbers<[1], [0], [0], [1], [0, 0, 1, 1], [], []>} : vector<2x128xbf16>, vector<128x128xbf16>, vector<2x128xf32> -> vector<2x128xf32>
    %c0_10 = arith.constant 0 : index
    %c0_11 = arith.constant 0 : index
    %14 = vector.load %arg4[%c0_10, %c0_11] : memref<1x128xf32, #tpu.memory_space<vmem>>, vector<1x128xf32>
    %15 = vector.broadcast %14 : vector<1x128xf32> to vector<2x128xf32>
    %16 = arith.addf %13, %15 : vector<2x128xf32>
    %c0_12 = arith.constant 0 : index
    %c0_13 = arith.constant 0 : index
    %17 = vector.load %arg5[%c0_12, %c0_13] : memref<2x128xf32, #tpu.memory_space<vmem>>, vector<2x128xf32>
    tpu.vector_store %arg5[%c0_12, %c0_13], %16 {strides = array<i32>} : memref<2x128xf32, #tpu.memory_space<vmem>>, vector<2x128xf32>,
    return
  }
}

</mosaic_0001>

<bundles_post_ra>
// kernel: yolo_forward.15
= control target key start
LH: loop header
LB: loop body
LE: loop exit
PB: predicated region body
PF: predicated region fallthrough
CT: control target
= control target key end

     0   :  { %s908_s18 = smov 0   ;;  %s1184_s0 = inlined_call_operand.vmem [shape: bf16[512,128], index: 0, kind: input, shape index: {}]   ;;  %s1185_s1 = inlined_call_operand.vmem [shape: f32[2,1,128], index: 1, kind: input, shape index: {}]   ;;  %s1186_s2 = inlined_call_operand.vmem [shape: f32[2,1,128], index: 2, kind: input, shape index: {}]   ;;  %s1187_s3 = inlined_call_operand.vmem [shape: f32[1,128], index: 3, kind: input, shape index: {}]   ;;  %s1188_s4 = inlined_call_operand.vmem [shape: f32[1,128], index: 4, kind: input, shape index: {}]   ;;  %s1189_s5 = inlined_call_operand.vmem [shape: bf16[512,128], index: 5, kind: output, shape index: {}]  }
   0x1 LB: > { %s673_s19 = sadd.s32 4294967295, %s876_s18   ;;  %p677_p0 = scmp.ge.s32.totalorder %s876_s18, 1  ;;  %s876_s18 = sphi %s908_s18, %s15_s18  }
   0x2   : > { %p188_p1 = scmp.lt.s32.totalorder %s876_s18, 3 }
   0x4   : > { %p189_p2 = pnand %p677_p0, %p188_p1 }
   0x5   : > { %s678_s20 = sshll.u32 (!%p189_p2), %s673_s19, 5 }
   0x6   : > { %192 = sbr.rel (%p189_p2) target bundleno = 109 (0x6d), region = 40  ;;  %p217_p3 = scmp.lt.s32.totalorder (!%p189_p2), %s678_s20, 63 }
   0xb   : > { %v228_v0 = vld [vmem:[%s1185_s1] sm:$0x1]  ;;  %v229_v1 = vld [vmem:[%s1185_s1 + $0x1] sm:$0x1]  ;;  %vm230_vm0 = vcmask 1040384   ;;  %s1193_s20 = smov (!%p217_p3, %s678_s20), 63 }
   0xc   : > { %v231_v2 = vsel %vm230_vm0, %v228_v0, 0.0  ;;  %v232_v3 = vsel %vm230_vm0, %v229_v1, 0.0  ;;  %v234_v4 = vld [vmem:[%s1186_s2] sm:$0x1]  ;;  %v235_v6 = vld [vmem:[%s1186_s2 + $0x1] sm:$0x1] }
   0xd   : > { %v233_v5 = vadd.f32 %v232_v3, %v231_v2  ;;  %v236_v7 = vsel %vm230_vm0, %v234_v4, 0.0  ;;  %v237_v8 = vsel %vm230_vm0, %v235_v6, 0.0  ;;  %s679_s29 = sshll.u32 %s1193_s20, 2 }
   0xe   : > { %v238_v9 = vadd.f32 %v237_v8, %v236_v7  ;;  %s936_s7 = scalar_lea.vmem %s1184_s0, %s679_s29  ;;  %s1060_s14 = scalar_lea.vmem %s1189_s5, %s679_s29 }
   0xf   : > { %v239_v10 = vmul.f32 0.001953125, %v233_v5  ;;  %v685_v16 = vld [vmem:[%s936_s7] sm:$0xff]   ;;  %v828_v17 = vld [vmem:[%s936_s7 + $0x8] sm:$0xff]   ;;  %v829_v18 = vld [vmem:[%s936_s7 + $0x10] sm:$0xff]  }
  0x10   : > { %v240_v11 = vmul.f32 0.001953125, %v238_v9  ;;  %v830_v19 = vld [vmem:[%s936_s7 + $0x18] sm:$0xff]   ;;  %v686_v20 = vunpack.c.l.bf16 %v685_v16  ;;  %v687_v22 = vunpack.c.h.bf16 %v685_v16  ;;  %v690_v23 = vunpack.c.l.bf16 %v828_v17  ;;  %v831_v25 = vld [vmem:[%s936_s7 + $0x20] sm:$0xff]   ;;  %v832_v34 = vld [vmem:[%s936_s7 + $0x28] sm:$0xff]  }
  0x11   : > { %v241_v12 = vmul.f32 %v239_v10, %v239_v10  ;;  %v942_v21 = vperm.slane %v239_v10, 0  ;;  %v691_v24 = vunpack.c.h.bf16 %v828_v17  ;;  %v694_v26 = vunpack.c.l.bf16 %v829_v18  ;;  %v833_v35 = vld [vmem:[%s936_s7 + $0x30] sm:$0xff]   ;;  %v834_v44 = vld [vmem:[%s936_s7 + $0x38] sm:$0xff]   ;;  %v835_v49 = vld [vmem:[%s936_s7 + $0x40] sm:$0xff]  }
  0x12   : > { %v695_v27 = vunpack.c.h.bf16 %v829_v18  ;;  %v698_v28 = vunpack.c.l.bf16 %v830_v19  ;;  %v699_v30 = vunpack.c.h.bf16 %v830_v19  ;;  %v702_v33 = vunpack.c.l.bf16 %v831_v25  ;;  %v836_v50 = vld [vmem:[%s936_s7 + $0x48] sm:$0xff]   ;;  %v837_v53 = vld [vmem:[%s936_s7 + $0x50] sm:$0xff]   ;;  %v838_v58 = vld [vmem:[%s936_s7 + $0x58] sm:$0xff]  }
  0x13   : > { %v242_v13 = vsub.f32 %v240_v11, %v241_v12  ;;  %v309_v31 = vsub.f32 %v686_v20, %v942_v21  ;;  %v310_v36 = vsub.f32 %v687_v22, %v942_v21  ;;  %v311_v37 = vsub.f32 %v690_v23, %v942_v21  ;;  %v1004_v17 = vld [vmem:[%s1187_s3] ss:$0 sm:$0xff] }
  0x14   : > { %v312_v38 = vsub.f32 %v691_v24, %v942_v21  ;;  %v703_v39 = vunpack.c.h.bf16 %v831_v25  ;;  %v313_v41 = vsub.f32 %v694_v26, %v942_v21  ;;  %v314_v42 = vsub.f32 %v695_v27, %v942_v21  ;;  %v1016_v22 = vld [vmem:[%s936_s7 + $0x60] sm:$0xff]  }
  0x15   : > { %v243_v14 = vmax.f32 %v242_v13, 0.0  ;;  %v315_v43 = vsub.f32 %v698_v28, %v942_v21  ;;  %v316_v45 = vsub.f32 %v699_v30, %v942_v21  ;;  %v706_v46 = vunpack.c.l.bf16 %v832_v34 }
  0x16   : > { %v707_v47 = vunpack.c.h.bf16 %v832_v34  ;;  %v710_v48 = vunpack.c.l.bf16 %v833_v35  ;;  %v959_v52 = vsub.f32 %v702_v33, %v942_v21  ;;  %v963_v54 = vsub.f32 %v703_v39, %v942_v21 }
  0x17   : > { %v341_v15 = vadd.f32 1e-05, %v243_v14  ;;  %v711_v55 = vunpack.c.h.bf16 %v833_v35  ;;  %v714_v56 = vunpack.c.l.bf16 %v834_v44  ;;  %v715_v57 = vunpack.c.h.bf16 %v834_v44 }
  0x18   : > { %v718_v60 = vunpack.c.l.bf16 %v835_v49  ;;  %v719_v61 = vunpack.c.h.bf16 %v835_v49  ;;  %v722_v62 = vunpack.c.l.bf16 %v836_v50  ;;  %v971_v0 = vsub.f32 %v706_v46, %v942_v21 }
  0x19   : > { %868 = vrsqrt.f32 %v341_v15  ;;  %vm348_vm1 = vweird.f32 %v341_v15  ;;  %v723_v1 = vunpack.c.h.bf16 %v836_v50  ;;  %v726_v2 = vunpack.c.l.bf16 %v837_v53 }
  0x1a   : > { %v727_v3 = vunpack.c.h.bf16 %v837_v53  ;;  %v974_v5 = vsub.f32 %v707_v47, %v942_v21  ;;  %v730_v6 = vunpack.c.l.bf16 %v838_v58  ;;  %v731_v7 = vunpack.c.h.bf16 %v838_v58 }
  0x1b   : > { %v977_v8 = vsub.f32 %v710_v48, %v942_v21  ;;  %v980_v9 = vsub.f32 %v711_v55, %v942_v21  ;;  %v983_v10 = vsub.f32 %v714_v56, %v942_v21  ;;  %v986_v11 = vsub.f32 %v715_v57, %v942_v21 }
  0x1c   : > { %v991_v13 = vsub.f32 %v718_v60, %v942_v21  ;;  %v994_v14 = vsub.f32 %v719_v61, %v942_v21  ;;  %v1007_v18 = vsub.f32 %v723_v1, %v942_v21  ;;  %v1010_v19 = vsub.f32 %v726_v2, %v942_v21 }
  0x1d   : > { %v1013_v20 = vsub.f32 %v727_v3, %v942_v21  ;;  %v1019_v23 = vsub.f32 %v730_v6, %v942_v21  ;;  %v1022_v24 = vsub.f32 %v731_v7, %v942_v21  ;;  %v734_v25 = vunpack.c.l.bf16 %v1016_v22 }
  0x1e   : > { %v735_v26 = vunpack.c.h.bf16 %v1016_v22 }
  0x1f   : > { %v869_v29 = vpop.eup %868 }
  0x20   : > { %v343_v32 = vmul.f32 %v869_v29, %v341_v15  ;;  %vm349_vm2 = vweird.f32 %v869_v29  ;;  %v997_v15 = vsub.f32 %v722_v62, %v942_v21 }
  0x21   : > { %vm966_vm3 = vmor %vm348_vm1, %vm349_vm2 }
  0x22   : > { %v344_v40 = vmul.f32 %v869_v29, %v343_v32 }
  0x24   : > { %v345_v51 = vmul.f32 0.5, %v344_v40 }
  0x26   : > { %v346_v59 = vsub.f32 1.5, %v345_v51 }
  0x28   : > { %v347_v4 = vmul.f32 %v869_v29, %v346_v59 }
  0x2a   : > { %v351_v12 = vsel %vm966_vm3, %v869_v29, %v347_v4  ;;  %v1031_v29 = vld [vmem:[%s1188_s4] ss:$0 sm:$0xff] }
  0x2b   : > { %v999_v16 = vperm.slane %v351_v12, 0 }
  0x2d   : > { %v353_v27 = vmul.f32 %v999_v16, %v309_v31  ;;  %v354_v28 = vmul.f32 %v999_v16, %v310_v36  ;;  %v355_v30 = vmul.f32 %v999_v16, %v311_v37  ;;  %v356_v32 = vmul.f32 %v999_v16, %v312_v38 }
  0x2e   : > { %v357_v33 = vmul.f32 %v999_v16, %v313_v41  ;;  %v358_v34 = vmul.f32 %v999_v16, %v314_v42  ;;  %v359_v35 = vmul.f32 %v999_v16, %v315_v43  ;;  %v360_v39 = vmul.f32 %v999_v16, %v316_v45 }
  0x2f   : > { %v389_v31 = vmul.f32 %v1004_v17, %v353_v27  ;;  %v390_v36 = vmul.f32 %v1004_v17, %v354_v28  ;;  %v391_v40 = vmul.f32 %v1004_v17, %v355_v30  ;;  %v392_v44 = vmul.f32 %v1004_v17, %v356_v32 }
  0x30   : > { %v393_v37 = vmul.f32 %v1004_v17, %v357_v33  ;;  %v394_v38 = vmul.f32 %v1004_v17, %v358_v34  ;;  %v395_v41 = vmul.f32 %v1004_v17, %v359_v35  ;;  %v396_v42 = vmul.f32 %v1004_v17, %v360_v39 }
  0x31   : > { %v425_v43 = vadd.f32 %v1031_v29, %v389_v31  ;;  %v426_v45 = vadd.f32 %v1031_v29, %v390_v36  ;;  %v427_v46 = vadd.f32 %v1031_v29, %v391_v40  ;;  %v428_v47 = vadd.f32 %v1031_v29, %v392_v44 }
  0x32   : > { %v429_v48 = vadd.f32 %v1031_v29, %v393_v37  ;;  %v430_v49 = vadd.f32 %v1031_v29, %v394_v38  ;;  %v431_v50 = vadd.f32 %v1031_v29, %v395_v41  ;;  %v432_v51 = vadd.f32 %v1031_v29, %v396_v42 }
  0x33   : > { %vm457_vm4 = vcmp.gt.f32.partialorder %v425_v43, 0.0  ;;  %vm458_vm5 = vcmp.gt.f32.partialorder %v426_v45, 0.0  ;;  %v489_v53 = vmul.f32 0.1, %v425_v43  ;;  %v490_v55 = vmul.f32 0.1, %v426_v45 }
  0x34   : > { %vm459_vm6 = vcmp.gt.f32.partialorder %v427_v46, 0.0  ;;  %vm460_vm7 = vcmp.gt.f32.partialorder %v428_v47, 0.0  ;;  %v491_v56 = vmul.f32 0.1, %v427_v46  ;;  %v492_v57 = vmul.f32 0.1, %v428_v47 }
  0x35   : > { %v521_v58 = vsel %vm457_vm4, %v425_v43, %v489_v53  ;;  %v522_v59 = vsel %vm458_vm5, %v426_v45, %v490_v55  ;;  %vm461_vm8 = vcmp.gt.f32.partialorder %v429_v48, 0.0  ;;  %vm462_vm9 = vcmp.gt.f32.partialorder %v430_v49, 0.0 }
  0x36   : > { %v751_v60 = vpack.c.bf16 %v522_v59, %v521_v58  ;;  %v523_v61 = vsel %vm459_vm6, %v427_v46, %v491_v56  ;;  %v524_v62 = vsel %vm460_vm7, %v428_v47, %v492_v57  ;;  %v493_v63 = vmul.f32 0.1, %v429_v48 }
  0x37   : > { %v756_v1 = vpack.c.bf16 %v524_v62, %v523_v61  ;;  %v494_v2 = vmul.f32 0.1, %v430_v49  ;;  %vm463_vm10 = vcmp.gt.f32.partialorder %v431_v50, 0.0  ;;  %vm464_vm11 = vcmp.gt.f32.partialorder %v432_v51, 0.0 }
  0x38   : > { %752 = vst [vmem:[%s1060_s14] sm:$0xff] %v751_v60   ;;  %v525_v3 = vsel %vm461_vm8, %v429_v48, %v493_v63  ;;  %v495_v4 = vmul.f32 0.1, %v431_v50  ;;  %v496_v6 = vmul.f32 0.1, %v432_v51  ;;  %v361_v7 = vmul.f32 %v999_v16, %v959_v52 }
  0x39   : > { %843 = vst [vmem:[%s1060_s14 + $0x8] sm:$0xff] %v756_v1   ;;  %v526_v12 = vsel %vm462_vm9, %v430_v49, %v494_v2  ;;  %v362_v27 = vmul.f32 %v999_v16, %v963_v54  ;;  %v363_v28 = vmul.f32 %v999_v16, %v971_v0  ;;  %v364_v30 = vmul.f32 %v999_v16, %v974_v5 }
  0x3a   : > { %v761_v32 = vpack.c.bf16 %v526_v12, %v525_v3  ;;  %v527_v33 = vsel %vm463_vm10, %v431_v50, %v495_v4  ;;  %v528_v34 = vsel %vm464_vm11, %v432_v51, %v496_v6  ;;  %v397_v35 = vmul.f32 %v1004_v17, %v361_v7 }
  0x3b   : > { %v766_v39 = vpack.c.bf16 %v528_v34, %v527_v33  ;;  %v398_v52 = vmul.f32 %v1004_v17, %v362_v27  ;;  %v399_v31 = vmul.f32 %v1004_v17, %v363_v28  ;;  %v400_v36 = vmul.f32 %v1004_v17, %v364_v30 }
  0x3c   : > { %844 = vst [vmem:[%s1060_s14 + $0x10] sm:$0xff] %v761_v32   ;;  %v433_v54 = vadd.f32 %v1031_v29, %v397_v35  ;;  %v365_v0 = vmul.f32 %v999_v16, %v977_v8  ;;  %v366_v5 = vmul.f32 %v999_v16, %v980_v9  ;;  %v367_v40 = vmul.f32 %v999_v16, %v983_v10 }
  0x3d   : > { %845 = vst [vmem:[%s1060_s14 + $0x18] sm:$0xff] %v766_v39   ;;  %v434_v44 = vadd.f32 %v1031_v29, %v398_v52  ;;  %v435_v37 = vadd.f32 %v1031_v29, %v399_v31  ;;  %v436_v38 = vadd.f32 %v1031_v29, %v400_v36  ;;  %v368_v41 = vmul.f32 %v999_v16, %v986_v11 }
  0x3e   : > { %vm465_vm12 = vcmp.gt.f32.partialorder %v433_v54, 0.0  ;;  %v497_v42 = vmul.f32 0.1, %v433_v54  ;;  %v401_v8 = vmul.f32 %v1004_v17, %v365_v0  ;;  %v402_v43 = vmul.f32 %v1004_v17, %v366_v5 }
  0x3f   : > { %vm466_vm13 = vcmp.gt.f32.partialorder %v434_v44, 0.0  ;;  %v498_v9 = vmul.f32 0.1, %v434_v44  ;;  %vm467_vm14 = vcmp.gt.f32.partialorder %v435_v37, 0.0  ;;  %vm468_vm15 = vcmp.gt.f32.partialorder %v436_v38, 0.0 }
  0x40   : > { %v529_v10 = vsel %vm465_vm12, %v433_v54, %v497_v42  ;;  %v499_v45 = vmul.f32 0.1, %v435_v37  ;;  %v500_v46 = vmul.f32 0.1, %v436_v38  ;;  %v437_v47 = vadd.f32 %v1031_v29, %v401_v8  ;;  %v840_v42 = vld [vmem:[%s936_s7 + $0x68] sm:$0xff]  }
  0x41   : > { %v530_v48 = vsel %vm466_vm13, %v434_v44, %v498_v9  ;;  %v438_v49 = vadd.f32 %v1031_v29, %v402_v43  ;;  %v403_v11 = vmul.f32 %v1004_v17, %v367_v40  ;;  %v404_v50 = vmul.f32 %v1004_v17, %v368_v41 }
  0x42   : > { %v771_v51 = vpack.c.bf16 %v530_v48, %v529_v10  ;;  %v531_v53 = vsel %vm467_vm14, %v435_v37, %v499_v45  ;;  %v532_v55 = vsel %vm468_vm15, %v436_v38, %v500_v46  ;;  %vm469_vm0 = vcmp.gt.f32.partialorder %v437_v47, 0.0  ;;  %v841_v48 = vld [vmem:[%s936_s7 + $0x70] sm:$0xff]  }
  0x43   : > { %v776_v56 = vpack.c.bf16 %v532_v55, %v531_v53  ;;  %vm470_vm1 = vcmp.gt.f32.partialorder %v438_v49, 0.0  ;;  %v501_v57 = vmul.f32 0.1, %v437_v47  ;;  %v502_v58 = vmul.f32 0.1, %v438_v49 }
  0x44   : > { %846 = vst [vmem:[%s1060_s14 + $0x20] sm:$0xff] %v771_v51   ;;  %v439_v59 = vadd.f32 %v1031_v29, %v403_v11  ;;  %v440_v60 = vadd.f32 %v1031_v29, %v404_v50  ;;  %v369_v61 = vmul.f32 %v999_v16, %v991_v13  ;;  %v370_v62 = vmul.f32 %v999_v16, %v994_v14 }
  0x45   : > { %847 = vst [vmem:[%s1060_s14 + $0x28] sm:$0xff] %v776_v56   ;;  %v533_v63 = vsel %vm469_vm0, %v437_v47, %v501_v57  ;;  %v534_v1 = vsel %vm470_vm1, %v438_v49, %v502_v58  ;;  %v371_v2 = vmul.f32 %v999_v16, %v997_v15  ;;  %v372_v3 = vmul.f32 %v999_v16, %v1007_v18 }
  0x46   : > { %v781_v4 = vpack.c.bf16 %v534_v1, %v533_v63  ;;  %vm471_vm2 = vcmp.gt.f32.partialorder %v439_v59, 0.0  ;;  %vm472_vm3 = vcmp.gt.f32.partialorder %v440_v60, 0.0  ;;  %v503_v6 = vmul.f32 0.1, %v439_v59 }
  0x47   : > { %v504_v7 = vmul.f32 0.1, %v440_v60  ;;  %v405_v12 = vmul.f32 %v1004_v17, %v369_v61  ;;  %v406_v13 = vmul.f32 %v1004_v17, %v370_v62  ;;  %v407_v14 = vmul.f32 %v1004_v17, %v371_v2 }
  0x48   : > { %848 = vst [vmem:[%s1060_s14 + $0x30] sm:$0xff] %v781_v4   ;;  %v535_v27 = vsel %vm471_vm2, %v439_v59, %v503_v6  ;;  %v408_v28 = vmul.f32 %v1004_v17, %v372_v3  ;;  %v373_v15 = vmul.f32 %v999_v16, %v1010_v19  ;;  %v374_v18 = vmul.f32 %v999_v16, %v1013_v20 }
  0x49   : > { %v536_v30 = vsel %vm472_vm3, %v440_v60, %v504_v7  ;;  %v441_v32 = vadd.f32 %v1031_v29, %v405_v12  ;;  %v442_v33 = vadd.f32 %v1031_v29, %v406_v13  ;;  %v443_v34 = vadd.f32 %v1031_v29, %v407_v14 }
  0x4a   : > { %v786_v35 = vpack.c.bf16 %v536_v30, %v535_v27  ;;  %v444_v39 = vadd.f32 %v1031_v29, %v408_v28  ;;  %v409_v52 = vmul.f32 %v1004_v17, %v373_v15  ;;  %v410_v31 = vmul.f32 %v1004_v17, %v374_v18  ;;  %v842_v28 = vld [vmem:[%s936_s7 + $0x78] sm:$0xff]  }
  0x4b   : > { %vm473_vm4 = vcmp.gt.f32.partialorder %v441_v32, 0.0  ;;  %vm474_vm5 = vcmp.gt.f32.partialorder %v442_v33, 0.0  ;;  %v505_v19 = vmul.f32 0.1, %v441_v32  ;;  %v506_v36 = vmul.f32 0.1, %v442_v33 }
  0x4c   : > { %849 = vst [vmem:[%s1060_s14 + $0x38] sm:$0xff] %v786_v35   ;;  %vm475_vm6 = vcmp.gt.f32.partialorder %v443_v34, 0.0  ;;  %vm476_vm7 = vcmp.gt.f32.partialorder %v444_v39, 0.0  ;;  %v507_v20 = vmul.f32 0.1, %v443_v34  ;;  %v445_v54 = vadd.f32 %v1031_v29, %v409_v52 }
  0x4d   : > { %v537_v0 = vsel %vm473_vm4, %v441_v32, %v505_v19  ;;  %v538_v5 = vsel %vm474_vm5, %v442_v33, %v506_v36  ;;  %v508_v40 = vmul.f32 0.1, %v444_v39  ;;  %v446_v44 = vadd.f32 %v1031_v29, %v410_v31 }
  0x4e   : > { %v791_v37 = vpack.c.bf16 %v538_v5, %v537_v0  ;;  %v539_v38 = vsel %vm475_vm6, %v443_v34, %v507_v20  ;;  %vm477_vm8 = vcmp.gt.f32.partialorder %v445_v54, 0.0  ;;  %v509_v41 = vmul.f32 0.1, %v445_v54 }
  0x4f   : > { %v540_v8 = vsel %vm476_vm7, %v444_v39, %v508_v40  ;;  %vm478_vm9 = vcmp.gt.f32.partialorder %v446_v44, 0.0  ;;  %v510_v43 = vmul.f32 0.1, %v446_v44  ;;  %v375_v9 = vmul.f32 %v999_v16, %v1019_v23 }
  0x50   : > { %850 = vst [vmem:[%s1060_s14 + $0x40] sm:$0xff] %v791_v37   ;;  %v796_v10 = vpack.c.bf16 %v540_v8, %v539_v38  ;;  %v541_v45 = vsel %vm477_vm8, %v445_v54, %v509_v41  ;;  %v376_v46 = vmul.f32 %v999_v16, %v1022_v24  ;;  %v333_v47 = vsub.f32 %v734_v25, %v942_v21 }
  0x51   : > { %v542_v49 = vsel %vm478_vm9, %v446_v44, %v510_v43  ;;  %v411_v11 = vmul.f32 %v1004_v17, %v375_v9  ;;  %v334_v50 = vsub.f32 %v735_v26, %v942_v21  ;;  %v738_v23 = vunpack.c.l.bf16 %v840_v42 }
  0x52   : > { %851 = vst [vmem:[%s1060_s14 + $0x48] sm:$0xff] %v796_v10   ;;  %v801_v51 = vpack.c.bf16 %v542_v49, %v541_v45  ;;  %v412_v53 = vmul.f32 %v1004_v17, %v376_v46  ;;  %v377_v24 = vmul.f32 %v999_v16, %v333_v47  ;;  %v739_v55 = vunpack.c.h.bf16 %v840_v42 }
  0x53   : > { %v447_v56 = vadd.f32 %v1031_v29, %v411_v11  ;;  %v378_v25 = vmul.f32 %v999_v16, %v334_v50  ;;  %v335_v57 = vsub.f32 %v738_v23, %v942_v21  ;;  %v742_v58 = vunpack.c.l.bf16 %v841_v48 }
  0x54   : > { %852 = vst [vmem:[%s1060_s14 + $0x50] sm:$0xff] %v801_v51   ;;  %v448_v59 = vadd.f32 %v1031_v29, %v412_v53  ;;  %v413_v22 = vmul.f32 %v1004_v17, %v377_v24  ;;  %v336_v26 = vsub.f32 %v739_v55, %v942_v21  ;;  %v743_v60 = vunpack.c.h.bf16 %v841_v48 }
  0x55   : > { %vm479_vm10 = vcmp.gt.f32.partialorder %v447_v56, 0.0  ;;  %v511_v61 = vmul.f32 0.1, %v447_v56  ;;  %v414_v62 = vmul.f32 %v1004_v17, %v378_v25  ;;  %v379_v63 = vmul.f32 %v999_v16, %v335_v57 }
  0x56   : > { %vm480_vm11 = vcmp.gt.f32.partialorder %v448_v59, 0.0  ;;  %v512_v1 = vmul.f32 0.1, %v448_v59  ;;  %v449_v2 = vadd.f32 %v1031_v29, %v413_v22  ;;  %v380_v3 = vmul.f32 %v999_v16, %v336_v26 }
  0x57   : > { %v543_v4 = vsel %vm479_vm10, %v447_v56, %v511_v61  ;;  %v450_v6 = vadd.f32 %v1031_v29, %v414_v62  ;;  %v415_v7 = vmul.f32 %v1004_v17, %v379_v63  ;;  %v337_v12 = vsub.f32 %v742_v58, %v942_v21 }
  0x58   : > { %v544_v13 = vsel %vm480_vm11, %v448_v59, %v512_v1  ;;  %vm481_vm12 = vcmp.gt.f32.partialorder %v449_v2, 0.0  ;;  %v513_v14 = vmul.f32 0.1, %v449_v2  ;;  %v416_v27 = vmul.f32 %v1004_v17, %v380_v3 }
  0x59   : > { %v806_v15 = vpack.c.bf16 %v544_v13, %v543_v4  ;;  %vm482_vm13 = vcmp.gt.f32.partialorder %v450_v6, 0.0  ;;  %v514_v18 = vmul.f32 0.1, %v450_v6  ;;  %v451_v30 = vadd.f32 %v1031_v29, %v415_v7 }
  0x5a   : > { %v545_v32 = vsel %vm481_vm12, %v449_v2, %v513_v14  ;;  %v452_v33 = vadd.f32 %v1031_v29, %v416_v27  ;;  %v338_v34 = vsub.f32 %v743_v60, %v942_v21  ;;  %v381_v35 = vmul.f32 %v999_v16, %v337_v12 }
  0x5b   : > { %853 = vst [vmem:[%s1060_s14 + $0x58] sm:$0xff] %v806_v15   ;;  %v546_v39 = vsel %vm482_vm13, %v450_v6, %v514_v18  ;;  %vm483_vm14 = vcmp.gt.f32.partialorder %v451_v30, 0.0  ;;  %v515_v52 = vmul.f32 0.1, %v451_v30  ;;  %v746_v31 = vunpack.c.l.bf16 %v842_v28 }
  0x5c   : > { %v811_v19 = vpack.c.bf16 %v546_v39, %v545_v32  ;;  %vm484_vm15 = vcmp.gt.f32.partialorder %v452_v33, 0.0  ;;  %v516_v36 = vmul.f32 0.1, %v452_v33  ;;  %v382_v20 = vmul.f32 %v999_v16, %v338_v34 }
  0x5d   : > { %v547_v54 = vsel %vm483_vm14, %v451_v30, %v515_v52  ;;  %v417_v0 = vmul.f32 %v1004_v17, %v381_v35  ;;  %v747_v5 = vunpack.c.h.bf16 %v842_v28  ;;  %v339_v40 = vsub.f32 %v746_v31, %v942_v21 }
  0x5e   : > { %854 = vst [vmem:[%s1060_s14 + $0x60] sm:$0xff] %v811_v19   ;;  %v548_v44 = vsel %vm484_vm15, %v452_v33, %v516_v36  ;;  %v418_v37 = vmul.f32 %v1004_v17, %v382_v20 }
  0x5f   : > { %v816_v38 = vpack.c.bf16 %v548_v44, %v547_v54  ;;  %v453_v41 = vadd.f32 %v1031_v29, %v417_v0  ;;  %v340_v42 = vsub.f32 %v747_v5, %v942_v21  ;;  %v383_v8 = vmul.f32 %v999_v16, %v339_v40 }
  0x60   : > { %v454_v43 = vadd.f32 %v1031_v29, %v418_v37 }
  0x61   : > { %855 = vst [vmem:[%s1060_s14 + $0x68] sm:$0xff] %v816_v38   ;;  %vm485_vm0 = vcmp.gt.f32.partialorder %v453_v41, 0.0  ;;  %v517_v9 = vmul.f32 0.1, %v453_v41  ;;  %v384_v10 = vmul.f32 %v999_v16, %v340_v42  ;;  %v419_v45 = vmul.f32 %v1004_v17, %v383_v8 }
  0x62   : > { %vm486_vm1 = vcmp.gt.f32.partialorder %v454_v43, 0.0  ;;  %v518_v46 = vmul.f32 0.1, %v454_v43 }
  0x63   : > { %v549_v47 = vsel %vm485_vm0, %v453_v41, %v517_v9  ;;  %v420_v48 = vmul.f32 %v1004_v17, %v384_v10  ;;  %v455_v21 = vadd.f32 %v1031_v29, %v419_v45 }
  0x64   : > { %v550_v49 = vsel %vm486_vm1, %v454_v43, %v518_v46 }
  0x65   : > { %v821_v11 = vpack.c.bf16 %v550_v49, %v549_v47  ;;  %v456_v50 = vadd.f32 %v1031_v29, %v420_v48  ;;  %vm487_vm2 = vcmp.gt.f32.partialorder %v455_v21, 0.0  ;;  %v519_v23 = vmul.f32 0.1, %v455_v21 }
  0x67   : > { %856 = vst [vmem:[%s1060_s14 + $0x70] sm:$0xff] %v821_v11   ;;  %vm488_vm3 = vcmp.gt.f32.partialorder %v456_v50, 0.0  ;;  %v520_v51 = vmul.f32 0.1, %v456_v50  ;;  %v551_v16 = vsel %vm487_vm2, %v455_v21, %v519_v23 }
  0x69   : > { %v552_v53 = vsel %vm488_vm3, %v456_v50, %v520_v51 }
  0x6a   : > { %v826_v24 = vpack.c.bf16 %v552_v53, %v551_v16 }
  0x6c   : > { %857 = vst [vmem:[%s1060_s14 + $0x78] sm:$0xff] %v826_v24  }
  0x6d PF: > { %s15_s18 = sadd.s32 1, %s876_s18  }
  0x6e   : > { %p12_p4 = scmp.ge.s32.totalorder %s15_s18, 4  }
  0x70   :  { %14 = sbr.rel (!%p12_p4) target bundleno = 1 (0x1), region = 70 }

// kernel: yolo_forward.14
= control target key start
LH: loop header
LB: loop body
LE: loop exit
PB: predicated region body
PF: predicated region fallthrough
CT: control target
= control target key end

     0   :  { %s2444_s18 = smov 0   ;;  %s2446_s19 = smov 0   ;;  %s3067_s0 = inlined_call_operand.vmem [shape: bf16[512,1152], index: 0, kind: input, shape index: {}]   ;;  %s3068_s1 = inlined_call_operand.vmem [shape: bf16[1152,128], index: 1, kind: input, shape index: {}]   ;;  %s3069_s2 = inlined_call_operand.vmem [shape: f32[1,128], index: 2, kind: input, shape index: {}]   ;;  %s3070_s3 = inlined_call_operand.vmem [shape: bf16[512,128], index: 3, kind: output, shape index: {0}]   ;;  %s3071_s4 = inlined_call_operand.vmem [shape: f32[2,1,128], index: 4, kind: output, shape index: {1}]   ;;  %s3072_s5 = inlined_call_operand.vmem [shape: f32[2,1,128], index: 5, kind: output, shape index: {2}]  }
   0x1   :  { %s2448_s20 = smov 0   ;;  %s2450_s21 = smov 0  }
   0x2   :  { %s2452_s22 = smov 0   ;;  %s2454_s23 = smov 0  }
   0x3   :  { %s2456_s24 = smov 0  }
   0x4 LB: > { %s25_s25 = sadd.s32 1, %s2403_s22  ;;  %s28_s26 = sadd.s32 1, %s2407_s23  ;;  %s2411_s24 = sphi %s2456_s24, %s16_s24   ;;  %s2407_s23 = sphi %s2454_s23, %s3078_s23   ;;  %s2403_s22 = sphi %s2452_s22, %s3077_s22   ;;  %s2399_s21 = sphi %s2450_s21, %s3076_s21   ;;  %s2395_s20 = sphi %s2448_s20, %s3075_s20   ;;  %s2391_s19 = sphi %s2446_s19, %s3074_s19   ;;  %s2387_s18 = sphi %s2444_s18, %s3073_s18  }
   0x5   : > { %p26_p0 = scmp.ge.s32.totalorder %s25_s25, 3  ;;  %p44_p1 = scmp.ne.s32.totalorder %s2391_s19, %s2387_s18 }
   0x6   : > { %p45_p2 = scmp.eq.s32.totalorder %s2411_s24, 0  ;;  %s37_s30 = sadd.s32 1, %s2391_s19 }
   0x7   : > { %s3080_s25 = smov (%p26_p0, %s25_s25), 0  ;;  %s3082_s26 = smov (!%p26_p0, %s28_s26), %s2407_s23 }
   0x8   : > { %p46_p3 = por %p45_p2, %p44_p1  ;;  %p30_p4 = scmp.ge.s32.totalorder %s3082_s26, 2 }
   0x9   : > { %s33_s27 = ssub.s32 %s2403_s22, %s3080_s25  ;;  %p1741_p6 = scmp.ge.s32.totalorder %s2411_s24, 6 }
   0xa   : > { %s3084_s26 = smov (%p30_p4, %s3082_s26), 0 }
   0xb   : > { %s32_s28 = ssub.s32 %s2407_s23, %s3084_s26  ;;  %198 = sbr.rel (%p1741_p6) target bundleno = 89 (0x59), region = 20 }
   0xc   : > { %s34_s29 = sor.u32 %s33_s27, %s32_s28 }
   0xd   : > { %p35_p5 = scmp.eq.s32.totalorder %s34_s29, 0 }
   0xf   : > { %s2495_s6 = scalar_select %p35_p5, %s2391_s19, %s37_s30  }
  0x10   : > { %201 = sbr.rel (!%p46_p3) target bundleno = 89 (0x59), region = 24  ;;  %s203_s7 = sand.u32 (%p46_p3), 1, %s2391_s19  }
  0x11   : > { %s207_s8 = smul.u32 (%p46_p3), 3, %s2403_s22 }
  0x12   : > { %s2296_s9 = smul.u32 (%p46_p3), 384, %s203_s7 }
  0x13   : > { %s2297_s10 = smul.u32 (%p46_p3), 288, %s2407_s23 }
  0x14   : > { %s2509_s16 = scalar_lea.vmem (%p46_p3), [#allocation3], %s2296_s9 }
  0x15   : > { %s209_s11 = sadd.s32 %s2297_s10, %s207_s8 }
  0x16   : > { %s1744_s12 = sshll.u32 %s209_s11, 2 }
  0x17   : > { %s2504_s15 = scalar_lea.vmem %s3067_s0, %s1744_s12 }
  0x18   : > { %v226_v0 = vld [vmem:[%s2504_s15] sm:$0xff]  ;;  %v230_v2 = vld [vmem:[%s2504_s15 + $0x48] sm:$0xff]  ;;  %v234_v4 = vld [vmem:[%s2504_s15 + $0x90] sm:$0xff] }
  0x19   : > { %v228_v1 = vld [vmem:[%s2504_s15 + $0x24] sm:$0xff]  ;;  %227 = vst [vmem:[%s2509_s16] sm:$0xff] %v226_v0  ;;  %v232_v3 = vld [vmem:[%s2504_s15 + $0x6c] sm:$0xff]  ;;  %v236_v5 = vld [vmem:[%s2504_s15 + $0xb4] sm:$0xff] }
  0x1a   : > { %229 = vst [vmem:[%s2509_s16 + $0xc] sm:$0xff] %v228_v1  ;;  %v238_v6 = vld [vmem:[%s2504_s15 + $0xd8] sm:$0xff]  ;;  %v242_v8 = vld [vmem:[%s2504_s15 + $0x120] sm:$0xff]  ;;  %v246_v10 = vld [vmem:[%s2504_s15 + $0x168] sm:$0xff] }
  0x1b   : > { %231 = vst [vmem:[%s2509_s16 + $0x18] sm:$0xff] %v230_v2  ;;  %v240_v7 = vld [vmem:[%s2504_s15 + $0xfc] sm:$0xff]  ;;  %v244_v9 = vld [vmem:[%s2504_s15 + $0x144] sm:$0xff]  ;;  %v248_v11 = vld [vmem:[%s2504_s15 + $0x18c] sm:$0xff] }
  0x1c   : > { %233 = vst [vmem:[%s2509_s16 + $0x24] sm:$0xff] %v232_v3  ;;  %v250_v12 = vld [vmem:[%s2504_s15 + $0x1b0] sm:$0xff]  ;;  %v254_v14 = vld [vmem:[%s2504_s15 + $0x1f8] sm:$0xff]  ;;  %v258_v16 = vld [vmem:[%s2504_s15 + $0x240] sm:$0xff] }
  0x1d   : > { %235 = vst [vmem:[%s2509_s16 + $0x30] sm:$0xff] %v234_v4  ;;  %v252_v13 = vld [vmem:[%s2504_s15 + $0x1d4] sm:$0xff]  ;;  %v256_v15 = vld [vmem:[%s2504_s15 + $0x21c] sm:$0xff]  ;;  %v260_v17 = vld [vmem:[%s2504_s15 + $0x264] sm:$0xff] }
  0x1e   : > { %237 = vst [vmem:[%s2509_s16 + $0x3c] sm:$0xff] %v236_v5  ;;  %v262_v18 = vld [vmem:[%s2504_s15 + $0x288] sm:$0xff]  ;;  %v266_v20 = vld [vmem:[%s2504_s15 + $0x2d0] sm:$0xff]  ;;  %v270_v22 = vld [vmem:[%s2504_s15 + $0x318] sm:$0xff] }
  0x1f   : > { %239 = vst [vmem:[%s2509_s16 + $0x48] sm:$0xff] %v238_v6  ;;  %v264_v19 = vld [vmem:[%s2504_s15 + $0x2ac] sm:$0xff]  ;;  %v268_v21 = vld [vmem:[%s2504_s15 + $0x2f4] sm:$0xff]  ;;  %v272_v23 = vld [vmem:[%s2504_s15 + $0x33c] sm:$0xff] }
  0x20   : > { %241 = vst [vmem:[%s2509_s16 + $0x54] sm:$0xff] %v240_v7  ;;  %v274_v24 = vld [vmem:[%s2504_s15 + $0x360] sm:$0xff]  ;;  %v278_v26 = vld [vmem:[%s2504_s15 + $0x3a8] sm:$0xff]  ;;  %v282_v28 = vld [vmem:[%s2504_s15 + $0x3f0] sm:$0xff] }
  0x21   : > { %243 = vst [vmem:[%s2509_s16 + $0x60] sm:$0xff] %v242_v8  ;;  %v276_v25 = vld [vmem:[%s2504_s15 + $0x384] sm:$0xff]  ;;  %v280_v27 = vld [vmem:[%s2504_s15 + $0x3cc] sm:$0xff]  ;;  %v284_v29 = vld [vmem:[%s2504_s15 + $0x414] sm:$0xff] }
  0x22   : > { %245 = vst [vmem:[%s2509_s16 + $0x6c] sm:$0xff] %v244_v9  ;;  %v286_v30 = vld [vmem:[%s2504_s15 + $0x438] sm:$0xff]  ;;  %v1745_v32 = vld [vmem:[%s2504_s15 + $0x8] sm:$0xf]  ;;  %v1747_v33 = vld [vmem:[%s2504_s15 + $0x2c] sm:$0xf] }
  0x23   : > { %247 = vst [vmem:[%s2509_s16 + $0x78] sm:$0xff] %v246_v10  ;;  %v288_v31 = vld [vmem:[%s2504_s15 + $0x45c] sm:$0xff]  ;;  %v1749_v34 = vld [vmem:[%s2504_s15 + $0x50] sm:$0xf]  ;;  %v1751_v35 = vld [vmem:[%s2504_s15 + $0x74] sm:$0xf] }
  0x24   : > { %249 = vst [vmem:[%s2509_s16 + $0x84] sm:$0xff] %v248_v11  ;;  %v1753_v36 = vld [vmem:[%s2504_s15 + $0x98] sm:$0xf]  ;;  %v1755_v37 = vld [vmem:[%s2504_s15 + $0xbc] sm:$0xf] }
  0x25   : > { %251 = vst [vmem:[%s2509_s16 + $0x90] sm:$0xff] %v250_v12  ;;  %v1757_v38 = vld [vmem:[%s2504_s15 + $0xe0] sm:$0xf]  ;;  %v1759_v39 = vld [vmem:[%s2504_s15 + $0x104] sm:$0xf] }
  0x26   : > { %253 = vst [vmem:[%s2509_s16 + $0x9c] sm:$0xff] %v252_v13  ;;  %v1761_v40 = vld [vmem:[%s2504_s15 + $0x128] sm:$0xf]  ;;  %v1763_v41 = vld [vmem:[%s2504_s15 + $0x14c] sm:$0xf] }
  0x27   : > { %255 = vst [vmem:[%s2509_s16 + $0xa8] sm:$0xff] %v254_v14  ;;  %v1765_v42 = vld [vmem:[%s2504_s15 + $0x170] sm:$0xf]  ;;  %v1767_v43 = vld [vmem:[%s2504_s15 + $0x194] sm:$0xf] }
  0x28   : > { %257 = vst [vmem:[%s2509_s16 + $0xb4] sm:$0xff] %v256_v15  ;;  %v1769_v44 = vld [vmem:[%s2504_s15 + $0x1b8] sm:$0xf]  ;;  %v1771_v45 = vld [vmem:[%s2504_s15 + $0x1dc] sm:$0xf] }
  0x29   : > { %259 = vst [vmem:[%s2509_s16 + $0xc0] sm:$0xff] %v258_v16  ;;  %v1773_v46 = vld [vmem:[%s2504_s15 + $0x200] sm:$0xf]  ;;  %v1775_v47 = vld [vmem:[%s2504_s15 + $0x224] sm:$0xf] }
  0x2a   : > { %261 = vst [vmem:[%s2509_s16 + $0xcc] sm:$0xff] %v260_v17  ;;  %v1777_v48 = vld [vmem:[%s2504_s15 + $0x248] sm:$0xf]  ;;  %v1779_v49 = vld [vmem:[%s2504_s15 + $0x26c] sm:$0xf] }
  0x2b   : > { %263 = vst [vmem:[%s2509_s16 + $0xd8] sm:$0xff] %v262_v18  ;;  %v1781_v50 = vld [vmem:[%s2504_s15 + $0x290] sm:$0xf]  ;;  %v1783_v51 = vld [vmem:[%s2504_s15 + $0x2b4] sm:$0xf] }
  0x2c   : > { %265 = vst [vmem:[%s2509_s16 + $0xe4] sm:$0xff] %v264_v19  ;;  %v1785_v52 = vld [vmem:[%s2504_s15 + $0x2d8] sm:$0xf]  ;;  %v1787_v53 = vld [vmem:[%s2504_s15 + $0x2fc] sm:$0xf] }
  0x2d   : > { %267 = vst [vmem:[%s2509_s16 + $0xf0] sm:$0xff] %v266_v20  ;;  %v1789_v54 = vld [vmem:[%s2504_s15 + $0x320] sm:$0xf]  ;;  %v1791_v55 = vld [vmem:[%s2504_s15 + $0x344] sm:$0xf] }
  0x2e   : > { %269 = vst [vmem:[%s2509_s16 + $0xfc] sm:$0xff] %v268_v21  ;;  %v1793_v56 = vld [vmem:[%s2504_s15 + $0x368] sm:$0xf]  ;;  %v1795_v57 = vld [vmem:[%s2504_s15 + $0x38c] sm:$0xf] }
  0x2f   : > { %271 = vst [vmem:[%s2509_s16 + $0x108] sm:$0xff] %v270_v22  ;;  %v1797_v58 = vld [vmem:[%s2504_s15 + $0x3b0] sm:$0xf]  ;;  %v1799_v59 = vld [vmem:[%s2504_s15 + $0x3d4] sm:$0xf] }
  0x30   : > { %273 = vst [vmem:[%s2509_s16 + $0x114] sm:$0xff] %v272_v23  ;;  %v1801_v60 = vld [vmem:[%s2504_s15 + $0x3f8] sm:$0xf]  ;;  %v1803_v61 = vld [vmem:[%s2504_s15 + $0x41c] sm:$0xf] }
  0x31   : > { %275 = vst [vmem:[%s2509_s16 + $0x120] sm:$0xff] %v274_v24  ;;  %v1805_v62 = vld [vmem:[%s2504_s15 + $0x440] sm:$0xf]  ;;  %v1807_v63 = vld [vmem:[%s2504_s15 + $0x464] sm:$0xf] }
  0x32   : > { %277 = vst [vmem:[%s2509_s16 + $0x12c] sm:$0xff] %v276_v25 }
  0x33   : > { %279 = vst [vmem:[%s2509_s16 + $0x138] sm:$0xff] %v278_v26 }
  0x34   : > { %281 = vst [vmem:[%s2509_s16 + $0x144] sm:$0xff] %v280_v27 }
  0x35   : > { %283 = vst [vmem:[%s2509_s16 + $0x150] sm:$0xff] %v282_v28 }
  0x36   : > { %285 = vst [vmem:[%s2509_s16 + $0x15c] sm:$0xff] %v284_v29 }
  0x37   : > { %287 = vst [vmem:[%s2509_s16 + $0x168] sm:$0xff] %v286_v30 }
  0x38   : > { %289 = vst [vmem:[%s2509_s16 + $0x174] sm:$0xff] %v288_v31 }
  0x39   : > { %1746 = vst [vmem:[%s2509_s16 + $0x8] sm:$0xf] %v1745_v32 }
  0x3a   : > { %1748 = vst [vmem:[%s2509_s16 + $0x14] sm:$0xf] %v1747_v33 }
  0x3b   : > { %1750 = vst [vmem:[%s2509_s16 + $0x20] sm:$0xf] %v1749_v34 }
  0x3c   : > { %1752 = vst [vmem:[%s2509_s16 + $0x2c] sm:$0xf] %v1751_v35 }
  0x3d   : > { %1754 = vst [vmem:[%s2509_s16 + $0x38] sm:$0xf] %v1753_v36 }
  0x3e   : > { %1756 = vst [vmem:[%s2509_s16 + $0x44] sm:$0xf] %v1755_v37 }
  0x3f   : > { %1758 = vst [vmem:[%s2509_s16 + $0x50] sm:$0xf] %v1757_v38 }
  0x40   : > { %1760 = vst [vmem:[%s2509_s16 + $0x5c] sm:$0xf] %v1759_v39 }
  0x41   : > { %1762 = vst [vmem:[%s2509_s16 + $0x68] sm:$0xf] %v1761_v40 }
  0x42   : > { %1764 = vst [vmem:[%s2509_s16 + $0x74] sm:$0xf] %v1763_v41 }
  0x43   : > { %1766 = vst [vmem:[%s2509_s16 + $0x80] sm:$0xf] %v1765_v42 }
  0x44   : > { %1768 = vst [vmem:[%s2509_s16 + $0x8c] sm:$0xf] %v1767_v43 }
  0x45   : > { %1770 = vst [vmem:[%s2509_s16 + $0x98] sm:$0xf] %v1769_v44 }
  0x46   : > { %1772 = vst [vmem:[%s2509_s16 + $0xa4] sm:$0xf] %v1771_v45 }
  0x47   : > { %1774 = vst [vmem:[%s2509_s16 + $0xb0] sm:$0xf] %v1773_v46 }
  0x48   : > { %1776 = vst [vmem:[%s2509_s16 + $0xbc] sm:$0xf] %v1775_v47 }
  0x49   : > { %1778 = vst [vmem:[%s2509_s16 + $0xc8] sm:$0xf] %v1777_v48 }
  0x4a   : > { %1780 = vst [vmem:[%s2509_s16 + $0xd4] sm:$0xf] %v1779_v49 }
  0x4b   : > { %1782 = vst [vmem:[%s2509_s16 + $0xe0] sm:$0xf] %v1781_v50 }
  0x4c   : > { %1784 = vst [vmem:[%s2509_s16 + $0xec] sm:$0xf] %v1783_v51 }
  0x4d   : > { %1786 = vst [vmem:[%s2509_s16 + $0xf8] sm:$0xf] %v1785_v52 }
  0x4e   : > { %1788 = vst [vmem:[%s2509_s16 + $0x104] sm:$0xf] %v1787_v53 }
  0x4f   : > { %1790 = vst [vmem:[%s2509_s16 + $0x110] sm:$0xf] %v1789_v54 }
  0x50   : > { %1792 = vst [vmem:[%s2509_s16 + $0x11c] sm:$0xf] %v1791_v55 }
  0x51   : > { %1794 = vst [vmem:[%s2509_s16 + $0x128] sm:$0xf] %v1793_v56 }
  0x52   : > { %1796 = vst [vmem:[%s2509_s16 + $0x134] sm:$0xf] %v1795_v57 }
  0x53   : > { %1798 = vst [vmem:[%s2509_s16 + $0x140] sm:$0xf] %v1797_v58 }
  0x54   : > { %1800 = vst [vmem:[%s2509_s16 + $0x14c] sm:$0xf] %v1799_v59 }
  0x55   : > { %1802 = vst [vmem:[%s2509_s16 + $0x158] sm:$0xf] %v1801_v60 }
  0x56   : > { %1804 = vst [vmem:[%s2509_s16 + $0x164] sm:$0xf] %v1803_v61 }
  0x57   : > { %1806 = vst [vmem:[%s2509_s16 + $0x170] sm:$0xf] %v1805_v62 }
  0x58   : > { %1808 = vst [vmem:[%s2509_s16 + $0x17c] sm:$0xf] %v1807_v63 }
  0x59 PF: > { %p1809_p7 = scmp.ge.s32.totalorder %s2411_s24, 1  ;;  %p375_p8 = scmp.lt.s32.totalorder %s2411_s24, 7 }
  0x5b   : > { %p376_p9 = pnand %p1809_p7, %p375_p8 }
  0x5c   : > { %s382_s17 = sand.u32 (!%p376_p9), 1, %s2387_s18   ;;  %s422_s27 = smul.u32 (!%p376_p9), 48, %s2395_s20 }
  0x5d   : > { %379 = sbr.rel (%p376_p9) target bundleno = 577 (0x241), region = 54  ;;  %s1811_s29 = sshll.u32 (!%p376_p9), %s2399_s21, 5 }
  0x5e   : > { %s2298_s28 = smul.u32 (!%p376_p9), 384, %s382_s17  ;;  %p423_p10 = scmp.lt.s32.totalorder (!%p376_p9), %s422_s27, 143 }
  0x5f   : > { %p429_p11 = scmp.lt.s32.totalorder (!%p376_p9), %s1811_s29, 63  ;;  %p434_p12 = scmp.lt.s32.totalorder (!%p376_p9), %s2399_s21, 1 }
  0x60   : > { %p1813_p13 = scmp.ne.s32.totalorder (!%p376_p9), %s2395_s20, 0 }
  0x62   : > { %s3086_s27 = smov (!%p423_p10, %s422_s27), 143  ;;  %s3088_s29 = smov (!%p429_p11, %s1811_s29), 63 }
  0x63   : > { %s1810_s30 = sshll.u32 %s3086_s27, 2  ;;  %s1812_s10 = sshll.u32 %s3088_s29, 2 }
  0x64   : > { %s2645_s9 = scalar_lea.vmem %s3068_s1, %s1810_s30  ;;  %s2650_s13 = scalar_lea.vmem %s3070_s3, %s1812_s10 }
  0x65   : > { %s3090_s21 = smov (!%p434_p12, %s2399_s21), 1  ;;  %s2663_s30 = scalar_lea.vmem [#allocation3], %s2298_s28 }
  0x66   : > { %s436_s15 = scalar_lea.vmem %s3071_s4, %s3090_s21  ;;  %s439_s27 = scalar_lea.vmem %s3072_s5, %s3090_s21 }
  0x67   : > { %443 = sbr.rel (%p1813_p13) target bundleno = 141 (0x8d), region = 62 }
  0x6c   : > { %v2413_v0 = vmov 0.0  }
  0x6d   : > { %444 = vst [vmem:[#allocation2 + $0xb0] sm:$0xff] %v2413_v0 }
  0x6e   : > { %445 = vst [vmem:[#allocation2] sm:$0xff] %v2413_v0 }
  0x6f   : > { %446 = vst [vmem:[#allocation2 + $0xd8] sm:$0xff] %v2413_v0 }
  0x70   : > { %447 = vst [vmem:[#allocation2 + $0x18] sm:$0xff] %v2413_v0 }
  0x71   : > { %448 = vst [vmem:[#allocation2 + $0x50] sm:$0xff] %v2413_v0 }
  0x72   : > { %449 = vst [vmem:[#allocation2 + $0x68] sm:$0xff] %v2413_v0 }
  0x73   : > { %450 = vst [vmem:[#allocation2 + $0x30] sm:$0xff] %v2413_v0 }
  0x74   : > { %451 = vst [vmem:[#allocation2 + $0x48] sm:$0xff] %v2413_v0 }
  0x75   : > { %452 = vst [vmem:[#allocation2 + $0x80] sm:$0xff] %v2413_v0 }
  0x76   : > { %453 = vst [vmem:[#allocation2 + $0x88] sm:$0xff] %v2413_v0 }
  0x77   : > { %454 = vst [vmem:[#allocation2 + $0xe8] sm:$0xff] %v2413_v0 }
  0x78   : > { %455 = vst [vmem:[#allocation2 + $0xb8] sm:$0xff] %v2413_v0 }
  0x79   : > { %456 = vst [vmem:[#allocation2 + $0x60] sm:$0xff] %v2413_v0 }
  0x7a   : > { %457 = vst [vmem:[#allocation2 + $0xf0] sm:$0xff] %v2413_v0 }
  0x7b   : > { %458 = vst [vmem:[#allocation2 + $0x8] sm:$0xff] %v2413_v0 }
  0x7c   : > { %459 = vst [vmem:[#allocation2 + $0x78] sm:$0xff] %v2413_v0 }
  0x7d   : > { %460 = vst [vmem:[#allocation2 + $0x38] sm:$0xff] %v2413_v0 }
  0x7e   : > { %461 = vst [vmem:[#allocation2 + $0x58] sm:$0xff] %v2413_v0 }
  0x7f   : > { %462 = vst [vmem:[#allocation2 + $0x40] sm:$0xff] %v2413_v0 }
  0x80   : > { %463 = vst [vmem:[#allocation2 + $0xc8] sm:$0xff] %v2413_v0 }
  0x81   : > { %464 = vst [vmem:[#allocation2 + $0xe0] sm:$0xff] %v2413_v0 }
  0x82   : > { %465 = vst [vmem:[#allocation2 + $0x90] sm:$0xff] %v2413_v0 }
  0x83   : > { %466 = vst [vmem:[#allocation2 + $0x70] sm:$0xff] %v2413_v0 }
  0x84   : > { %467 = vst [vmem:[#allocation2 + $0xc0] sm:$0xff] %v2413_v0 }
  0x85   : > { %468 = vst [vmem:[#allocation2 + $0xa8] sm:$0xff] %v2413_v0 }
  0x86   : > { %469 = vst [vmem:[#allocation2 + $0xd0] sm:$0xff] %v2413_v0 }
  0x87   : > { %470 = vst [vmem:[#allocation2 + $0x10] sm:$0xff] %v2413_v0 }
  0x88   : > { %471 = vst [vmem:[#allocation2 + $0x28] sm:$0xff] %v2413_v0 }
  0x89   : > { %472 = vst [vmem:[#allocation2 + $0xa0] sm:$0xff] %v2413_v0 }
  0x8a   : > { %473 = vst [vmem:[#allocation2 + $0xf8] sm:$0xff] %v2413_v0 }
  0x8b   : > { %474 = vst [vmem:[#allocation2 + $0x20] sm:$0xff] %v2413_v0 }
  0x8c   : > { %475 = vst [vmem:[#allocation2 + $0x98] sm:$0xff] %v2413_v0 }
  0x8d PF: > { %v2160_v1 = vld [vmem:[%s2645_s9 + $0x38] sm:$0xff]  ;;  %v2159_v4 = vld [vmem:[%s2645_s9 + $0x30] sm:$0xff]  ;;  %v2158_v7 = vld [vmem:[%s2645_s9 + $0x28] sm:$0xff]  ;;  %p2102_p0 = scmp.ne.s32.totalorder %s2395_s20, 2 }
  0x8e   : > { %v2668_v2 = vld [vmem:[%s2645_s9 + $0x78] sm:$0xff]  ;;  %1020 = vmatpush.bf16.msra.mxu0 %v2160_v1  ;;  %2272 = vmatpush.bf16.msra.mxu3 %v2160_v1  ;;  %v2677_v5 = vld [vmem:[%s2645_s9 + $0x70] sm:$0xff]  ;;  %v2166_v8 = vld [vmem:[%s2645_s9 + $0x68] sm:$0xff] }
  0x8f   : > { %v2671_v3 = vld [vmem:[%s2645_s9 + $0xb8] sm:$0xff]  ;;  %1109 = vmatpush.bf16.msra.mxu1 %v2668_v2  ;;  %v2680_v6 = vld [vmem:[%s2645_s9 + $0xb0] sm:$0xff]  ;;  %v2687_v9 = vld [vmem:[%s2645_s9 + $0xa8] sm:$0xff] }
  0x90   : > { %1198 = vmatpush.bf16.msra.mxu2 %v2671_v3  ;;  %v2157_v10 = vld [vmem:[%s2645_s9 + $0x20] sm:$0xff]  ;;  %v2156_v13 = vld [vmem:[%s2645_s9 + $0x18] sm:$0xff]  ;;  %v2155_v16 = vld [vmem:[%s2645_s9 + $0x10] sm:$0xff] }
  0x91   : > { %v2165_v11 = vld [vmem:[%s2645_s9 + $0x60] sm:$0xff]  ;;  %v2164_v14 = vld [vmem:[%s2645_s9 + $0x58] sm:$0xff]  ;;  %v2163_v17 = vld [vmem:[%s2645_s9 + $0x50] sm:$0xff] }
  0x92   : > { %1021 = vmatpush.bf16.msra.mxu0 %v2159_v4  ;;  %2273 = vmatpush.bf16.msra.mxu3 %v2159_v4  ;;  %v2693_v12 = vld [vmem:[%s2645_s9 + $0xa0] sm:$0xff]  ;;  %v2699_v15 = vld [vmem:[%s2645_s9 + $0x98] sm:$0xff]  ;;  %v2705_v18 = vld [vmem:[%s2645_s9 + $0x90] sm:$0xff] }
  0x93   : > { %1110 = vmatpush.bf16.msra.mxu1 %v2677_v5  ;;  %v2154_v19 = vld [vmem:[%s2645_s9 + $0x8] sm:$0xff]  ;;  %v2153_v22 = vld [vmem:[%s2645_s9] sm:$0xff]  ;;  %v1818_v30 = vld [vmem:[%s2663_s30 + $0xc] sm:$0xf0] }
  0x94   : > { %1199 = vmatpush.bf16.msra.mxu2 %v2680_v6  ;;  %v2162_v20 = vld [vmem:[%s2645_s9 + $0x48] sm:$0xff]  ;;  %v2161_v23 = vld [vmem:[%s2645_s9 + $0x40] sm:$0xff]  ;;  %v2107_v32 = vld [vmem:[%s2663_s30 + $0x10] sm:$0xf0] }
  0x95   : > { %v2711_v21 = vld [vmem:[%s2645_s9 + $0x88] sm:$0xff]  ;;  %v2716_v24 = vld [vmem:[%s2645_s9 + $0x80] sm:$0xff]  ;;  %v1828_v37 = vld [vmem:[%s2663_s30 + $0x18] sm:$0xf] }
  0x96   : > { %1022 = vmatpush.bf16.msra.mxu0 %v2158_v7  ;;  %2274 = vmatpush.bf16.msra.mxu3 %v2158_v7  ;;  %v1816_v25 = vld [vmem:[%s2663_s30] sm:$0xf]  ;;  %v2106_v26 = vld [vmem:[%s2663_s30 + $0x8] sm:$0xf0]  ;;  %v2105_v29 = vld [vmem:[%s2663_s30 + $0x4] sm:$0xf] }
  0x97   : > { %1111 = vmatpush.bf16.msra.mxu1 %v2166_v8  ;;  %v1960_v27 = vld [vmem:[%s2663_s30 + $0x120] sm:$0xf]  ;;  %v2142_v28 = vld [vmem:[%s2663_s30 + $0x128] sm:$0xf0]  ;;  %v1824_v31 = vld [vmem:[%s2663_s30 + $0x8] sm:$0xf]  ;;  %v1817_v33 = vor.u32 %v2106_v26, %v1816_v25  ;;  %v1821_v35 = vor.u32 %v2105_v29, %v1818_v30 }
  0x98   : > { %1200 = vmatpush.bf16.msra.mxu2 %v2687_v9  ;;  %v1961_v34 = vor.u32 %v2142_v28, %v1960_v27  ;;  %v1825_v36 = vor.u32 %v2107_v32, %v1824_v31  ;;  %v2109_v38 = vld [vmem:[%s2663_s30 + $0x20] sm:$0xf0]  ;;  %v1972_v39 = vld [vmem:[%s2663_s30 + $0x138] sm:$0xf]  ;;  %v2108_v41 = vld [vmem:[%s2663_s30 + $0x1c] sm:$0xf] }
  0x99   : > { %v2145_v40 = vld [vmem:[%s2663_s30 + $0x140] sm:$0xf0]  ;;  %v1830_v42 = vld [vmem:[%s2663_s30 + $0x24] sm:$0xf0]  ;;  %v1836_v43 = vld [vmem:[%s2663_s30 + $0x20] sm:$0xf]  ;;  %v1829_v45 = vor.u32 %v2109_v38, %v1828_v37 }
  0x9a   : > { %1023 = vmatpush.bf16.msra.mxu0 %v2157_v10  ;;  %2275 = vmatpush.bf16.msra.mxu3 %v2157_v10  ;;  %v2110_v44 = vld [vmem:[%s2663_s30 + $0x28] sm:$0xf0]  ;;  %v1973_v46 = vor.u32 %v2145_v40, %v1972_v39  ;;  %v1833_v47 = vor.u32 %v2108_v41, %v1830_v42  ;;  %v1840_v49 = vld [vmem:[%s2663_s30 + $0x30] sm:$0xf]  ;;  %v2112_v50 = vld [vmem:[%s2663_s30 + $0x38] sm:$0xf0] }
  0x9b   : > { %1112 = vmatpush.bf16.msra.mxu1 %v2165_v11  ;;  %v1837_v48 = vor.u32 %v2110_v44, %v1836_v43  ;;  %v1984_v51 = vld [vmem:[%s2663_s30 + $0x150] sm:$0xf]  ;;  %v2148_v52 = vld [vmem:[%s2663_s30 + $0x158] sm:$0xf0]  ;;  %v2111_v53 = vld [vmem:[%s2663_s30 + $0x34] sm:$0xf]  ;;  %v1841_v57 = vor.u32 %v2112_v50, %v1840_v49 }
  0x9c   : > { %1201 = vmatpush.bf16.msra.mxu2 %v2693_v12  ;;  %v1842_v54 = vld [vmem:[%s2663_s30 + $0x3c] sm:$0xf0]  ;;  %v1848_v55 = vld [vmem:[%s2663_s30 + $0x38] sm:$0xf]  ;;  %v2113_v56 = vld [vmem:[%s2663_s30 + $0x40] sm:$0xf0]  ;;  %v1985_v58 = vor.u32 %v2148_v52, %v1984_v51 }
  0x9d   : > { %v1845_v59 = vor.u32 %v2111_v53, %v1842_v54  ;;  %v1849_v60 = vor.u32 %v2113_v56, %v1848_v55  ;;  %v1852_v61 = vld [vmem:[%s2663_s30 + $0x48] sm:$0xf]  ;;  %v2115_v62 = vld [vmem:[%s2663_s30 + $0x50] sm:$0xf0]  ;;  %v2114_v1 = vld [vmem:[%s2663_s30 + $0x4c] sm:$0xf] }
  0x9e   : > { %1024 = vmatpush.bf16.msra.mxu0 %v2156_v13  ;;  %2276 = vmatpush.bf16.msra.mxu3 %v2156_v13  ;;  %v1996_v63 = vld [vmem:[%s2663_s30 + $0x168] sm:$0xf]  ;;  %v2151_v0 = vld [vmem:[%s2663_s30 + $0x170] sm:$0xf0]  ;;  %v2116_v4 = vld [vmem:[%s2663_s30 + $0x58] sm:$0xf0] }
  0x9f   : > { %1113 = vmatpush.bf16.msra.mxu1 %v2164_v14  ;;  %v2118_v10 = vld [vmem:[%s2663_s30 + $0x68] sm:$0xf0]  ;;  %v1962_v13 = vld [vmem:[%s2663_s30 + $0x12c] sm:$0xf0]  ;;  %v2144_v25 = vld [vmem:[%s2663_s30 + $0x13c] sm:$0xf] }
  0xa0   : > { %1202 = vmatpush.bf16.msra.mxu2 %v2699_v15  ;;  %v1974_v26 = vld [vmem:[%s2663_s30 + $0x144] sm:$0xf0]  ;;  %v1884_v27 = vld [vmem:[%s2663_s30 + $0x80] sm:$0xf]  ;;  %v2122_v28 = vld [vmem:[%s2663_s30 + $0x88] sm:$0xf0] }
  0xa1   : > { %v1977_v30 = vor.u32 %v2144_v25, %v1974_v26  ;;  %v1885_v32 = vor.u32 %v2122_v28, %v1884_v27  ;;  %v1986_v37 = vld [vmem:[%s2663_s30 + $0x15c] sm:$0xf0]  ;;  %v1896_v39 = vld [vmem:[%s2663_s30 + $0x98] sm:$0xf]  ;;  %v2125_v40 = vld [vmem:[%s2663_s30 + $0xa0] sm:$0xf0] }
  0xa2   : > { %1025 = vmatpush.bf16.msra.mxu0 %v2155_v16  ;;  %2277 = vmatpush.bf16.msra.mxu3 %v2155_v16  ;;  %v2119_v16 = vld [vmem:[%s2663_s30 + $0x70] sm:$0xf0]  ;;  %v1890_v38 = vld [vmem:[%s2663_s30 + $0x9c] sm:$0xf0]  ;;  %v1897_v44 = vor.u32 %v2125_v40, %v1896_v39  ;;  %v1998_v49 = vld [vmem:[%s2663_s30 + $0x174] sm:$0xf0] }
  0xa3   : > { %1114 = vmatpush.bf16.msra.mxu1 %v2163_v17  ;;  %v1902_v50 = vld [vmem:[%s2663_s30 + $0xb4] sm:$0xf0]  ;;  %v1908_v51 = vld [vmem:[%s2663_s30 + $0xb0] sm:$0xf]  ;;  %v2128_v52 = vld [vmem:[%s2663_s30 + $0xb8] sm:$0xf0] }
  0xa4   : > { %1203 = vmatpush.bf16.msra.mxu2 %v2705_v18  ;;  %v1909_v56 = vor.u32 %v2128_v52, %v1908_v51  ;;  %v477_v26 = vld [vmem:[#allocation2] sm:$0xff] }
  0xa6   : > { %1026 = vmatpush.bf16.msra.mxu0 %v2154_v19  ;;  %2278 = vmatpush.bf16.msra.mxu3 %v2154_v19 }
  0xa7   : > { %1115 = vmatpush.bf16.msra.mxu1 %v2162_v20 }
  0xa8   : > { %1204 = vmatpush.bf16.msra.mxu2 %v2711_v21 }
  0xaa   : > { %1027 = vmatpush.bf16.msra.mxu0 %v2153_v22  ;;  %2279 = vmatpush.bf16.msra.mxu3 %v2153_v22  ;;  %v2121_v22 = vld [vmem:[%s2663_s30 + $0x80] sm:$0xf0] }
  0xab   : > { %1116 = vmatpush.bf16.msra.mxu1 %v2161_v23 }
  0xac   : > { %1205 = vmatpush.bf16.msra.mxu2 %v2716_v24 }
  0xad   : > { %1028 = vmatmul.bf16.vlgmr.msra.gmra.mxu0 %v1817_v33  ;;  %1088 = vmatmul.bf16.vlgmr.msra.gmra.mxu3 %v1961_v34  ;;  %v1888_v33 = vld [vmem:[%s2663_s30 + $0x90] sm:$0xf]  ;;  %v2124_v34 = vld [vmem:[%s2663_s30 + $0x98] sm:$0xf0] }
  0xae   : > { %2280 = vmatpush.bf16.msrb.mxu3 %v2668_v2  ;;  %1117 = vmatmul.bf16.vlgmr.msra.gmra.mxu1 %v1821_v35  ;;  %v1854_v2 = vld [vmem:[%s2663_s30 + $0x54] sm:$0xf0]  ;;  %v2123_v35 = vld [vmem:[%s2663_s30 + $0x94] sm:$0xf]  ;;  %v1889_v41 = vor.u32 %v2124_v34, %v1888_v33 }
  0xaf   : > { %1206 = vmatmul.bf16.vlgmr.msra.gmra.mxu2 %v1825_v36  ;;  %v1857_v7 = vor.u32 %v2114_v1, %v1854_v2  ;;  %v2147_v36 = vld [vmem:[%s2663_s30 + $0x154] sm:$0xf]  ;;  %v1893_v43 = vor.u32 %v2123_v35, %v1890_v38 }
  0xb0   : > { %v1989_v42 = vor.u32 %v2147_v36, %v1986_v37  ;;  %v478_v37 = vld [vmem:[#allocation2 + $0xd8] sm:$0xff] }
  0xb2   : > { %2281 = vmatpush.bf16.msrb.mxu3 %v2677_v5  ;;  %v1853_v5 = vor.u32 %v2115_v62, %v1852_v61  ;;  %v2143_v61 = vld [vmem:[%s2663_s30 + $0x130] sm:$0xf0]  ;;  %v1914_v62 = vld [vmem:[%s2663_s30 + $0xcc] sm:$0xf0] }
  0xb6   : > { %2282 = vmatpush.bf16.msrb.mxu3 %v2166_v8 }
  0xba   : > { %2283 = vmatpush.bf16.msrb.mxu3 %v2165_v11  ;;  %v2117_v11 = vld [vmem:[%s2663_s30 + $0x64] sm:$0xf] }
  0xbd   : > { %1033 = vmatmul.bf16.gmra.mxu0 %v1829_v45  ;;  %1093 = vmatmul.bf16.gmra.mxu3 %v1973_v46  ;;  %v1900_v45 = vld [vmem:[%s2663_s30 + $0xa8] sm:$0xf]  ;;  %v2127_v46 = vld [vmem:[%s2663_s30 + $0xb0] sm:$0xf0] }
  0xbe   : > { %2284 = vmatpush.bf16.msrb.mxu3 %v2164_v14  ;;  %1122 = vmatmul.bf16.gmra.mxu1 %v1833_v47  ;;  %v1866_v14 = vld [vmem:[%s2663_s30 + $0x6c] sm:$0xf0]  ;;  %v2126_v47 = vld [vmem:[%s2663_s30 + $0xac] sm:$0xf]  ;;  %v1901_v53 = vor.u32 %v2127_v46, %v1900_v45  ;;  %v2135_v45 = vld [vmem:[%s2663_s30 + $0xf4] sm:$0xf] }
  0xbf   : > { %1211 = vmatmul.bf16.gmra.mxu2 %v1837_v48  ;;  %v1869_v19 = vor.u32 %v2117_v11, %v1866_v14  ;;  %v2150_v48 = vld [vmem:[%s2663_s30 + $0x16c] sm:$0xf]  ;;  %v1905_v55 = vor.u32 %v2126_v47, %v1902_v50  ;;  %v1992_v46 = vld [vmem:[%s2663_s30 + $0x158] sm:$0xf]  ;;  %v2149_v47 = vld [vmem:[%s2663_s30 + $0x160] sm:$0xf0] }
  0xc0   : > { %v2001_v54 = vor.u32 %v2150_v48, %v1998_v49  ;;  %v1938_v48 = vld [vmem:[%s2663_s30 + $0xfc] sm:$0xf0]  ;;  %v1944_v49 = vld [vmem:[%s2663_s30 + $0xf8] sm:$0xf]  ;;  %v2137_v50 = vld [vmem:[%s2663_s30 + $0x100] sm:$0xf0] }
  0xc2   : > { %2285 = vmatpush.bf16.msrb.mxu3 %v2163_v17 }
  0xc6   : > { %2286 = vmatpush.bf16.msrb.mxu3 %v2162_v20 }
  0xca   : > { %2287 = vmatpush.bf16.msrb.mxu3 %v2161_v23  ;;  %v2120_v23 = vld [vmem:[%s2663_s30 + $0x7c] sm:$0xf] }
  0xcd   : > { %1038 = vmatmul.bf16.gmra.mxu0 %v1841_v57  ;;  %1098 = vmatmul.bf16.gmra.mxu3 %v1985_v58  ;;  %v1912_v57 = vld [vmem:[%s2663_s30 + $0xc0] sm:$0xf]  ;;  %v2130_v58 = vld [vmem:[%s2663_s30 + $0xc8] sm:$0xf0] }
  0xce   : > { %2288 = vmatpush.bf16.msra.mxu3 %v2671_v3  ;;  %1127 = vmatmul.bf16.gmra.mxu1 %v1845_v59  ;;  %v1860_v3 = vld [vmem:[%s2663_s30 + $0x50] sm:$0xf]  ;;  %v2129_v59 = vld [vmem:[%s2663_s30 + $0xc4] sm:$0xf]  ;;  %v1913_v1 = vor.u32 %v2130_v58, %v1912_v57 }
  0xcf   : > { %1216 = vmatmul.bf16.gmra.mxu2 %v1849_v60  ;;  %v1861_v8 = vor.u32 %v2116_v4, %v1860_v3  ;;  %v1968_v60 = vld [vmem:[%s2663_s30 + $0x128] sm:$0xf]  ;;  %v1917_v4 = vor.u32 %v2129_v59, %v1914_v62  ;;  %v1941_v59 = vor.u32 %v2135_v45, %v1938_v48  ;;  %v484_v48 = vld [vmem:[#allocation2 + $0x80] sm:$0xff] }
  0xd0   : > { %v1969_v2 = vor.u32 %v2143_v61, %v1968_v60  ;;  %v1945_v60 = vor.u32 %v2137_v50, %v1944_v49 }
  0xd2   : > { %2289 = vmatpush.bf16.msra.mxu3 %v2680_v6  ;;  %v1997_v6 = vor.u32 %v2151_v0, %v1996_v63  ;;  %v1920_v63 = vld [vmem:[%s2663_s30 + $0xc8] sm:$0xf]  ;;  %v2131_v0 = vld [vmem:[%s2663_s30 + $0xd0] sm:$0xf0] }
  0xd6   : > { %2290 = vmatpush.bf16.msra.mxu3 %v2687_v9  ;;  %v1864_v9 = vld [vmem:[%s2663_s30 + $0x60] sm:$0xf] }
  0xd7   : > { %v1865_v17 = vor.u32 %v2118_v10, %v1864_v9  ;;  %v476_v9 = vld [vmem:[#allocation2 + $0xb0] sm:$0xff] }
  0xda   : > { %2291 = vmatpush.bf16.msra.mxu3 %v2693_v12  ;;  %v2141_v12 = vld [vmem:[%s2663_s30 + $0x124] sm:$0xf] }
  0xdd   : > { %1043 = vmatmul.bf16.gmra.mxu0 %v1853_v5  ;;  %1103 = vmatmul.bf16.gmra.mxu3 %v1997_v6  ;;  %v1921_v5 = vor.u32 %v2131_v0, %v1920_v63 }
  0xde   : > { %2292 = vmatpush.bf16.msra.mxu3 %v2699_v15  ;;  %1132 = vmatmul.bf16.gmra.mxu1 %v1857_v7  ;;  %v1872_v15 = vld [vmem:[%s2663_s30 + $0x68] sm:$0xf] }
  0xdf   : > { %1221 = vmatmul.bf16.gmra.mxu2 %v1861_v8  ;;  %v1873_v20 = vor.u32 %v2119_v16, %v1872_v15  ;;  %v1924_v15 = vld [vmem:[%s2663_s30 + $0xd8] sm:$0xf]  ;;  %v2133_v16 = vld [vmem:[%s2663_s30 + $0xe0] sm:$0xf0] }
  0xe0   : > { %v1925_v27 = vor.u32 %v2133_v16, %v1924_v15  ;;  %v2140_v15 = vld [vmem:[%s2663_s30 + $0x118] sm:$0xf0] }
  0xe2   : > { %2293 = vmatpush.bf16.msra.mxu3 %v2705_v18  ;;  %v1965_v18 = vor.u32 %v2141_v12, %v1962_v13 }
  0xe6   : > { %2294 = vmatpush.bf16.msra.mxu3 %v2711_v21  ;;  %v1876_v21 = vld [vmem:[%s2663_s30 + $0x78] sm:$0xf] }
  0xe7   : > { %v1877_v29 = vor.u32 %v2121_v22, %v1876_v21  ;;  %v1932_v21 = vld [vmem:[%s2663_s30 + $0xe0] sm:$0xf]  ;;  %v2134_v22 = vld [vmem:[%s2663_s30 + $0xe8] sm:$0xf0] }
  0xea   : > { %2295 = vmatpush.bf16.msra.mxu3 %v2716_v24  ;;  %v1878_v24 = vld [vmem:[%s2663_s30 + $0x84] sm:$0xf0] }
  0xeb   : > { %v1881_v31 = vor.u32 %v2120_v23, %v1878_v24 }
  0xed   : > { %1048 = vmatmul.bf16.gmra.mxu0 %v1865_v17  ;;  %1177 = vmatmul.bf16.vlgmr.msrb.gmra.mxu3 %v1965_v18  ;;  %v2132_v17 = vld [vmem:[%s2663_s30 + $0xdc] sm:$0xf]  ;;  %v1980_v18 = vld [vmem:[%s2663_s30 + $0x140] sm:$0xf] }
  0xee   : > { %1137 = vmatmul.bf16.gmra.mxu1 %v1869_v19  ;;  %v2146_v19 = vld [vmem:[%s2663_s30 + $0x148] sm:$0xf0] }
  0xef   : > { %1226 = vmatmul.bf16.gmra.mxu2 %v1873_v20  ;;  %v1926_v20 = vld [vmem:[%s2663_s30 + $0xe4] sm:$0xf0]  ;;  %v1981_v28 = vor.u32 %v2146_v19, %v1980_v18 }
  0xf0   : > { %v481_v18 = vld [vmem:[#allocation2 + $0x68] sm:$0xff] }
  0xfd   : > { %1053 = vmatmul.bf16.gmra.mxu0 %v1877_v29  ;;  %1182 = vmatmul.bf16.gmra.mxu3 %v1977_v30 }
  0xfe   : > { %1142 = vmatmul.bf16.gmra.mxu1 %v1881_v31  ;;  %v1929_v31 = vor.u32 %v2132_v17, %v1926_v20 }
  0xff   : > { %1231 = vmatmul.bf16.gmra.mxu2 %v1885_v32  ;;  %v1933_v32 = vor.u32 %v2134_v22, %v1932_v21 }
 0x10d   : > { %1058 = vmatmul.bf16.gmra.mxu0 %v1889_v41  ;;  %1187 = vmatmul.bf16.gmra.mxu3 %v1989_v42 }
 0x10e   : > { %1147 = vmatmul.bf16.gmra.mxu1 %v1893_v43  ;;  %v1936_v43 = vld [vmem:[%s2663_s30 + $0xf0] sm:$0xf] }
 0x10f   : > { %1236 = vmatmul.bf16.gmra.mxu2 %v1897_v44  ;;  %v2136_v44 = vld [vmem:[%s2663_s30 + $0xf8] sm:$0xf0] }
 0x11d   : > { %1063 = vmatmul.bf16.gmra.mxu0 %v1901_v53  ;;  %1192 = vmatmul.bf16.gmra.mxu3 %v2001_v54  ;;  %v479_v53 = vld [vmem:[#allocation2 + $0x18] sm:$0xff] }
 0x11e   : > { %1152 = vmatmul.bf16.gmra.mxu1 %v1905_v55  ;;  %v1937_v55 = vor.u32 %v2136_v44, %v1936_v43 }
 0x11f   : > { %1241 = vmatmul.bf16.gmra.mxu2 %v1909_v56  ;;  %v1993_v56 = vor.u32 %v2149_v47, %v1992_v46 }
 0x12a   : > { %v1029_v3 = vpop.f32.mrf.mxu0 }
 0x12b   : > { %v1118_v6 = vpop.f32.mrf.mxu1 }
 0x12c   : > { %v1119_v7 = vadd.f32 %v1118_v6, %v1029_v3 }
 0x12d   : > { %1068 = vmatmul.bf16.gmra.mxu0 %v1913_v1  ;;  %1266 = vmatmul.bf16.vlgmr.msra.gmra.mxu3 %v1969_v2  ;;  %v480_v1 = vld [vmem:[#allocation2 + $0x50] sm:$0xff] }
 0x12e   : > { %1157 = vmatmul.bf16.gmra.mxu1 %v1917_v4 }
 0x12f   : > { %1246 = vmatmul.bf16.gmra.mxu2 %v1921_v5 }
 0x130   : > { %v2802_v8 = vpop.f32.mrf.mxu3 }
 0x132   : > { %v1207_v10 = vpop.f32.mrf.mxu2  ;;  %v1031_v12 = vpop.f32.mrf.mxu0 }
 0x133   : > { %v1208_v11 = vadd.f32 %v1207_v10, %v1119_v7  ;;  %v1120_v13 = vpop.f32.mrf.mxu1  ;;  %v1948_v7 = vld [vmem:[%s2663_s30 + $0x108] sm:$0xf]  ;;  %v2138_v10 = vld [vmem:[%s2663_s30 + $0x10c] sm:$0xf] }
 0x134   : > { %v1121_v23 = vadd.f32 %v1120_v13, %v1031_v12  ;;  %v2152_v12 = vld [vmem:[%s2663_s30 + $0x178] sm:$0xf0]  ;;  %v1950_v13 = vld [vmem:[%s2663_s30 + $0x114] sm:$0xf0] }
 0x135   : > { %v1287_v14 = vadd.f32 %v1208_v11, %v476_v9  ;;  %v2139_v9 = vld [vmem:[%s2663_s30 + $0x110] sm:$0xf0]  ;;  %v2004_v11 = vld [vmem:[%s2663_s30 + $0x170] sm:$0xf] }
 0x136   : > { %v1949_v20 = vor.u32 %v2139_v9, %v1948_v7  ;;  %v2005_v21 = vor.u32 %v2152_v12, %v2004_v11  ;;  %v487_v11 = vld [vmem:[#allocation2 + $0xb8] sm:$0xff] }
 0x137   : > { %1319 = vst [vmem:[#allocation2 + $0xb0] sm:$0xff] %v1287_v14  ;;  %v1956_v14 = vld [vmem:[%s2663_s30 + $0x110] sm:$0xf] }
 0x138   : > { %v2812_v25 = vpop.f32.mrf.mxu3 }
 0x13a   : > { %v1209_v24 = vpop.f32.mrf.mxu2  ;;  %v1034_v30 = vpop.f32.mrf.mxu0 }
 0x13b   : > { %v1210_v29 = vadd.f32 %v1209_v24, %v1121_v23  ;;  %v1123_v33 = vpop.f32.mrf.mxu1  ;;  %v1957_v24 = vor.u32 %v2140_v15, %v1956_v14 }
 0x13c   : > { %v1124_v35 = vadd.f32 %v1123_v33, %v1034_v30 }
 0x13d   : > { %v1288_v34 = vadd.f32 %v1210_v29, %v477_v26  ;;  %1073 = vmatmul.bf16.gmra.mxu0 %v1925_v27  ;;  %1271 = vmatmul.bf16.gmra.mxu3 %v1981_v28  ;;  %v1953_v26 = vor.u32 %v2138_v10, %v1950_v13 }
 0x13e   : > { %1162 = vmatmul.bf16.gmra.mxu1 %v1929_v31  ;;  %v482_v31 = vld [vmem:[#allocation2 + $0x30] sm:$0xff] }
 0x13f   : > { %1320 = vst [vmem:[#allocation2] sm:$0xff] %v1288_v34  ;;  %1251 = vmatmul.bf16.gmra.mxu2 %v1933_v32 }
 0x140   : > { %v2814_v36 = vpop.f32.mrf.mxu3 }
 0x142   : > { %v1212_v38 = vpop.f32.mrf.mxu2  ;;  %v1036_v40 = vpop.f32.mrf.mxu0 }
 0x143   : > { %v1213_v39 = vadd.f32 %v1212_v38, %v1124_v35  ;;  %v1125_v41 = vpop.f32.mrf.mxu1 }
 0x144   : > { %v1126_v51 = vadd.f32 %v1125_v41, %v1036_v40  ;;  %v483_v40 = vld [vmem:[#allocation2 + $0x48] sm:$0xff] }
 0x145   : > { %v1289_v42 = vadd.f32 %v1213_v39, %v478_v37 }
 0x147   : > { %1321 = vst [vmem:[#allocation2 + $0xd8] sm:$0xff] %v1289_v42 }
 0x148   : > { %v2824_v52 = vpop.f32.mrf.mxu3 }
 0x14a   : > { %v1214_v54 = vpop.f32.mrf.mxu2  ;;  %v1039_v58 = vpop.f32.mrf.mxu0 }
 0x14b   : > { %v1215_v57 = vadd.f32 %v1214_v54, %v1126_v51  ;;  %v1128_v61 = vpop.f32.mrf.mxu1 }
 0x14c   : > { %v1129_v63 = vadd.f32 %v1128_v61, %v1039_v58 }
 0x14d   : > { %v1290_v62 = vadd.f32 %v1215_v57, %v479_v53  ;;  %1078 = vmatmul.bf16.gmra.mxu0 %v1937_v55  ;;  %1276 = vmatmul.bf16.gmra.mxu3 %v1993_v56  ;;  %v485_v57 = vld [vmem:[#allocation2 + $0x88] sm:$0xff] }
 0x14e   : > { %1167 = vmatmul.bf16.gmra.mxu1 %v1941_v59 }
 0x14f   : > { %1322 = vst [vmem:[#allocation2 + $0x18] sm:$0xff] %v1290_v62  ;;  %1256 = vmatmul.bf16.gmra.mxu2 %v1945_v60 }
 0x150   : > { %v2826_v0 = vpop.f32.mrf.mxu3 }
 0x152   : > { %v1217_v2 = vpop.f32.mrf.mxu2  ;;  %v1041_v4 = vpop.f32.mrf.mxu0 }
 0x153   : > { %v1218_v3 = vadd.f32 %v1217_v2, %v1129_v63  ;;  %v1130_v5 = vpop.f32.mrf.mxu1  ;;  %v486_v2 = vld [vmem:[#allocation2 + $0xe8] sm:$0xff] }
 0x154   : > { %v1131_v16 = vadd.f32 %v1130_v5, %v1041_v4 }
 0x155   : > { %v1291_v6 = vadd.f32 %v1218_v3, %v480_v1 }
 0x157   : > { %1323 = vst [vmem:[#allocation2 + $0x50] sm:$0xff] %v1291_v6 }
 0x158   : > { %v2836_v17 = vpop.f32.mrf.mxu3 }
 0x15a   : > { %v1219_v19 = vpop.f32.mrf.mxu2  ;;  %v1044_v23 = vpop.f32.mrf.mxu0 }
 0x15b   : > { %v1220_v22 = vadd.f32 %v1219_v19, %v1131_v16  ;;  %v1133_v27 = vpop.f32.mrf.mxu1 }
 0x15c   : > { %v1134_v29 = vadd.f32 %v1133_v27, %v1044_v23 }
 0x15d   : > { %v1292_v28 = vadd.f32 %v1220_v22, %v481_v18  ;;  %1083 = vmatmul.bf16.gmra.mxu0 %v1949_v20  ;;  %1281 = vmatmul.bf16.gmra.mxu3 %v2005_v21  ;;  %v488_v20 = vld [vmem:[#allocation2 + $0x60] sm:$0xff] }
 0x15e   : > { %1172 = vmatmul.bf16.gmra.mxu1 %v1953_v26 }
 0x15f   : > { %1324 = vst [vmem:[#allocation2 + $0x68] sm:$0xff] %v1292_v28  ;;  %1261 = vmatmul.bf16.gmra.mxu2 %v1957_v24 }
 0x160   : > { %v2838_v30 = vpop.f32.mrf.mxu3 }
 0x162   : > { %v1222_v32 = vpop.f32.mrf.mxu2  ;;  %v1046_v34 = vpop.f32.mrf.mxu0 }
 0x163   : > { %v1223_v33 = vadd.f32 %v1222_v32, %v1134_v29  ;;  %v1135_v35 = vpop.f32.mrf.mxu1  ;;  %v489_v29 = vld [vmem:[#allocation2 + $0xf0] sm:$0xff] }
 0x164   : > { %v1136_v38 = vadd.f32 %v1135_v35, %v1046_v34 }
 0x165   : > { %v1293_v37 = vadd.f32 %v1223_v33, %v482_v31 }
 0x167   : > { %1325 = vst [vmem:[#allocation2 + $0x30] sm:$0xff] %v1293_v37 }
 0x168   : > { %v2840_v39 = vpop.f32.mrf.mxu3 }
 0x16a   : > { %v1224_v41 = vpop.f32.mrf.mxu2  ;;  %v1049_v43 = vpop.f32.mrf.mxu0 }
 0x16b   : > { %v1225_v42 = vadd.f32 %v1224_v41, %v1136_v38  ;;  %v1138_v44 = vpop.f32.mrf.mxu1 }
 0x16c   : > { %v1139_v46 = vadd.f32 %v1138_v44, %v1049_v43 }
 0x16d   : > { %v1294_v45 = vadd.f32 %v1225_v42, %v483_v40  ;;  %v490_v40 = vld [vmem:[#allocation2 + $0x8] sm:$0xff] }
 0x16f   : > { %1326 = vst [vmem:[#allocation2 + $0x48] sm:$0xff] %v1294_v45 }
 0x170   : > { %v2842_v47 = vpop.f32.mrf.mxu3 }
 0x172   : > { %v1227_v49 = vpop.f32.mrf.mxu2  ;;  %v1051_v51 = vpop.f32.mrf.mxu0 }
 0x173   : > { %v1228_v50 = vadd.f32 %v1227_v49, %v1139_v46  ;;  %v1140_v53 = vpop.f32.mrf.mxu1  ;;  %v491_v49 = vld [vmem:[#allocation2 + $0x78] sm:$0xff] }
 0x174   : > { %v1141_v55 = vadd.f32 %v1140_v53, %v1051_v51 }
 0x175   : > { %v1295_v54 = vadd.f32 %v1228_v50, %v484_v48 }
 0x177   : > { %1327 = vst [vmem:[#allocation2 + $0x80] sm:$0xff] %v1295_v54 }
 0x178   : > { %v2844_v56 = vpop.f32.mrf.mxu3 }
 0x17a   : > { %v1229_v58 = vpop.f32.mrf.mxu2  ;;  %v1054_v60 = vpop.f32.mrf.mxu0 }
 0x17b   : > { %v1230_v59 = vadd.f32 %v1229_v58, %v1141_v55  ;;  %v1143_v61 = vpop.f32.mrf.mxu1  ;;  %v1179_v58 = vadd.f32 %v2842_v47, %v2802_v8 }
 0x17c   : > { %v1144_v63 = vadd.f32 %v1143_v61, %v1054_v60  ;;  %v492_v61 = vld [vmem:[#allocation2 + $0x38] sm:$0xff] }
 0x17d   : > { %v1296_v62 = vadd.f32 %v1230_v59, %v485_v57  ;;  %v500_v59 = vld [vmem:[#allocation2 + $0xa8] sm:$0xff] }
 0x17f   : > { %1328 = vst [vmem:[#allocation2 + $0x88] sm:$0xff] %v1296_v62 }
 0x180   : > { %v2846_v1 = vpop.f32.mrf.mxu3 }
 0x182   : > { %v1232_v3 = vpop.f32.mrf.mxu2  ;;  %v1056_v5 = vpop.f32.mrf.mxu0 }
 0x183   : > { %v1233_v4 = vadd.f32 %v1232_v3, %v1144_v63  ;;  %v1145_v6 = vpop.f32.mrf.mxu1 }
 0x184   : > { %v1146_v9 = vadd.f32 %v1145_v6, %v1056_v5 }
 0x185   : > { %v1297_v7 = vadd.f32 %v1233_v4, %v486_v2 }
 0x187   : > { %1329 = vst [vmem:[#allocation2 + $0xe8] sm:$0xff] %v1297_v7  ;;  %v1181_v7 = vadd.f32 %v2844_v56, %v2812_v25  ;;  %v494_v25 = vld [vmem:[#allocation2 + $0x40] sm:$0xff] }
 0x188   : > { %v2848_v10 = vpop.f32.mrf.mxu3 }
 0x18a   : > { %v1234_v12 = vpop.f32.mrf.mxu2  ;;  %v1059_v14 = vpop.f32.mrf.mxu0 }
 0x18b   : > { %v1235_v13 = vadd.f32 %v1234_v12, %v1146_v9  ;;  %v1148_v15 = vpop.f32.mrf.mxu1 }
 0x18c   : > { %v1149_v18 = vadd.f32 %v1148_v15, %v1059_v14 }
 0x18d   : > { %v1298_v16 = vadd.f32 %v1235_v13, %v487_v11  ;;  %v501_v11 = vld [vmem:[#allocation2 + $0xd0] sm:$0xff]  ;;  %v493_v13 = vld [vmem:[#allocation2 + $0x58] sm:$0xff] }
 0x18f   : > { %1330 = vst [vmem:[#allocation2 + $0xb8] sm:$0xff] %v1298_v16 }
 0x190   : > { %v2850_v19 = vpop.f32.mrf.mxu3 }
 0x192   : > { %v1237_v21 = vpop.f32.mrf.mxu2  ;;  %v1061_v23 = vpop.f32.mrf.mxu0 }
 0x193   : > { %v1238_v22 = vadd.f32 %v1237_v21, %v1149_v18  ;;  %v1150_v26 = vpop.f32.mrf.mxu1 }
 0x194   : > { %v1151_v27 = vadd.f32 %v1150_v26, %v1061_v23  ;;  %v502_v23 = vld [vmem:[#allocation2 + $0x10] sm:$0xff] }
 0x195   : > { %v1299_v24 = vadd.f32 %v1238_v22, %v488_v20  ;;  %v1184_v22 = vadd.f32 %v2846_v1, %v2814_v36 }
 0x197   : > { %1331 = vst [vmem:[#allocation2 + $0x60] sm:$0xff] %v1299_v24 }
 0x198   : > { %v2852_v28 = vpop.f32.mrf.mxu3 }
 0x19a   : > { %v1239_v31 = vpop.f32.mrf.mxu2  ;;  %v1064_v33 = vpop.f32.mrf.mxu0 }
 0x19b   : > { %v1240_v32 = vadd.f32 %v1239_v31, %v1151_v27  ;;  %v1153_v34 = vpop.f32.mrf.mxu1 }
 0x19c   : > { %v1154_v37 = vadd.f32 %v1153_v34, %v1064_v33  ;;  %v1186_v34 = vadd.f32 %v2848_v10, %v2824_v52  ;;  %v496_v52 = vld [vmem:[#allocation2 + $0xe0] sm:$0xff] }
 0x19d   : > { %v1300_v35 = vadd.f32 %v1240_v32, %v489_v29 }
 0x19f   : > { %1332 = vst [vmem:[#allocation2 + $0xf0] sm:$0xff] %v1300_v35 }
 0x1a0   : > { %v2854_v38 = vpop.f32.mrf.mxu3 }
 0x1a2   : > { %v1242_v41 = vpop.f32.mrf.mxu2  ;;  %v1066_v43 = vpop.f32.mrf.mxu0 }
 0x1a3   : > { %v1243_v42 = vadd.f32 %v1242_v41, %v1154_v37  ;;  %v1155_v44 = vpop.f32.mrf.mxu1  ;;  %v503_v37 = vld [vmem:[#allocation2 + $0x28] sm:$0xff] }
 0x1a4   : > { %v1156_v46 = vadd.f32 %v1155_v44, %v1066_v43  ;;  %v495_v41 = vld [vmem:[#allocation2 + $0xc8] sm:$0xff] }
 0x1a5   : > { %v1301_v45 = vadd.f32 %v1243_v42, %v490_v40 }
 0x1a7   : > { %1333 = vst [vmem:[#allocation2 + $0x8] sm:$0xff] %v1301_v45 }
 0x1a8   : > { %v2856_v48 = vpop.f32.mrf.mxu3 }
 0x1aa   : > { %v1244_v50 = vpop.f32.mrf.mxu2  ;;  %v1069_v53 = vpop.f32.mrf.mxu0 }
 0x1ab   : > { %v1245_v51 = vadd.f32 %v1244_v50, %v1156_v46  ;;  %v1158_v54 = vpop.f32.mrf.mxu1  ;;  %v1189_v50 = vadd.f32 %v2850_v19, %v2826_v0 }
 0x1ac   : > { %v1159_v57 = vadd.f32 %v1158_v54, %v1069_v53 }
 0x1ad   : > { %v1302_v55 = vadd.f32 %v1245_v51, %v491_v49  ;;  %v504_v51 = vld [vmem:[#allocation2 + $0xa0] sm:$0xff] }
 0x1af   : > { %1334 = vst [vmem:[#allocation2 + $0x78] sm:$0xff] %v1302_v55 }
 0x1b0   : > { %v1267_v60 = vpop.f32.mrf.mxu3 }
 0x1b1   : > { %v1268_v63 = vadd.f32 %v1267_v60, %v1179_v58 }
 0x1b2   : > { %v1247_v62 = vpop.f32.mrf.mxu2  ;;  %v1071_v3 = vpop.f32.mrf.mxu0 }
 0x1b3   : > { %v1248_v2 = vadd.f32 %v1247_v62, %v1159_v57  ;;  %v1311_v4 = vadd.f32 %v1268_v63, %v500_v59  ;;  %v1160_v5 = vpop.f32.mrf.mxu1  ;;  %v505_v63 = vld [vmem:[#allocation2 + $0xf8] sm:$0xff] }
 0x1b4   : > { %v1161_v9 = vadd.f32 %v1160_v5, %v1071_v3  ;;  %v497_v3 = vld [vmem:[#allocation2 + $0x90] sm:$0xff] }
 0x1b5   : > { %v1303_v6 = vadd.f32 %v1248_v2, %v492_v61  ;;  %1343 = vst [vmem:[#allocation2 + $0xa8] sm:$0xff] %v1311_v4  ;;  %v1191_v61 = vadd.f32 %v2852_v28, %v2836_v17  ;;  %v498_v17 = vld [vmem:[#allocation2 + $0x70] sm:$0xff] }
 0x1b7   : > { %1335 = vst [vmem:[#allocation2 + $0x38] sm:$0xff] %v1303_v6 }
 0x1b8   : > { %v1269_v12 = vpop.f32.mrf.mxu3 }
 0x1b9   : > { %v1270_v47 = vadd.f32 %v1269_v12, %v1181_v7  ;;  %v1194_v12 = vadd.f32 %v2854_v38, %v2838_v30 }
 0x1ba   : > { %v1249_v8 = vpop.f32.mrf.mxu2  ;;  %v1074_v15 = vpop.f32.mrf.mxu0 }
 0x1bb   : > { %v1250_v14 = vadd.f32 %v1249_v8, %v1161_v9  ;;  %v1312_v16 = vadd.f32 %v1270_v47, %v501_v11  ;;  %v1163_v18 = vpop.f32.mrf.mxu1 }
 0x1bc   : > { %v1164_v21 = vadd.f32 %v1163_v18, %v1074_v15 }
 0x1bd   : > { %v1304_v20 = vadd.f32 %v1250_v14, %v493_v13  ;;  %1344 = vst [vmem:[#allocation2 + $0xd0] sm:$0xff] %v1312_v16  ;;  %v506_v13 = vld [vmem:[#allocation2 + $0x20] sm:$0xff] }
 0x1bf   : > { %1336 = vst [vmem:[#allocation2 + $0x58] sm:$0xff] %v1304_v20 }
 0x1c0   : > { %v1272_v26 = vpop.f32.mrf.mxu3 }
 0x1c1   : > { %v1273_v24 = vadd.f32 %v1272_v26, %v1184_v22 }
 0x1c2   : > { %v1252_v56 = vpop.f32.mrf.mxu2  ;;  %v1076_v29 = vpop.f32.mrf.mxu0 }
 0x1c3   : > { %v1253_v27 = vadd.f32 %v1252_v56, %v1164_v21  ;;  %v1313_v31 = vadd.f32 %v1273_v24, %v502_v23  ;;  %v1165_v32 = vpop.f32.mrf.mxu1  ;;  %v1196_v21 = vadd.f32 %v2856_v48, %v2840_v39  ;;  %v507_v23 = vld [vmem:[#allocation2 + $0x98] sm:$0xff] }
 0x1c4   : > { %v1166_v35 = vadd.f32 %v1165_v32, %v1076_v29 }
 0x1c5   : > { %v1305_v33 = vadd.f32 %v1253_v27, %v494_v25  ;;  %1345 = vst [vmem:[#allocation2 + $0x10] sm:$0xff] %v1313_v31  ;;  %v499_v25 = vld [vmem:[#allocation2 + $0xc0] sm:$0xff] }
 0x1c7   : > { %1337 = vst [vmem:[#allocation2 + $0x40] sm:$0xff] %v1305_v33 }
 0x1c8   : > { %v1274_v40 = vpop.f32.mrf.mxu3 }
 0x1c9   : > { %v1275_v1 = vadd.f32 %v1274_v40, %v1186_v34 }
 0x1ca   : > { %v1254_v36 = vpop.f32.mrf.mxu2  ;;  %v1079_v43 = vpop.f32.mrf.mxu0 }
 0x1cb   : > { %v1255_v42 = vadd.f32 %v1254_v36, %v1166_v35  ;;  %v1314_v44 = vadd.f32 %v1275_v1, %v503_v37  ;;  %v1168_v45 = vpop.f32.mrf.mxu1 }
 0x1cc   : > { %v1169_v49 = vadd.f32 %v1168_v45, %v1079_v43 }
 0x1cd   : > { %v1306_v46 = vadd.f32 %v1255_v42, %v495_v41  ;;  %1346 = vst [vmem:[#allocation2 + $0x28] sm:$0xff] %v1314_v44 }
 0x1cf   : > { %1338 = vst [vmem:[#allocation2 + $0xc8] sm:$0xff] %v1306_v46 }
 0x1d0   : > { %v1277_v53 = vpop.f32.mrf.mxu3 }
 0x1d1   : > { %v1278_v54 = vadd.f32 %v1277_v53, %v1189_v50 }
 0x1d2   : > { %v1257_v10 = vpop.f32.mrf.mxu2  ;;  %v1081_v57 = vpop.f32.mrf.mxu0 }
 0x1d3   : > { %v1258_v55 = vadd.f32 %v1257_v10, %v1169_v49  ;;  %v1315_v58 = vadd.f32 %v1278_v54, %v504_v51  ;;  %v1170_v59 = vpop.f32.mrf.mxu1 }
 0x1d4   : > { %v1171_v62 = vadd.f32 %v1170_v59, %v1081_v57 }
 0x1d5   : > { %v1307_v60 = vadd.f32 %v1258_v55, %v496_v52  ;;  %1347 = vst [vmem:[#allocation2 + $0xa0] sm:$0xff] %v1315_v58 }
 0x1d7   : > { %1339 = vst [vmem:[#allocation2 + $0xe0] sm:$0xff] %v1307_v60 }
 0x1d8   : > { %v1279_v2 = vpop.f32.mrf.mxu3 }
 0x1d9   : > { %v1280_v19 = vadd.f32 %v1279_v2, %v1191_v61 }
 0x1da   : > { %v1259_v0 = vpop.f32.mrf.mxu2  ;;  %v1084_v6 = vpop.f32.mrf.mxu0 }
 0x1db   : > { %v1260_v4 = vadd.f32 %v1259_v0, %v1171_v62  ;;  %v1316_v5 = vadd.f32 %v1280_v19, %v505_v63  ;;  %v1173_v7 = vpop.f32.mrf.mxu1 }
 0x1dc   : > { %v1174_v11 = vadd.f32 %v1173_v7, %v1084_v6 }
 0x1dd   : > { %v1308_v9 = vadd.f32 %v1260_v4, %v497_v3  ;;  %1348 = vst [vmem:[#allocation2 + $0xf8] sm:$0xff] %v1316_v5 }
 0x1df   : > { %1340 = vst [vmem:[#allocation2 + $0x90] sm:$0xff] %v1308_v9 }
 0x1e0   : > { %v1282_v8 = vpop.f32.mrf.mxu3 }
 0x1e1   : > { %v1283_v47 = vadd.f32 %v1282_v8, %v1194_v12 }
 0x1e2   : > { %v1262_v28 = vpop.f32.mrf.mxu2  ;;  %v1086_v18 = vpop.f32.mrf.mxu0 }
 0x1e3   : > { %v1263_v14 = vadd.f32 %v1262_v28, %v1174_v11  ;;  %v1317_v15 = vadd.f32 %v1283_v47, %v506_v13  ;;  %v1175_v20 = vpop.f32.mrf.mxu1 }
 0x1e4   : > { %v1176_v22 = vadd.f32 %v1175_v20, %v1086_v18 }
 0x1e5   : > { %v1309_v16 = vadd.f32 %v1263_v14, %v498_v17  ;;  %1349 = vst [vmem:[#allocation2 + $0x20] sm:$0xff] %v1317_v15 }
 0x1e7   : > { %1341 = vst [vmem:[#allocation2 + $0x70] sm:$0xff] %v1309_v16 }
 0x1e8   : > { %v1284_v26 = vpop.f32.mrf.mxu3 }
 0x1e9   : > { %v1285_v38 = vadd.f32 %v1284_v26, %v1196_v21 }
 0x1ea   : > { %v1264_v30 = vpop.f32.mrf.mxu2 }
 0x1eb   : > { %v1265_v56 = vadd.f32 %v1264_v30, %v1176_v22  ;;  %v1318_v24 = vadd.f32 %v1285_v38, %v507_v23  ;;  %1354 = sbr.rel (%p2102_p0) target bundleno = 577 (0x241), region = 66 }
 0x1ed   : > { %v1310_v27 = vadd.f32 %v1265_v56, %v499_v25  ;;  %1350 = vst [vmem:[#allocation2 + $0x98] sm:$0xff] %v1318_v24 }
 0x1ef   : > { %1342 = vst [vmem:[#allocation2 + $0xc0] sm:$0xff] %v1310_v27 }
 0x1f0   : > { %v1355_v29 = vld [vmem:[#allocation2 + $0xb0] sm:$0xff]  ;;  %v1356_v31 = vld [vmem:[#allocation2] sm:$0xff]  ;;  %v1357_v48 = vld [vmem:[#allocation2 + $0xd8] sm:$0xff] }
 0x1f1   : > { %v2878_v39 = vld [vmem:[%s3069_s2] ss:$0 sm:$0xff]  ;;  %v1358_v32 = vld [vmem:[#allocation2 + $0x18] sm:$0xff]  ;;  %v1359_v33 = vld [vmem:[#allocation2 + $0x50] sm:$0xff] }
 0x1f2   : > { %v1360_v34 = vld [vmem:[#allocation2 + $0x68] sm:$0xff]  ;;  %v1361_v35 = vld [vmem:[#allocation2 + $0x30] sm:$0xff]  ;;  %v1391_v37 = vadd.f32 %v2878_v39, %v1355_v29  ;;  %v1392_v40 = vadd.f32 %v2878_v39, %v1356_v31  ;;  %v1393_v41 = vadd.f32 %v2878_v39, %v1357_v48  ;;  %v1394_v36 = vadd.f32 %v2878_v39, %v1358_v32  ;;  %v1363_v54 = vld [vmem:[#allocation2 + $0x80] sm:$0xff] }
 0x1f3   : > { %v1362_v1 = vld [vmem:[#allocation2 + $0x48] sm:$0xff]  ;;  %v1395_v42 = vadd.f32 %v2878_v39, %v1359_v33  ;;  %v1396_v43 = vadd.f32 %v2878_v39, %v1360_v34  ;;  %v1397_v44 = vadd.f32 %v2878_v39, %v1361_v35  ;;  %v1366_v61 = vld [vmem:[#allocation2 + $0xb8] sm:$0xff]  ;;  %v1367_v62 = vld [vmem:[#allocation2 + $0x60] sm:$0xff]  ;;  %v1399_v4 = vadd.f32 %v2878_v39, %v1363_v54 }
 0x1f4   : > { %v2180_v45 = vpack.c.bf16 %v1392_v40, %v1391_v37  ;;  %v1487_v46 = vadd.f32 %v1392_v40, %v1391_v37  ;;  %v1524_v49 = vmul.f32 %v1391_v37, %v1391_v37  ;;  %v1525_v50 = vmul.f32 %v1392_v40, %v1392_v40  ;;  %v1364_v55 = vld [vmem:[#allocation2 + $0x88] sm:$0xff]  ;;  %v1368_v63 = vld [vmem:[#allocation2 + $0xf0] sm:$0xff]  ;;  %v1370_v47 = vld [vmem:[#allocation2 + $0x78] sm:$0xff] }
 0x1f5   : > { %v2185_v51 = vpack.c.bf16 %v1394_v36, %v1393_v41  ;;  %v1526_v53 = vmul.f32 %v1393_v41, %v1393_v41  ;;  %v2190_v52 = vpack.c.bf16 %v1396_v43, %v1395_v42  ;;  %v1398_v10 = vadd.f32 %v2878_v39, %v1362_v1  ;;  %v1365_v57 = vld [vmem:[#allocation2 + $0xe8] sm:$0xff]  ;;  %v1371_v14 = vld [vmem:[#allocation2 + $0x38] sm:$0xff]  ;;  %v1373_v23 = vld [vmem:[#allocation2 + $0x40] sm:$0xff] }
 0x1f6   : > { %2181 = vst [vmem:[%s2650_s13] sm:$0xff] %v2180_v45   ;;  %v1556_v58 = vadd.f32 %v1525_v50, %v1524_v49  ;;  %v1488_v59 = vadd.f32 %v1487_v46, %v1393_v41  ;;  %v1527_v60 = vmul.f32 %v1394_v36, %v1394_v36  ;;  %v1528_v2 = vmul.f32 %v1395_v42, %v1395_v42  ;;  %v1369_v12 = vld [vmem:[#allocation2 + $0x8] sm:$0xff]  ;;  %v1372_v15 = vld [vmem:[#allocation2 + $0x58] sm:$0xff]  ;;  %v1375_v34 = vld [vmem:[#allocation2 + $0xe0] sm:$0xff] }
 0x1f7   : > { %2257 = vst [vmem:[%s2650_s13 + $0x8] sm:$0xff] %v2185_v51   ;;  %v2195_v3 = vpack.c.bf16 %v1398_v10, %v1397_v44  ;;  %v1400_v5 = vadd.f32 %v2878_v39, %v1364_v55  ;;  %v2895_v6 = vadd.f32 %v2878_v39, %v1365_v57  ;;  %v2898_v7 = vadd.f32 %v2878_v39, %v1366_v61  ;;  %v1374_v26 = vld [vmem:[#allocation2 + $0xc8] sm:$0xff]  ;;  %v1376_v35 = vld [vmem:[#allocation2 + $0x90] sm:$0xff]  ;;  %v1378_v1 = vld [vmem:[#allocation2 + $0xc0] sm:$0xff] }
 0x1f8   : > { %v1489_v0 = vadd.f32 %v1488_v59, %v1394_v36  ;;  %v1557_v19 = vadd.f32 %v1556_v58, %v1526_v53  ;;  %2258 = vst [vmem:[%s2650_s13 + $0x10] sm:$0xff] %v2190_v52   ;;  %v2901_v9 = vadd.f32 %v2878_v39, %v1367_v62  ;;  %v2904_v11 = vadd.f32 %v2878_v39, %v1368_v63  ;;  %v1377_v36 = vld [vmem:[#allocation2 + $0x70] sm:$0xff]  ;;  %v1382_v63 = vld [vmem:[#allocation2 + $0x28] sm:$0xff] }
 0x1f9   : > { %2259 = vst [vmem:[%s2650_s13 + $0x18] sm:$0xff] %v2195_v3   ;;  %v1529_v17 = vmul.f32 %v1396_v43, %v1396_v43  ;;  %v2200_v28 = vpack.c.bf16 %v1400_v5, %v1399_v4  ;;  %v2205_v16 = vpack.c.bf16 %v2898_v7, %v2895_v6  ;;  %v1530_v22 = vmul.f32 %v1397_v44, %v1397_v44  ;;  %v1380_v45 = vld [vmem:[#allocation2 + $0xd0] sm:$0xff] }
 0x1fa   : > { %v1558_v13 = vadd.f32 %v1557_v19, %v1527_v60  ;;  %v1490_v8 = vadd.f32 %v1489_v0, %v1395_v42  ;;  %v2210_v18 = vpack.c.bf16 %v2904_v11, %v2901_v9  ;;  %v2913_v25 = vadd.f32 %v2878_v39, %v1369_v12  ;;  %v1379_v42 = vld [vmem:[#allocation2 + $0xa8] sm:$0xff]  ;;  %v1381_v60 = vld [vmem:[#allocation2 + $0x10] sm:$0xff] }
 0x1fb   : > { %2260 = vst [vmem:[%s2650_s13 + $0x20] sm:$0xff] %v2200_v28   ;;  %v2916_v30 = vadd.f32 %v2878_v39, %v1370_v47  ;;  %v2919_v38 = vadd.f32 %v2878_v39, %v1371_v14  ;;  %v2922_v56 = vadd.f32 %v2878_v39, %v1372_v15  ;;  %v1531_v29 = vmul.f32 %v1398_v10, %v1398_v10  ;;  %v1384_v28 = vld [vmem:[#allocation2 + $0xf8] sm:$0xff] }
 0x1fc   : > { %v1491_v20 = vadd.f32 %v1490_v8, %v1396_v43  ;;  %v1559_v21 = vadd.f32 %v1558_v13, %v1528_v2  ;;  %2261 = vst [vmem:[%s2650_s13 + $0x28] sm:$0xff] %v2205_v16   ;;  %v2930_v32 = vadd.f32 %v2878_v39, %v1373_v23  ;;  %v2933_v33 = vadd.f32 %v2878_v39, %v1374_v26  ;;  %v1385_v16 = vld [vmem:[#allocation2 + $0x20] sm:$0xff]  ;;  %v1386_v23 = vld [vmem:[#allocation2 + $0x98] sm:$0xff] }
 0x1fd   : > { %2262 = vst [vmem:[%s2650_s13 + $0x30] sm:$0xff] %v2210_v18   ;;  %v2215_v31 = vpack.c.bf16 %v2916_v30, %v2913_v25  ;;  %v2220_v48 = vpack.c.bf16 %v2922_v56, %v2919_v38  ;;  %v1532_v41 = vmul.f32 %v1399_v4, %v1399_v4  ;;  %v1533_v43 = vmul.f32 %v1400_v5, %v1400_v5 }
 0x1fe   : > { %v1560_v24 = vadd.f32 %v1559_v21, %v1529_v17  ;;  %v1492_v27 = vadd.f32 %v1491_v20, %v1397_v44  ;;  %v2225_v44 = vpack.c.bf16 %v2933_v33, %v2930_v32  ;;  %v2940_v50 = vadd.f32 %v2878_v39, %v1375_v34 }
 0x1ff   : > { %2263 = vst [vmem:[%s2650_s13 + $0x38] sm:$0xff] %v2215_v31   ;;  %v2943_v51 = vadd.f32 %v2878_v39, %v1376_v35  ;;  %v2947_v53 = vadd.f32 %v2878_v39, %v1377_v36  ;;  %v2950_v52 = vadd.f32 %v2878_v39, %v1378_v1  ;;  %v2956_v54 = vadd.f32 %v2878_v39, %v1380_v45 }
 0x200   : > { %v1493_v37 = vadd.f32 %v1492_v27, %v1398_v10  ;;  %v1561_v40 = vadd.f32 %v1560_v24, %v1530_v22  ;;  %2264 = vst [vmem:[%s2650_s13 + $0x40] sm:$0xff] %v2220_v48   ;;  %v2953_v10 = vadd.f32 %v2878_v39, %v1379_v42  ;;  %v1534_v58 = vmul.f32 %v2895_v6, %v2895_v6 }
 0x201   : > { %2265 = vst [vmem:[%s2650_s13 + $0x48] sm:$0xff] %v2225_v44   ;;  %v2230_v59 = vpack.c.bf16 %v2943_v51, %v2940_v50  ;;  %v2235_v61 = vpack.c.bf16 %v2950_v52, %v2947_v53  ;;  %v1535_v0 = vmul.f32 %v2898_v7, %v2898_v7  ;;  %v2972_v19 = vadd.f32 %v2878_v39, %v1381_v60 }
 0x202   : > { %v1562_v46 = vadd.f32 %v1561_v40, %v1531_v29  ;;  %v1494_v49 = vadd.f32 %v1493_v37, %v1399_v4  ;;  %v2240_v62 = vpack.c.bf16 %v2956_v54, %v2953_v10  ;;  %v2975_v4 = vadd.f32 %v2878_v39, %v1382_v63 }
 0x203   : > { %2266 = vst [vmem:[%s2650_s13 + $0x50] sm:$0xff] %v2230_v59   ;;  %v1536_v8 = vmul.f32 %v2901_v9, %v2901_v9  ;;  %v1538_v21 = vmul.f32 %v2913_v25, %v2913_v25  ;;  %v1421_v26 = vadd.f32 %v2878_v39, %v1385_v16  ;;  %v1422_v24 = vadd.f32 %v2878_v39, %v1386_v23 }
 0x204   : > { %v1495_v55 = vadd.f32 %v1494_v49, %v1400_v5  ;;  %v1563_v57 = vadd.f32 %v1562_v46, %v1532_v41  ;;  %2267 = vst [vmem:[%s2650_s13 + $0x58] sm:$0xff] %v2235_v61   ;;  %v1383_v5 = vld [vmem:[#allocation2 + $0xa0] sm:$0xff]  ;;  %v2245_v17 = vpack.c.bf16 %v2975_v4, %v2972_v19  ;;  %v1539_v29 = vmul.f32 %v2916_v30, %v2916_v30 }
 0x205   : > { %2268 = vst [vmem:[%s2650_s13 + $0x60] sm:$0xff] %v2240_v62   ;;  %v1419_v15 = vadd.f32 %v2878_v39, %v1383_v5  ;;  %v2255_v31 = vpack.c.bf16 %v1422_v24, %v1421_v26  ;;  %v1540_v34 = vmul.f32 %v2919_v38, %v2919_v38  ;;  %v1542_v41 = vmul.f32 %v2930_v32, %v2930_v32 }
 0x206   : > { %v1564_v2 = vadd.f32 %v1563_v57, %v1533_v43  ;;  %v1496_v3 = vadd.f32 %v1495_v55, %v2895_v6  ;;  %v1537_v6 = vmul.f32 %v2904_v11, %v2904_v11  ;;  %2269 = vst [vmem:[%s2650_s13 + $0x68] sm:$0xff] %v2245_v17   ;;  %v1543_v1 = vmul.f32 %v2933_v33, %v2933_v33 }
 0x207   : > { %2271 = vst [vmem:[%s2650_s13 + $0x78] sm:$0xff] %v2255_v31  }
 0x208   : > { %v1497_v12 = vadd.f32 %v1496_v3, %v2898_v7  ;;  %v1565_v13 = vadd.f32 %v1564_v2, %v1534_v58  ;;  %v1420_v7 = vadd.f32 %v2878_v39, %v1384_v28  ;;  %v1541_v39 = vmul.f32 %v2922_v56, %v2922_v56 }
 0x20a   : > { %v1566_v47 = vadd.f32 %v1565_v13, %v1535_v0  ;;  %v1498_v14 = vadd.f32 %v1497_v12, %v2901_v9  ;;  %v2250_v22 = vpack.c.bf16 %v1420_v7, %v1419_v15  ;;  %v1552_v12 = vmul.f32 %v1419_v15, %v1419_v15 }
 0x20c   : > { %v1499_v18 = vadd.f32 %v1498_v14, %v2904_v11  ;;  %v1567_v20 = vadd.f32 %v1566_v47, %v1536_v8  ;;  %2270 = vst [vmem:[%s2650_s13 + $0x70] sm:$0xff] %v2250_v22   ;;  %v1553_v8 = vmul.f32 %v1420_v7, %v1420_v7  ;;  %v1555_v47 = vmul.f32 %v1422_v24, %v1422_v24 }
 0x20e   : > { %v1568_v9 = vadd.f32 %v1567_v20, %v1537_v6  ;;  %v1500_v27 = vadd.f32 %v1499_v18, %v2913_v25 }
 0x210   : > { %v1501_v11 = vadd.f32 %v1500_v27, %v2916_v30  ;;  %v1569_v48 = vadd.f32 %v1568_v9, %v1538_v21 }
 0x212   : > { %v1570_v35 = vadd.f32 %v1569_v48, %v1539_v29  ;;  %v1502_v37 = vadd.f32 %v1501_v11, %v2919_v38  ;;  %v1544_v38 = vmul.f32 %v2940_v50, %v2940_v50 }
 0x214   : > { %v1503_v25 = vadd.f32 %v1502_v37, %v2922_v56  ;;  %v1571_v40 = vadd.f32 %v1570_v35, %v1540_v34  ;;  %v1545_v56 = vmul.f32 %v2943_v51, %v2943_v51 }
 0x216   : > { %v1572_v36 = vadd.f32 %v1571_v40, %v1541_v39  ;;  %v1504_v30 = vadd.f32 %v1503_v25, %v2930_v32  ;;  %v1546_v32 = vmul.f32 %v2947_v53, %v2947_v53 }
 0x218   : > { %v1505_v42 = vadd.f32 %v1504_v30, %v2933_v33  ;;  %v1573_v43 = vadd.f32 %v1572_v36, %v1542_v41  ;;  %v1547_v33 = vmul.f32 %v2950_v52, %v2950_v52 }
 0x21a   : > { %v1574_v44 = vadd.f32 %v1573_v43, %v1543_v1  ;;  %v1506_v45 = vadd.f32 %v1505_v42, %v2940_v50  ;;  %v1548_v50 = vmul.f32 %v2953_v10, %v2953_v10 }
 0x21c   : > { %v1507_v46 = vadd.f32 %v1506_v45, %v2943_v51  ;;  %v1575_v49 = vadd.f32 %v1574_v44, %v1544_v38  ;;  %v1549_v51 = vmul.f32 %v2956_v54, %v2956_v54 }
 0x21e   : > { %v1576_v55 = vadd.f32 %v1575_v49, %v1545_v56  ;;  %v1508_v57 = vadd.f32 %v1507_v46, %v2947_v53  ;;  %v1550_v53 = vmul.f32 %v2972_v19, %v2972_v19 }
 0x220   : > { %v1509_v58 = vadd.f32 %v1508_v57, %v2950_v52  ;;  %v1577_v59 = vadd.f32 %v1576_v55, %v1546_v32  ;;  %v1551_v52 = vmul.f32 %v2975_v4, %v2975_v4 }
 0x222   : > { %v1578_v60 = vadd.f32 %v1577_v59, %v1547_v33  ;;  %v1510_v61 = vadd.f32 %v1509_v58, %v2953_v10 }
 0x224   : > { %v1511_v62 = vadd.f32 %v1510_v61, %v2956_v54  ;;  %v1579_v63 = vadd.f32 %v1578_v60, %v1548_v50  ;;  %v1554_v54 = vmul.f32 %v1421_v26, %v1421_v26 }
 0x226   : > { %v1580_v2 = vadd.f32 %v1579_v63, %v1549_v51  ;;  %v1512_v3 = vadd.f32 %v1511_v62, %v2972_v19 }
 0x228   : > { %v1513_v0 = vadd.f32 %v1512_v3, %v2975_v4  ;;  %v1581_v5 = vadd.f32 %v1580_v2, %v1550_v53 }
 0x22a   : > { %v1582_v10 = vadd.f32 %v1581_v5, %v1551_v52  ;;  %v1514_v13 = vadd.f32 %v1513_v0, %v1419_v15 }
 0x22c   : > { %v1515_v6 = vadd.f32 %v1514_v13, %v1420_v7  ;;  %v1583_v17 = vadd.f32 %v1582_v10, %v1552_v12 }
 0x22e   : > { %v1516_v28 = vadd.f32 %v1515_v6, %v1421_v26  ;;  %v1584_v14 = vadd.f32 %v1583_v17, %v1553_v8 }
 0x230   : > { %v1517_v16 = vadd.f32 %v1516_v28, %v1422_v24  ;;  %v1585_v19 = vadd.f32 %v1584_v14, %v1554_v54 }
 0x232   : > { %v1518_v18 = vrot.slane %v1517_v16, 4  ;;  %v1586_v20 = vadd.f32 %v1585_v19, %v1555_v47 }
 0x234   : > { %v1519_v21 = vadd.f32 %v1518_v18, %v1517_v16  ;;  %v1587_v22 = vrot.slane %v1586_v20, 4 }
 0x236   : > { %v1520_v4 = vrot.slane %v1519_v21, 2  ;;  %v1588_v23 = vadd.f32 %v1587_v22, %v1586_v20 }
 0x238   : > { %v1521_v9 = vadd.f32 %v1520_v4, %v1519_v21  ;;  %v1589_v27 = vrot.slane %v1588_v23, 2 }
 0x23a   : > { %v1522_v15 = vrot.slane %v1521_v9, 1  ;;  %v1590_v29 = vadd.f32 %v1589_v27, %v1588_v23 }
 0x23c   : > { %v1523_v7 = vadd.f32 %v1522_v15, %v1521_v9  ;;  %v1591_v31 = vrot.slane %v1590_v29, 1 }
 0x23e   : > { %1593 = vst [vmem:[%s436_s15] sm:$0x1] %v1523_v7  ;;  %v1592_v26 = vadd.f32 %v1591_v31, %v1590_v29 }
 0x240   : > { %1594 = vst [vmem:[%s439_s27] sm:$0x1] %v1592_v26 }
 0x241 PF: > { %s16_s24 = sadd.s32 1, %s2411_s24   ;;  %s3073_s18 = smov %s2391_s19 }
 0x242   : > { %p13_p1 = scmp.ge.s32.totalorder %s16_s24, 8   ;;  %s3074_s19 = smov %s2495_s6 }
 0x243   : > { %s3075_s20 = smov %s2403_s22  ;;  %s3076_s21 = smov %s2407_s23 }
 0x244   : > { %s3077_s22 = smov %s3080_s25  ;;  %s3078_s23 = smov %s3084_s26 }
 0x245   :  { %15 = sbr.rel (!%p13_p1) target bundleno = 4 (0x4), region = 134 }

// kernel: yolo_forward.16
= control target key start
LH: loop header
LB: loop body
LE: loop exit
PB: predicated region body
PF: predicated region fallthrough
CT: control target
= control target key end

     0   :  { %s365_s0 = inlined_call_operand.vmem [shape: bf16[16,2,8,256], index: 0, kind: input, shape index: {}]   ;;  %s366_s1 = inlined_call_operand.vmem [shape: bf16[16,8,128], index: 1, kind: output, shape index: {}]  }
   0x1   :  { %v8_v0 = vld [vmem:[%s365_s0] sm:$0xff]  ;;  %v9_v1 = vld [vmem:[%s365_s0 + $0x8] sm:$0xff]  ;;  %v10_v2 = vld [vmem:[%s365_s0 + $0x10] sm:$0xff] }
   0x2   :  { %v11_v3 = vld [vmem:[%s365_s0 + $0x18] sm:$0xff]  ;;  %v40_v4 = vunpack.c.l.bf16 %v8_v0  ;;  %v41_v5 = vunpack.c.h.bf16 %v8_v0  ;;  %v42_v6 = vunpack.c.l.bf16 %v9_v1  ;;  %v43_v7 = vunpack.c.h.bf16 %v9_v1  ;;  %v12_v8 = vld [vmem:[%s365_s0 + $0x20] sm:$0xff]  ;;  %v13_v9 = vld [vmem:[%s365_s0 + $0x28] sm:$0xff] }
   0x3   :  { %v44_v10 = vunpack.c.l.bf16 %v10_v2  ;;  %v45_v11 = vunpack.c.h.bf16 %v10_v2  ;;  %v46_v12 = vunpack.c.l.bf16 %v11_v3  ;;  %v47_v13 = vunpack.c.h.bf16 %v11_v3  ;;  %v14_v14 = vld [vmem:[%s365_s0 + $0x30] sm:$0xff]  ;;  %v15_v15 = vld [vmem:[%s365_s0 + $0x38] sm:$0xff]  ;;  %v16_v24 = vld [vmem:[%s365_s0 + $0x40] sm:$0xff] }
   0x4   :  { %v104_v16 = vmax.f32 %v40_v4, %v42_v6  ;;  %v105_v17 = vmax.f32 %v41_v5, %v43_v7  ;;  %v48_v18 = vunpack.c.l.bf16 %v12_v8  ;;  %v49_v19 = vunpack.c.h.bf16 %v12_v8  ;;  %v17_v25 = vld [vmem:[%s365_s0 + $0x48] sm:$0xff]  ;;  %v18_v34 = vld [vmem:[%s365_s0 + $0x50] sm:$0xff]  ;;  %v19_v35 = vld [vmem:[%s365_s0 + $0x58] sm:$0xff] }
   0x5   :  { %v106_v20 = vmax.f32 %v44_v10, %v46_v12  ;;  %v107_v21 = vmax.f32 %v45_v11, %v47_v13  ;;  %v50_v22 = vunpack.c.l.bf16 %v13_v9  ;;  %v51_v23 = vunpack.c.h.bf16 %v13_v9  ;;  %v20_v40 = vld [vmem:[%s365_s0 + $0x60] sm:$0xff]  ;;  %v21_v45 = vld [vmem:[%s365_s0 + $0x68] sm:$0xff]  ;;  %v22_v50 = vld [vmem:[%s365_s0 + $0x70] sm:$0xff] }
   0x6   :  { %v136_v26 = vmax.f32 %v104_v16, %v105_v17  ;;  %v52_v27 = vunpack.c.l.bf16 %v14_v14  ;;  %v53_v28 = vunpack.c.h.bf16 %v14_v14  ;;  %v54_v29 = vunpack.c.l.bf16 %v15_v15  ;;  %v23_v54 = vld [vmem:[%s365_s0 + $0x78] sm:$0xff]  ;;  %v24_v60 = vld [vmem:[%s365_s0 + $0x80] sm:$0xff]  ;;  %v25_v1 = vld [vmem:[%s365_s0 + $0x88] sm:$0xff] }
   0x7   :  { %v137_v30 = vmax.f32 %v106_v20, %v107_v21  ;;  %v55_v31 = vunpack.c.h.bf16 %v15_v15  ;;  %v108_v32 = vmax.f32 %v48_v18, %v50_v22  ;;  %v109_v33 = vmax.f32 %v49_v19, %v51_v23  ;;  %v26_v6 = vld [vmem:[%s365_s0 + $0x90] sm:$0xff]  ;;  %v27_v9 = vld [vmem:[%s365_s0 + $0x98] sm:$0xff]  ;;  %v28_v16 = vld [vmem:[%s365_s0 + $0xa0] sm:$0xff] }
   0x8   :  { %v110_v36 = vmax.f32 %v52_v27, %v54_v29  ;;  %v56_v37 = vunpack.c.l.bf16 %v16_v24  ;;  %v57_v38 = vunpack.c.h.bf16 %v16_v24  ;;  %v58_v39 = vunpack.c.l.bf16 %v17_v25  ;;  %v29_v17 = vld [vmem:[%s365_s0 + $0xa8] sm:$0xff]  ;;  %v31_v27 = vld [vmem:[%s365_s0 + $0xb8] sm:$0xff] }
   0x9   :  { %v191_v41 = vpack.c.bf16 %v137_v30, %v136_v26  ;;  %v111_v42 = vmax.f32 %v53_v28, %v55_v31  ;;  %v138_v43 = vmax.f32 %v108_v32, %v109_v33  ;;  %v59_v44 = vunpack.c.h.bf16 %v17_v25  ;;  %v30_v26 = vld [vmem:[%s365_s0 + $0xb0] sm:$0xff] }
   0xa   :  { %v60_v46 = vunpack.c.l.bf16 %v18_v34  ;;  %v61_v47 = vunpack.c.h.bf16 %v18_v34  ;;  %v62_v48 = vunpack.c.l.bf16 %v19_v35  ;;  %v63_v49 = vunpack.c.h.bf16 %v19_v35 }
   0xb   :  { %192 = vst [vmem:[%s366_s1] sm:$0xff] %v191_v41   ;;  %v139_v51 = vmax.f32 %v110_v36, %v111_v42  ;;  %v112_v52 = vmax.f32 %v56_v37, %v58_v39  ;;  %v113_v53 = vmax.f32 %v57_v38, %v59_v44  ;;  %v64_v55 = vunpack.c.l.bf16 %v20_v40  ;;  %v32_v36 = vld [vmem:[%s365_s0 + $0xc0] sm:$0xff]  ;;  %v33_v37 = vld [vmem:[%s365_s0 + $0xc8] sm:$0xff] }
   0xc   :  { %v114_v56 = vmax.f32 %v60_v46, %v62_v48  ;;  %v115_v57 = vmax.f32 %v61_v47, %v63_v49  ;;  %v65_v58 = vunpack.c.h.bf16 %v20_v40  ;;  %v66_v59 = vunpack.c.l.bf16 %v21_v45  ;;  %v34_v46 = vld [vmem:[%s365_s0 + $0xd0] sm:$0xff]  ;;  %v35_v47 = vld [vmem:[%s365_s0 + $0xd8] sm:$0xff] }
   0xd   :  { %v196_v61 = vpack.c.bf16 %v139_v51, %v138_v43  ;;  %v140_v62 = vmax.f32 %v112_v52, %v113_v53  ;;  %v67_v63 = vunpack.c.h.bf16 %v21_v45  ;;  %v68_v0 = vunpack.c.l.bf16 %v22_v50  ;;  %v36_v52 = vld [vmem:[%s365_s0 + $0xe0] sm:$0xff] }
   0xe   :  { %v141_v2 = vmax.f32 %v114_v56, %v115_v57  ;;  %v69_v3 = vunpack.c.h.bf16 %v22_v50  ;;  %v70_v4 = vunpack.c.l.bf16 %v23_v54  ;;  %v71_v5 = vunpack.c.h.bf16 %v23_v54  ;;  %v37_v57 = vld [vmem:[%s365_s0 + $0xe8] sm:$0xff] }
   0xf   :  { %228 = vst [vmem:[%s366_s1 + $0x8] sm:$0xff] %v196_v61   ;;  %v116_v7 = vmax.f32 %v64_v55, %v66_v59  ;;  %v117_v8 = vmax.f32 %v65_v58, %v67_v63  ;;  %v72_v10 = vunpack.c.l.bf16 %v24_v60  ;;  %v73_v11 = vunpack.c.h.bf16 %v24_v60 }
  0x10   :  { %v201_v12 = vpack.c.bf16 %v141_v2, %v140_v62  ;;  %v118_v13 = vmax.f32 %v68_v0, %v70_v4  ;;  %v119_v14 = vmax.f32 %v69_v3, %v71_v5  ;;  %v74_v15 = vunpack.c.l.bf16 %v25_v1  ;;  %v38_v62 = vld [vmem:[%s365_s0 + $0xf0] sm:$0xff]  ;;  %v39_v2 = vld [vmem:[%s365_s0 + $0xf8] sm:$0xff] }
  0x11   :  { %v142_v18 = vmax.f32 %v116_v7, %v117_v8  ;;  %v75_v19 = vunpack.c.h.bf16 %v25_v1  ;;  %v76_v20 = vunpack.c.l.bf16 %v26_v6  ;;  %v77_v21 = vunpack.c.h.bf16 %v26_v6 }
  0x12   :  { %229 = vst [vmem:[%s366_s1 + $0x10] sm:$0xff] %v201_v12   ;;  %v143_v22 = vmax.f32 %v118_v13, %v119_v14  ;;  %v78_v23 = vunpack.c.l.bf16 %v27_v9  ;;  %v79_v24 = vunpack.c.h.bf16 %v27_v9  ;;  %v120_v25 = vmax.f32 %v72_v10, %v74_v15 }
  0x13   :  { %v121_v28 = vmax.f32 %v73_v11, %v75_v19  ;;  %v80_v29 = vunpack.c.l.bf16 %v28_v16  ;;  %v81_v30 = vunpack.c.h.bf16 %v28_v16  ;;  %v82_v31 = vunpack.c.l.bf16 %v29_v17 }
  0x14   :  { %v206_v32 = vpack.c.bf16 %v143_v22, %v142_v18  ;;  %v122_v33 = vmax.f32 %v76_v20, %v78_v23  ;;  %v123_v34 = vmax.f32 %v77_v21, %v79_v24  ;;  %v83_v35 = vunpack.c.h.bf16 %v29_v17 }
  0x15   :  { %v144_v38 = vmax.f32 %v120_v25, %v121_v28  ;;  %v84_v39 = vunpack.c.l.bf16 %v30_v26  ;;  %v85_v40 = vunpack.c.h.bf16 %v30_v26  ;;  %v86_v41 = vunpack.c.l.bf16 %v31_v27 }
  0x16   :  { %230 = vst [vmem:[%s366_s1 + $0x18] sm:$0xff] %v206_v32   ;;  %v145_v42 = vmax.f32 %v122_v33, %v123_v34  ;;  %v87_v43 = vunpack.c.h.bf16 %v31_v27  ;;  %v124_v44 = vmax.f32 %v80_v29, %v82_v31  ;;  %v125_v45 = vmax.f32 %v81_v30, %v83_v35 }
  0x17   :  { %v126_v48 = vmax.f32 %v84_v39, %v86_v41  ;;  %v88_v49 = vunpack.c.l.bf16 %v32_v36  ;;  %v89_v50 = vunpack.c.h.bf16 %v32_v36  ;;  %v90_v51 = vunpack.c.l.bf16 %v33_v37 }
  0x18   :  { %v211_v53 = vpack.c.bf16 %v145_v42, %v144_v38  ;;  %v127_v54 = vmax.f32 %v85_v40, %v87_v43  ;;  %v146_v55 = vmax.f32 %v124_v44, %v125_v45  ;;  %v91_v56 = vunpack.c.h.bf16 %v33_v37 }
  0x19   :  { %v92_v58 = vunpack.c.l.bf16 %v34_v46  ;;  %v93_v59 = vunpack.c.h.bf16 %v34_v46  ;;  %v94_v60 = vunpack.c.l.bf16 %v35_v47  ;;  %v95_v61 = vunpack.c.h.bf16 %v35_v47 }
  0x1a   :  { %231 = vst [vmem:[%s366_s1 + $0x20] sm:$0xff] %v211_v53   ;;  %v147_v63 = vmax.f32 %v126_v48, %v127_v54  ;;  %v128_v0 = vmax.f32 %v88_v49, %v90_v51  ;;  %v129_v1 = vmax.f32 %v89_v50, %v91_v56  ;;  %v96_v3 = vunpack.c.l.bf16 %v36_v52 }
  0x1b   :  { %v130_v4 = vmax.f32 %v92_v58, %v94_v60  ;;  %v131_v5 = vmax.f32 %v93_v59, %v95_v61  ;;  %v97_v6 = vunpack.c.h.bf16 %v36_v52  ;;  %v98_v7 = vunpack.c.l.bf16 %v37_v57 }
  0x1c   :  { %v216_v8 = vpack.c.bf16 %v147_v63, %v146_v55  ;;  %v148_v9 = vmax.f32 %v128_v0, %v129_v1  ;;  %v99_v10 = vunpack.c.h.bf16 %v37_v57  ;;  %v100_v11 = vunpack.c.l.bf16 %v38_v62 }
  0x1d   :  { %v149_v12 = vmax.f32 %v130_v4, %v131_v5  ;;  %v101_v13 = vunpack.c.h.bf16 %v38_v62  ;;  %v102_v14 = vunpack.c.l.bf16 %v39_v2  ;;  %v103_v15 = vunpack.c.h.bf16 %v39_v2 }
  0x1e   :  { %232 = vst [vmem:[%s366_s1 + $0x28] sm:$0xff] %v216_v8   ;;  %v132_v16 = vmax.f32 %v96_v3, %v98_v7  ;;  %v133_v17 = vmax.f32 %v97_v6, %v99_v10 }
  0x1f   :  { %v221_v18 = vpack.c.bf16 %v149_v12, %v148_v9  ;;  %v134_v19 = vmax.f32 %v100_v11, %v102_v14  ;;  %v135_v20 = vmax.f32 %v101_v13, %v103_v15 }
  0x20   :  { %v150_v21 = vmax.f32 %v132_v16, %v133_v17 }
  0x21   :  { %233 = vst [vmem:[%s366_s1 + $0x30] sm:$0xff] %v221_v18   ;;  %v151_v22 = vmax.f32 %v134_v19, %v135_v20 }
  0x23   :  { %v226_v23 = vpack.c.bf16 %v151_v22, %v150_v21 }
  0x25   :  { %234 = vst [vmem:[%s366_s1 + $0x38] sm:$0xff] %v226_v23  }

// kernel: yolo_forward.18
= control target key start
LH: loop header
LB: loop body
LE: loop exit
PB: predicated region body
PF: predicated region fallthrough
CT: control target
= control target key end

     0   :  { %s486_s1 = inlined_call_operand.vmem [shape: f32[1,1,128], index: 1, kind: input, shape index: {}]   ;;  %s487_s2 = inlined_call_operand.vmem [shape: f32[1,1,128], index: 2, kind: input, shape index: {}]   ;;  %s488_s3 = inlined_call_operand.vmem [shape: f32[1,128], index: 3, kind: input, shape index: {}]   ;;  %s489_s4 = inlined_call_operand.vmem [shape: f32[1,128], index: 4, kind: input, shape index: {}]   ;;  %s490_s0 = inlined_call_operand.vmem [shape: bf16[128,128], index: 0, kind: input, shape index: {}]   ;;  %s491_s5 = inlined_call_operand.vmem [shape: bf16[128,128], index: 5, kind: output, shape index: {}]  }
   0x1   :  { %v20_v0 = vld [vmem:[%s486_s1] sm:$0x1]  ;;  %v306_v11 = vld [vmem:[%s490_s0 + $0x8] sm:$0xff]   ;;  %v307_v16 = vld [vmem:[%s490_s0 + $0x10] sm:$0xff]  }
   0x2   :  { %v22_v1 = vld [vmem:[%s487_s2] sm:$0x1]  ;;  %v24_v2 = vmul.f32 0.0078125, %v20_v0  ;;  %v308_v17 = vld [vmem:[%s490_s0 + $0x18] sm:$0xff]   ;;  %v240_v18 = vunpack.c.l.bf16 %v306_v11  ;;  %v241_v21 = vunpack.c.h.bf16 %v306_v11  ;;  %v310_v22 = vld [vmem:[%s490_s0 + $0x28] sm:$0xff]   ;;  %v244_v24 = vunpack.c.l.bf16 %v307_v16 }
   0x3   :  { %v25_v3 = vmul.f32 0.0078125, %v22_v1  ;;  %v235_v9 = vld [vmem:[%s490_s0] sm:$0xff]   ;;  %v311_v23 = vld [vmem:[%s490_s0 + $0x30] sm:$0xff]   ;;  %v245_v25 = vunpack.c.h.bf16 %v307_v16  ;;  %v248_v26 = vunpack.c.l.bf16 %v308_v17  ;;  %v249_v27 = vunpack.c.h.bf16 %v308_v17  ;;  %v312_v28 = vld [vmem:[%s490_s0 + $0x38] sm:$0xff]  }
   0x4   :  { %v26_v4 = vmul.f32 %v24_v2, %v24_v2  ;;  %v236_v12 = vunpack.c.l.bf16 %v235_v9  ;;  %v237_v13 = vunpack.c.h.bf16 %v235_v9  ;;  %v62_v14 = vperm.slane %v24_v2, 0  ;;  %v309_v19 = vld [vmem:[%s490_s0 + $0x20] sm:$0xff]  }
   0x5   :  { %v252_v32 = vunpack.c.l.bf16 %v309_v19  ;;  %v253_v34 = vunpack.c.h.bf16 %v309_v19  ;;  %v256_v35 = vunpack.c.l.bf16 %v310_v22  ;;  %v257_v36 = vunpack.c.h.bf16 %v310_v22  ;;  %v395_v51 = vld [vmem:[%s488_s3] ss:$0 sm:$0xff] }
   0x6   :  { %v27_v5 = vsub.f32 %v25_v3, %v26_v4  ;;  %v64_v29 = vsub.f32 %v236_v12, %v62_v14  ;;  %v65_v30 = vsub.f32 %v237_v13, %v62_v14  ;;  %v260_v37 = vunpack.c.l.bf16 %v311_v23  ;;  %v410_v61 = vld [vmem:[%s489_s4] ss:$0 sm:$0xff] }
   0x7   :  { %v261_v39 = vunpack.c.h.bf16 %v311_v23  ;;  %v264_v40 = vunpack.c.l.bf16 %v312_v28  ;;  %v265_v41 = vunpack.c.h.bf16 %v312_v28  ;;  %v66_v42 = vsub.f32 %v240_v18, %v62_v14 }
   0x8   :  { %v28_v6 = vmax.f32 %v27_v5, 0.0  ;;  %v67_v43 = vsub.f32 %v241_v21, %v62_v14  ;;  %v68_v44 = vsub.f32 %v244_v24, %v62_v14  ;;  %v69_v45 = vsub.f32 %v245_v25, %v62_v14 }
   0x9   :  { %v70_v47 = vsub.f32 %v248_v26, %v62_v14  ;;  %v71_v48 = vsub.f32 %v249_v27, %v62_v14  ;;  %v72_v49 = vsub.f32 %v252_v32, %v62_v14  ;;  %v73_v52 = vsub.f32 %v253_v34, %v62_v14 }
   0xa   :  { %v80_v7 = vadd.f32 1e-05, %v28_v6  ;;  %v74_v53 = vsub.f32 %v256_v35, %v62_v14  ;;  %v75_v54 = vsub.f32 %v257_v36, %v62_v14  ;;  %v397_v55 = vsub.f32 %v260_v37, %v62_v14 }
   0xb   :  { %v399_v56 = vsub.f32 %v261_v39, %v62_v14  ;;  %v401_v57 = vsub.f32 %v264_v40, %v62_v14  ;;  %v403_v58 = vsub.f32 %v265_v41, %v62_v14 }
   0xc   :  { %322 = vrsqrt.f32 %v80_v7  ;;  %vm87_vm0 = vweird.f32 %v80_v7 }
  0x12   :  { %v323_v8 = vpop.eup %322 }
  0x13   :  { %v82_v10 = vmul.f32 %v323_v8, %v80_v7  ;;  %vm88_vm1 = vweird.f32 %v323_v8 }
  0x14   :  { %vm384_vm2 = vmor %vm87_vm0, %vm88_vm1 }
  0x15   :  { %v83_v15 = vmul.f32 %v323_v8, %v82_v10 }
  0x17   :  { %v84_v20 = vmul.f32 0.5, %v83_v15 }
  0x19   :  { %v85_v31 = vsub.f32 1.5, %v84_v20 }
  0x1b   :  { %v86_v38 = vmul.f32 %v323_v8, %v85_v31 }
  0x1d   :  { %v90_v46 = vsel %vm384_vm2, %v323_v8, %v86_v38 }
  0x1e   :  { %v390_v50 = vperm.slane %v90_v46, 0 }
  0x20   :  { %v94_v59 = vmul.f32 %v390_v50, %v64_v29  ;;  %v95_v60 = vmul.f32 %v390_v50, %v65_v30  ;;  %v96_v62 = vmul.f32 %v390_v50, %v66_v42  ;;  %v97_v63 = vmul.f32 %v390_v50, %v67_v43 }
  0x21   :  { %v98_v0 = vmul.f32 %v390_v50, %v68_v44  ;;  %v99_v1 = vmul.f32 %v390_v50, %v69_v45  ;;  %v100_v2 = vmul.f32 %v390_v50, %v70_v47  ;;  %v101_v3 = vmul.f32 %v390_v50, %v71_v48 }
  0x22   :  { %v114_v4 = vmul.f32 %v395_v51, %v94_v59  ;;  %v115_v5 = vmul.f32 %v395_v51, %v95_v60  ;;  %v116_v6 = vmul.f32 %v395_v51, %v96_v62  ;;  %v117_v7 = vmul.f32 %v395_v51, %v97_v63 }
  0x23   :  { %v118_v8 = vmul.f32 %v395_v51, %v98_v0  ;;  %v119_v9 = vmul.f32 %v395_v51, %v99_v1  ;;  %v120_v10 = vmul.f32 %v395_v51, %v100_v2  ;;  %v121_v11 = vmul.f32 %v395_v51, %v101_v3 }
  0x24   :  { %v134_v12 = vadd.f32 %v410_v61, %v114_v4  ;;  %v135_v13 = vadd.f32 %v410_v61, %v115_v5  ;;  %v136_v14 = vadd.f32 %v410_v61, %v116_v6  ;;  %v137_v15 = vadd.f32 %v410_v61, %v117_v7 }
  0x25   :  { %v138_v16 = vadd.f32 %v410_v61, %v118_v8  ;;  %v139_v17 = vadd.f32 %v410_v61, %v119_v9  ;;  %v140_v18 = vadd.f32 %v410_v61, %v120_v10  ;;  %v141_v19 = vadd.f32 %v410_v61, %v121_v11 }
  0x26   :  { %vm150_vm3 = vcmp.gt.f32.partialorder %v134_v12, 0.0  ;;  %vm151_vm4 = vcmp.gt.f32.partialorder %v135_v13, 0.0  ;;  %v166_v20 = vmul.f32 0.1, %v134_v12  ;;  %v167_v21 = vmul.f32 0.1, %v135_v13 }
  0x27   :  { %vm152_vm5 = vcmp.gt.f32.partialorder %v136_v14, 0.0  ;;  %vm153_vm6 = vcmp.gt.f32.partialorder %v137_v15, 0.0  ;;  %v168_v22 = vmul.f32 0.1, %v136_v14  ;;  %v169_v23 = vmul.f32 0.1, %v137_v15 }
  0x28   :  { %v182_v24 = vsel %vm150_vm3, %v134_v12, %v166_v20  ;;  %v183_v25 = vsel %vm151_vm4, %v135_v13, %v167_v21  ;;  %vm154_vm7 = vcmp.gt.f32.partialorder %v138_v16, 0.0  ;;  %vm155_vm8 = vcmp.gt.f32.partialorder %v139_v17, 0.0 }
  0x29   :  { %v269_v26 = vpack.c.bf16 %v183_v25, %v182_v24  ;;  %v184_v27 = vsel %vm152_vm5, %v136_v14, %v168_v22  ;;  %v185_v28 = vsel %vm153_vm6, %v137_v15, %v169_v23  ;;  %v170_v29 = vmul.f32 0.1, %v138_v16 }
  0x2a   :  { %v274_v30 = vpack.c.bf16 %v185_v28, %v184_v27  ;;  %v171_v31 = vmul.f32 0.1, %v139_v17  ;;  %vm156_vm9 = vcmp.gt.f32.partialorder %v140_v18, 0.0  ;;  %vm157_vm10 = vcmp.gt.f32.partialorder %v141_v19, 0.0 }
  0x2b   :  { %270 = vst [vmem:[%s491_s5] sm:$0xff] %v269_v26   ;;  %v186_v32 = vsel %vm154_vm7, %v138_v16, %v170_v29  ;;  %v172_v33 = vmul.f32 0.1, %v140_v18  ;;  %v173_v34 = vmul.f32 0.1, %v141_v19  ;;  %v102_v35 = vmul.f32 %v390_v50, %v72_v49 }
  0x2c   :  { %313 = vst [vmem:[%s491_s5 + $0x8] sm:$0xff] %v274_v30   ;;  %v187_v36 = vsel %vm155_vm8, %v139_v17, %v171_v31  ;;  %v103_v37 = vmul.f32 %v390_v50, %v73_v52  ;;  %v104_v38 = vmul.f32 %v390_v50, %v74_v53  ;;  %v105_v39 = vmul.f32 %v390_v50, %v75_v54 }
  0x2d   :  { %v279_v40 = vpack.c.bf16 %v187_v36, %v186_v32  ;;  %v188_v41 = vsel %vm156_vm9, %v140_v18, %v172_v33  ;;  %v189_v42 = vsel %vm157_vm10, %v141_v19, %v173_v34  ;;  %v122_v43 = vmul.f32 %v395_v51, %v102_v35 }
  0x2e   :  { %v284_v44 = vpack.c.bf16 %v189_v42, %v188_v41  ;;  %v123_v45 = vmul.f32 %v395_v51, %v103_v37  ;;  %v124_v46 = vmul.f32 %v395_v51, %v104_v38  ;;  %v125_v47 = vmul.f32 %v395_v51, %v105_v39 }
  0x2f   :  { %314 = vst [vmem:[%s491_s5 + $0x10] sm:$0xff] %v279_v40   ;;  %v142_v48 = vadd.f32 %v410_v61, %v122_v43  ;;  %v106_v49 = vmul.f32 %v390_v50, %v397_v55  ;;  %v107_v52 = vmul.f32 %v390_v50, %v399_v56  ;;  %v108_v53 = vmul.f32 %v390_v50, %v401_v57 }
  0x30   :  { %315 = vst [vmem:[%s491_s5 + $0x18] sm:$0xff] %v284_v44   ;;  %v143_v54 = vadd.f32 %v410_v61, %v123_v45  ;;  %v144_v59 = vadd.f32 %v410_v61, %v124_v46  ;;  %v145_v60 = vadd.f32 %v410_v61, %v125_v47  ;;  %v109_v62 = vmul.f32 %v390_v50, %v403_v58 }
  0x31   :  { %vm158_vm11 = vcmp.gt.f32.partialorder %v142_v48, 0.0  ;;  %v174_v55 = vmul.f32 0.1, %v142_v48  ;;  %v126_v56 = vmul.f32 %v395_v51, %v106_v49  ;;  %v127_v63 = vmul.f32 %v395_v51, %v107_v52 }
  0x32   :  { %vm159_vm12 = vcmp.gt.f32.partialorder %v143_v54, 0.0  ;;  %v175_v57 = vmul.f32 0.1, %v143_v54  ;;  %vm160_vm13 = vcmp.gt.f32.partialorder %v144_v59, 0.0  ;;  %vm161_vm14 = vcmp.gt.f32.partialorder %v145_v60, 0.0 }
  0x33   :  { %v190_v0 = vsel %vm158_vm11, %v142_v48, %v174_v55  ;;  %v176_v1 = vmul.f32 0.1, %v144_v59  ;;  %v177_v2 = vmul.f32 0.1, %v145_v60  ;;  %v146_v3 = vadd.f32 %v410_v61, %v126_v56 }
  0x34   :  { %v191_v4 = vsel %vm159_vm12, %v143_v54, %v175_v57  ;;  %v147_v5 = vadd.f32 %v410_v61, %v127_v63  ;;  %v128_v50 = vmul.f32 %v395_v51, %v108_v53  ;;  %v129_v58 = vmul.f32 %v395_v51, %v109_v62 }
  0x35   :  { %v289_v6 = vpack.c.bf16 %v191_v4, %v190_v0  ;;  %v192_v7 = vsel %vm160_vm13, %v144_v59, %v176_v1  ;;  %v193_v8 = vsel %vm161_vm14, %v145_v60, %v177_v2  ;;  %vm162_vm15 = vcmp.gt.f32.partialorder %v146_v3, 0.0 }
  0x36   :  { %v294_v9 = vpack.c.bf16 %v193_v8, %v192_v7  ;;  %vm163_vm0 = vcmp.gt.f32.partialorder %v147_v5, 0.0  ;;  %v178_v10 = vmul.f32 0.1, %v146_v3  ;;  %v179_v11 = vmul.f32 0.1, %v147_v5 }
  0x37   :  { %316 = vst [vmem:[%s491_s5 + $0x20] sm:$0xff] %v289_v6   ;;  %v148_v12 = vadd.f32 %v410_v61, %v128_v50  ;;  %v149_v13 = vadd.f32 %v410_v61, %v129_v58 }
  0x38   :  { %317 = vst [vmem:[%s491_s5 + $0x28] sm:$0xff] %v294_v9   ;;  %v194_v51 = vsel %vm162_vm15, %v146_v3, %v178_v10  ;;  %v195_v14 = vsel %vm163_vm0, %v147_v5, %v179_v11 }
  0x39   :  { %v299_v15 = vpack.c.bf16 %v195_v14, %v194_v51  ;;  %vm164_vm1 = vcmp.gt.f32.partialorder %v148_v12, 0.0  ;;  %vm165_vm2 = vcmp.gt.f32.partialorder %v149_v13, 0.0  ;;  %v180_v16 = vmul.f32 0.1, %v148_v12 }
  0x3a   :  { %v181_v17 = vmul.f32 0.1, %v149_v13 }
  0x3b   :  { %318 = vst [vmem:[%s491_s5 + $0x30] sm:$0xff] %v299_v15   ;;  %v196_v18 = vsel %vm164_vm1, %v148_v12, %v180_v16 }
  0x3c   :  { %v197_v19 = vsel %vm165_vm2, %v149_v13, %v181_v17 }
  0x3d   :  { %v304_v20 = vpack.c.bf16 %v197_v19, %v196_v18 }
  0x3f   :  { %319 = vst [vmem:[%s491_s5 + $0x38] sm:$0xff] %v304_v20  }

// kernel: yolo_forward.17
= control target key start
LH: loop header
LB: loop body
LE: loop exit
PB: predicated region body
PF: predicated region fallthrough
CT: control target
= control target key end

     0   :  { %s1679_s18 = smov 0   ;;  %s1681_s19 = smov 0   ;;  %s1975_s0 = inlined_call_operand.vmem [shape: bf16[128,1152], index: 0, kind: input, shape index: {}]   ;;  %s1976_s1 = inlined_call_operand.vmem [shape: bf16[1152,128], index: 1, kind: input, shape index: {}]   ;;  %s1977_s2 = inlined_call_operand.vmem [shape: f32[1,128], index: 2, kind: input, shape index: {}]   ;;  %s1978_s3 = inlined_call_operand.vmem [shape: bf16[128,128], index: 3, kind: output, shape index: {0}]   ;;  %s1979_s4 = inlined_call_operand.vmem [shape: f32[1,1,128], index: 4, kind: output, shape index: {1}]   ;;  %s1980_s5 = inlined_call_operand.vmem [shape: f32[1,1,128], index: 5, kind: output, shape index: {2}]  }
   0x1   :  { %s1683_s20 = smov 0   ;;  %s1685_s21 = smov 0  }
   0x2   :  { %s1687_s22 = smov 0  }
   0x3 LB: > { %s25_s23 = sadd.s32 1, %s1642_s21  ;;  %p44_p1 = scmp.ne.s32.totalorder %s1634_s19, %s1630_s18  ;;  %s1646_s22 = sphi %s1687_s22, %s16_s22   ;;  %s1642_s21 = sphi %s1685_s21, %s1984_s21   ;;  %s1638_s20 = sphi %s1683_s20, %s1983_s20   ;;  %s1634_s19 = sphi %s1681_s19, %s1982_s19   ;;  %s1630_s18 = sphi %s1679_s18, %s1981_s18  }
   0x4   : > { %p26_p0 = scmp.ge.s32.totalorder %s25_s23, 3  ;;  %p45_p2 = scmp.eq.s32.totalorder %s1646_s22, 0 }
   0x5   : > { %s37_s25 = sadd.s32 1, %s1634_s19  ;;  %p1208_p5 = scmp.ge.s32.totalorder %s1646_s22, 3 }
   0x6   : > { %s1986_s23 = smov (%p26_p0, %s25_s23), 0  ;;  %p46_p3 = por %p45_p2, %p44_p1 }
   0x7   : > { %s33_s24 = ssub.s32 %s1642_s21, %s1986_s23  ;;  %198 = sbr.rel (%p1208_p5) target bundleno = 49 (0x31), region = 20 }
   0x8   : > { %p35_p4 = scmp.eq.s32.totalorder %s33_s24, 0 }
   0xa   : > { %s1714_s26 = scalar_select %p35_p4, %s1634_s19, %s37_s25  }
   0xc   : > { %201 = sbr.rel (!%p46_p3) target bundleno = 49 (0x31), region = 24  ;;  %s203_s27 = sand.u32 (%p46_p3), 1, %s1634_s19  }
   0xd   : > { %s1444_s28 = smul.u32 (%p46_p3), 12, %s1642_s21 }
   0xe   : > { %s1564_s29 = smul.u32 (%p46_p3), 192, %s203_s27 }
   0xf   : > { %s1722_s7 = scalar_lea.vmem (%p46_p3), %s1975_s0, %s1444_s28 }
  0x10   : > { %v226_v0 = vld [vmem:[%s1722_s7] sm:$0xff] (%p46_p3)  ;;  %v230_v2 = vld [vmem:[%s1722_s7 + $0x48] sm:$0xff] (%p46_p3)  ;;  %s1727_s8 = scalar_lea.vmem (%p46_p3), [#allocation3], %s1564_s29  ;;  %v234_v4 = vld [vmem:[%s1722_s7 + $0x90] sm:$0xff] (%p46_p3) }
  0x11   : > { %v228_v1 = vld [vmem:[%s1722_s7 + $0x24] sm:$0xff]  ;;  %227 = vst [vmem:[%s1727_s8] sm:$0xff] %v226_v0  ;;  %v232_v3 = vld [vmem:[%s1722_s7 + $0x6c] sm:$0xff]  ;;  %v236_v5 = vld [vmem:[%s1722_s7 + $0xb4] sm:$0xff] }
  0x12   : > { %229 = vst [vmem:[%s1727_s8 + $0xc] sm:$0xff] %v228_v1  ;;  %v238_v6 = vld [vmem:[%s1722_s7 + $0xd8] sm:$0xff]  ;;  %v242_v8 = vld [vmem:[%s1722_s7 + $0x120] sm:$0xff]  ;;  %v246_v10 = vld [vmem:[%s1722_s7 + $0x168] sm:$0xff] }
  0x13   : > { %231 = vst [vmem:[%s1727_s8 + $0x18] sm:$0xff] %v230_v2  ;;  %v240_v7 = vld [vmem:[%s1722_s7 + $0xfc] sm:$0xff]  ;;  %v244_v9 = vld [vmem:[%s1722_s7 + $0x144] sm:$0xff]  ;;  %v248_v11 = vld [vmem:[%s1722_s7 + $0x18c] sm:$0xff] }
  0x14   : > { %233 = vst [vmem:[%s1727_s8 + $0x24] sm:$0xff] %v232_v3  ;;  %v250_v12 = vld [vmem:[%s1722_s7 + $0x1b0] sm:$0xff]  ;;  %v254_v14 = vld [vmem:[%s1722_s7 + $0x1f8] sm:$0xff]  ;;  %v1210_v16 = vld [vmem:[%s1722_s7 + $0x8] sm:$0xf] }
  0x15   : > { %235 = vst [vmem:[%s1727_s8 + $0x30] sm:$0xff] %v234_v4  ;;  %v252_v13 = vld [vmem:[%s1722_s7 + $0x1d4] sm:$0xff]  ;;  %v256_v15 = vld [vmem:[%s1722_s7 + $0x21c] sm:$0xff]  ;;  %v1212_v17 = vld [vmem:[%s1722_s7 + $0x2c] sm:$0xf] }
  0x16   : > { %237 = vst [vmem:[%s1727_s8 + $0x3c] sm:$0xff] %v236_v5  ;;  %v1214_v18 = vld [vmem:[%s1722_s7 + $0x50] sm:$0xf]  ;;  %v1216_v19 = vld [vmem:[%s1722_s7 + $0x74] sm:$0xf] }
  0x17   : > { %239 = vst [vmem:[%s1727_s8 + $0x48] sm:$0xff] %v238_v6  ;;  %v1218_v20 = vld [vmem:[%s1722_s7 + $0x98] sm:$0xf]  ;;  %v1220_v21 = vld [vmem:[%s1722_s7 + $0xbc] sm:$0xf] }
  0x18   : > { %241 = vst [vmem:[%s1727_s8 + $0x54] sm:$0xff] %v240_v7  ;;  %v1222_v22 = vld [vmem:[%s1722_s7 + $0xe0] sm:$0xf]  ;;  %v1224_v23 = vld [vmem:[%s1722_s7 + $0x104] sm:$0xf] }
  0x19   : > { %243 = vst [vmem:[%s1727_s8 + $0x60] sm:$0xff] %v242_v8  ;;  %v1226_v24 = vld [vmem:[%s1722_s7 + $0x128] sm:$0xf]  ;;  %v1228_v25 = vld [vmem:[%s1722_s7 + $0x14c] sm:$0xf] }
  0x1a   : > { %245 = vst [vmem:[%s1727_s8 + $0x6c] sm:$0xff] %v244_v9  ;;  %v1230_v26 = vld [vmem:[%s1722_s7 + $0x170] sm:$0xf]  ;;  %v1232_v27 = vld [vmem:[%s1722_s7 + $0x194] sm:$0xf] }
  0x1b   : > { %247 = vst [vmem:[%s1727_s8 + $0x78] sm:$0xff] %v246_v10  ;;  %v1234_v28 = vld [vmem:[%s1722_s7 + $0x1b8] sm:$0xf]  ;;  %v1236_v29 = vld [vmem:[%s1722_s7 + $0x1dc] sm:$0xf] }
  0x1c   : > { %249 = vst [vmem:[%s1727_s8 + $0x84] sm:$0xff] %v248_v11  ;;  %v1238_v30 = vld [vmem:[%s1722_s7 + $0x200] sm:$0xf]  ;;  %v1240_v31 = vld [vmem:[%s1722_s7 + $0x224] sm:$0xf] }
  0x1d   : > { %251 = vst [vmem:[%s1727_s8 + $0x90] sm:$0xff] %v250_v12 }
  0x1e   : > { %253 = vst [vmem:[%s1727_s8 + $0x9c] sm:$0xff] %v252_v13 }
  0x1f   : > { %255 = vst [vmem:[%s1727_s8 + $0xa8] sm:$0xff] %v254_v14 }
  0x20   : > { %257 = vst [vmem:[%s1727_s8 + $0xb4] sm:$0xff] %v256_v15 }
  0x21   : > { %1211 = vst [vmem:[%s1727_s8 + $0x8] sm:$0xf] %v1210_v16 }
  0x22   : > { %1213 = vst [vmem:[%s1727_s8 + $0x14] sm:$0xf] %v1212_v17 }
  0x23   : > { %1215 = vst [vmem:[%s1727_s8 + $0x20] sm:$0xf] %v1214_v18 }
  0x24   : > { %1217 = vst [vmem:[%s1727_s8 + $0x2c] sm:$0xf] %v1216_v19 }
  0x25   : > { %1219 = vst [vmem:[%s1727_s8 + $0x38] sm:$0xf] %v1218_v20 }
  0x26   : > { %1221 = vst [vmem:[%s1727_s8 + $0x44] sm:$0xf] %v1220_v21 }
  0x27   : > { %1223 = vst [vmem:[%s1727_s8 + $0x50] sm:$0xf] %v1222_v22 }
  0x28   : > { %1225 = vst [vmem:[%s1727_s8 + $0x5c] sm:$0xf] %v1224_v23 }
  0x29   : > { %1227 = vst [vmem:[%s1727_s8 + $0x68] sm:$0xf] %v1226_v24 }
  0x2a   : > { %1229 = vst [vmem:[%s1727_s8 + $0x74] sm:$0xf] %v1228_v25 }
  0x2b   : > { %1231 = vst [vmem:[%s1727_s8 + $0x80] sm:$0xf] %v1230_v26 }
  0x2c   : > { %1233 = vst [vmem:[%s1727_s8 + $0x8c] sm:$0xf] %v1232_v27 }
  0x2d   : > { %1235 = vst [vmem:[%s1727_s8 + $0x98] sm:$0xf] %v1234_v28 }
  0x2e   : > { %1237 = vst [vmem:[%s1727_s8 + $0xa4] sm:$0xf] %v1236_v29 }
  0x2f   : > { %1239 = vst [vmem:[%s1727_s8 + $0xb0] sm:$0xf] %v1238_v30 }
  0x30   : > { %1241 = vst [vmem:[%s1727_s8 + $0xbc] sm:$0xf] %v1240_v31 }
  0x31 PF: > { %p1242_p6 = scmp.ge.s32.totalorder %s1646_s22, 1  ;;  %p311_p7 = scmp.lt.s32.totalorder %s1646_s22, 4 }
  0x33   : > { %p312_p8 = pnand %p1242_p6, %p311_p7 }
  0x34   : > { %s318_s9 = sand.u32 (!%p312_p8), 1, %s1630_s18   ;;  %s358_s10 = smul.u32 (!%p312_p8), 48, %s1638_s20 }
  0x35   : > { %315 = sbr.rel (%p312_p8) target bundleno = 389 (0x185), region = 54  ;;  %p1244_p10 = scmp.ne.s32.totalorder (!%p312_p8), %s1638_s20, 0 }
  0x36   : > { %s1565_s11 = smul.u32 (!%p312_p8), 192, %s318_s9  ;;  %p359_p9 = scmp.lt.s32.totalorder (!%p312_p8), %s358_s10, 143 }
  0x38   : > { %s1799_s16 = scalar_lea.vmem (!%p312_p8), [#allocation3], %s1565_s11 }
  0x3a   : > { %s1988_s10 = smov (!%p359_p9, %s358_s10), 143  ;;  %379 = sbr.rel (%p1244_p10) target bundleno = 80 (0x50), region = 62 }
  0x3b   : > { %s1243_s12 = sshll.u32 %s1988_s10, 2 }
  0x3c   : > { %s1797_s15 = scalar_lea.vmem %s1976_s1, %s1243_s12 }
  0x3f   : > { %v1648_v32 = vmov 0.0  }
  0x40   : > { %380 = vst [vmem:[#allocation2 + $0x30] sm:$0xff] %v1648_v32 }
  0x41   : > { %381 = vst [vmem:[#allocation2] sm:$0xff] %v1648_v32 }
  0x42   : > { %382 = vst [vmem:[#allocation2 + $0x58] sm:$0xff] %v1648_v32 }
  0x43   : > { %383 = vst [vmem:[#allocation2 + $0x18] sm:$0xff] %v1648_v32 }
  0x44   : > { %384 = vst [vmem:[#allocation2 + $0x50] sm:$0xff] %v1648_v32 }
  0x45   : > { %385 = vst [vmem:[#allocation2 + $0x68] sm:$0xff] %v1648_v32 }
  0x46   : > { %386 = vst [vmem:[#allocation2 + $0x8] sm:$0xff] %v1648_v32 }
  0x47   : > { %387 = vst [vmem:[#allocation2 + $0x48] sm:$0xff] %v1648_v32 }
  0x48   : > { %388 = vst [vmem:[#allocation2 + $0x40] sm:$0xff] %v1648_v32 }
  0x49   : > { %389 = vst [vmem:[#allocation2 + $0x20] sm:$0xff] %v1648_v32 }
  0x4a   : > { %390 = vst [vmem:[#allocation2 + $0x10] sm:$0xff] %v1648_v32 }
  0x4b   : > { %391 = vst [vmem:[#allocation2 + $0x38] sm:$0xff] %v1648_v32 }
  0x4c   : > { %392 = vst [vmem:[#allocation2 + $0x60] sm:$0xff] %v1648_v32 }
  0x4d   : > { %393 = vst [vmem:[#allocation2 + $0x70] sm:$0xff] %v1648_v32 }
  0x4e   : > { %394 = vst [vmem:[#allocation2 + $0x78] sm:$0xff] %v1648_v32 }
  0x4f   : > { %395 = vst [vmem:[#allocation2 + $0x28] sm:$0xff] %v1648_v32 }
  0x50 PF: > { %v1476_v33 = vld [vmem:[%s1797_s15 + $0x38] sm:$0xff]  ;;  %v1475_v36 = vld [vmem:[%s1797_s15 + $0x30] sm:$0xff]  ;;  %v1474_v39 = vld [vmem:[%s1797_s15 + $0x28] sm:$0xff]  ;;  %p1437_p11 = scmp.ne.s32.totalorder %s1638_s20, 2 }
  0x51   : > { %v1804_v34 = vld [vmem:[%s1797_s15 + $0x78] sm:$0xff]  ;;  %764 = vmatpush.bf16.msra.mxu0 %v1476_v33  ;;  %1540 = vmatpush.bf16.msra.mxu3 %v1476_v33  ;;  %v1813_v37 = vld [vmem:[%s1797_s15 + $0x70] sm:$0xff]  ;;  %v1482_v40 = vld [vmem:[%s1797_s15 + $0x68] sm:$0xff] }
  0x52   : > { %v1807_v35 = vld [vmem:[%s1797_s15 + $0xb8] sm:$0xff]  ;;  %813 = vmatpush.bf16.msra.mxu1 %v1804_v34  ;;  %v1816_v38 = vld [vmem:[%s1797_s15 + $0xb0] sm:$0xff]  ;;  %v1823_v41 = vld [vmem:[%s1797_s15 + $0xa8] sm:$0xff] }
  0x53   : > { %862 = vmatpush.bf16.msra.mxu2 %v1807_v35  ;;  %v1473_v42 = vld [vmem:[%s1797_s15 + $0x20] sm:$0xff]  ;;  %v1472_v45 = vld [vmem:[%s1797_s15 + $0x18] sm:$0xff]  ;;  %v1471_v48 = vld [vmem:[%s1797_s15 + $0x10] sm:$0xff] }
  0x54   : > { %v1481_v43 = vld [vmem:[%s1797_s15 + $0x60] sm:$0xff]  ;;  %v1480_v46 = vld [vmem:[%s1797_s15 + $0x58] sm:$0xff]  ;;  %v1479_v49 = vld [vmem:[%s1797_s15 + $0x50] sm:$0xff] }
  0x55   : > { %765 = vmatpush.bf16.msra.mxu0 %v1475_v36  ;;  %1541 = vmatpush.bf16.msra.mxu3 %v1475_v36  ;;  %v1829_v44 = vld [vmem:[%s1797_s15 + $0xa0] sm:$0xff]  ;;  %v1835_v47 = vld [vmem:[%s1797_s15 + $0x98] sm:$0xff]  ;;  %v1841_v50 = vld [vmem:[%s1797_s15 + $0x90] sm:$0xff] }
  0x56   : > { %814 = vmatpush.bf16.msra.mxu1 %v1813_v37  ;;  %v1470_v51 = vld [vmem:[%s1797_s15 + $0x8] sm:$0xff]  ;;  %v1469_v54 = vld [vmem:[%s1797_s15] sm:$0xff]  ;;  %v1319_v59 = vld [vmem:[%s1799_s16 + $0x90] sm:$0xf] }
  0x57   : > { %863 = vmatpush.bf16.msra.mxu2 %v1816_v38  ;;  %v1478_v52 = vld [vmem:[%s1797_s15 + $0x48] sm:$0xff]  ;;  %v1477_v55 = vld [vmem:[%s1797_s15 + $0x40] sm:$0xff]  ;;  %v1464_v60 = vld [vmem:[%s1799_s16 + $0x98] sm:$0xf0] }
  0x58   : > { %v1847_v53 = vld [vmem:[%s1797_s15 + $0x88] sm:$0xff]  ;;  %v1852_v56 = vld [vmem:[%s1797_s15 + $0x80] sm:$0xff]  ;;  %v1249_v62 = vld [vmem:[%s1799_s16 + $0xc] sm:$0xf0]  ;;  %v1320_v2 = vor.u32 %v1464_v60, %v1319_v59 }
  0x59   : > { %766 = vmatpush.bf16.msra.mxu0 %v1474_v39  ;;  %1542 = vmatpush.bf16.msra.mxu3 %v1474_v39  ;;  %v1247_v57 = vld [vmem:[%s1799_s16] sm:$0xf]  ;;  %v1446_v58 = vld [vmem:[%s1799_s16 + $0x8] sm:$0xf0]  ;;  %v1445_v61 = vld [vmem:[%s1799_s16 + $0x4] sm:$0xf] }
  0x5a   : > { %815 = vmatpush.bf16.msra.mxu1 %v1482_v40  ;;  %v1255_v63 = vld [vmem:[%s1799_s16 + $0x8] sm:$0xf]  ;;  %v1447_v0 = vld [vmem:[%s1799_s16 + $0x10] sm:$0xf0]  ;;  %v1248_v1 = vor.u32 %v1446_v58, %v1247_v57  ;;  %v1252_v3 = vor.u32 %v1445_v61, %v1249_v62  ;;  %v1259_v5 = vld [vmem:[%s1799_s16 + $0x18] sm:$0xf] }
  0x5b   : > { %864 = vmatpush.bf16.msra.mxu2 %v1823_v41  ;;  %v1256_v4 = vor.u32 %v1447_v0, %v1255_v63  ;;  %v1449_v6 = vld [vmem:[%s1799_s16 + $0x20] sm:$0xf0]  ;;  %v1331_v7 = vld [vmem:[%s1799_s16 + $0xa8] sm:$0xf]  ;;  %v1467_v8 = vld [vmem:[%s1799_s16 + $0xb0] sm:$0xf0] }
  0x5c   : > { %v1448_v9 = vld [vmem:[%s1799_s16 + $0x1c] sm:$0xf]  ;;  %v1261_v10 = vld [vmem:[%s1799_s16 + $0x24] sm:$0xf0]  ;;  %v1267_v11 = vld [vmem:[%s1799_s16 + $0x20] sm:$0xf]  ;;  %v1260_v13 = vor.u32 %v1449_v6, %v1259_v5  ;;  %v1332_v14 = vor.u32 %v1467_v8, %v1331_v7 }
  0x5d   : > { %767 = vmatpush.bf16.msra.mxu0 %v1473_v42  ;;  %1543 = vmatpush.bf16.msra.mxu3 %v1473_v42  ;;  %v1450_v12 = vld [vmem:[%s1799_s16 + $0x28] sm:$0xf0]  ;;  %v1264_v15 = vor.u32 %v1448_v9, %v1261_v10  ;;  %v1271_v17 = vld [vmem:[%s1799_s16 + $0x30] sm:$0xf]  ;;  %v1452_v18 = vld [vmem:[%s1799_s16 + $0x38] sm:$0xf0] }
  0x5e   : > { %816 = vmatpush.bf16.msra.mxu1 %v1481_v43  ;;  %v1268_v16 = vor.u32 %v1450_v12, %v1267_v11  ;;  %v1451_v19 = vld [vmem:[%s1799_s16 + $0x34] sm:$0xf]  ;;  %v1321_v21 = vld [vmem:[%s1799_s16 + $0x9c] sm:$0xf0]  ;;  %v1279_v23 = vld [vmem:[%s1799_s16 + $0x38] sm:$0xf]  ;;  %v1272_v25 = vor.u32 %v1452_v18, %v1271_v17 }
  0x5f   : > { %865 = vmatpush.bf16.msra.mxu2 %v1829_v44  ;;  %v1463_v20 = vld [vmem:[%s1799_s16 + $0x94] sm:$0xf]  ;;  %v1273_v22 = vld [vmem:[%s1799_s16 + $0x3c] sm:$0xf0]  ;;  %v1453_v24 = vld [vmem:[%s1799_s16 + $0x40] sm:$0xf0] }
  0x60   : > { %v1324_v26 = vor.u32 %v1463_v20, %v1321_v21  ;;  %v1276_v27 = vor.u32 %v1451_v19, %v1273_v22  ;;  %v1280_v28 = vor.u32 %v1453_v24, %v1279_v23  ;;  %v1283_v29 = vld [vmem:[%s1799_s16 + $0x48] sm:$0xf]  ;;  %v1455_v30 = vld [vmem:[%s1799_s16 + $0x50] sm:$0xf0]  ;;  %v1454_v31 = vld [vmem:[%s1799_s16 + $0x4c] sm:$0xf] }
  0x61   : > { %768 = vmatpush.bf16.msra.mxu0 %v1472_v45  ;;  %1544 = vmatpush.bf16.msra.mxu3 %v1472_v45  ;;  %v1466_v32 = vld [vmem:[%s1799_s16 + $0xac] sm:$0xf]  ;;  %v1333_v33 = vld [vmem:[%s1799_s16 + $0xb4] sm:$0xf0]  ;;  %v1456_v36 = vld [vmem:[%s1799_s16 + $0x58] sm:$0xf0] }
  0x62   : > { %817 = vmatpush.bf16.msra.mxu1 %v1480_v46  ;;  %v1336_v39 = vor.u32 %v1466_v32, %v1333_v33  ;;  %v1458_v42 = vld [vmem:[%s1799_s16 + $0x68] sm:$0xf0]  ;;  %v1465_v45 = vld [vmem:[%s1799_s16 + $0xa0] sm:$0xf0]  ;;  %v1339_v57 = vld [vmem:[%s1799_s16 + $0xb0] sm:$0xf] }
  0x63   : > { %866 = vmatpush.bf16.msra.mxu2 %v1835_v47  ;;  %v1309_v58 = vld [vmem:[%s1799_s16 + $0x84] sm:$0xf0]  ;;  %v1315_v59 = vld [vmem:[%s1799_s16 + $0x80] sm:$0xf]  ;;  %v1462_v60 = vld [vmem:[%s1799_s16 + $0x88] sm:$0xf0] }
  0x64   : > { %v1316_v0 = vor.u32 %v1462_v60, %v1315_v59  ;;  %v396_v5 = vld [vmem:[#allocation2 + $0x30] sm:$0xff]  ;;  %v398_v21 = vld [vmem:[#allocation2 + $0x58] sm:$0xff] }
  0x65   : > { %769 = vmatpush.bf16.msra.mxu0 %v1471_v48  ;;  %1545 = vmatpush.bf16.msra.mxu3 %v1471_v48  ;;  %v1459_v48 = vld [vmem:[%s1799_s16 + $0x70] sm:$0xf0] }
  0x66   : > { %818 = vmatpush.bf16.msra.mxu1 %v1479_v49 }
  0x67   : > { %867 = vmatpush.bf16.msra.mxu2 %v1841_v50 }
  0x69   : > { %770 = vmatpush.bf16.msra.mxu0 %v1470_v51  ;;  %1546 = vmatpush.bf16.msra.mxu3 %v1470_v51 }
  0x6a   : > { %819 = vmatpush.bf16.msra.mxu1 %v1478_v52 }
  0x6b   : > { %868 = vmatpush.bf16.msra.mxu2 %v1847_v53 }
  0x6d   : > { %771 = vmatpush.bf16.msra.mxu0 %v1469_v54  ;;  %1547 = vmatpush.bf16.msra.mxu3 %v1469_v54  ;;  %v1461_v54 = vld [vmem:[%s1799_s16 + $0x80] sm:$0xf0] }
  0x6e   : > { %820 = vmatpush.bf16.msra.mxu1 %v1477_v55 }
  0x6f   : > { %869 = vmatpush.bf16.msra.mxu2 %v1852_v56 }
  0x70   : > { %772 = vmatmul.bf16.vlgmr.msra.gmra.mxu0 %v1248_v1  ;;  %802 = vmatmul.bf16.vlgmr.msra.gmra.mxu3 %v1320_v2 }
  0x71   : > { %1548 = vmatpush.bf16.msrb.mxu3 %v1804_v34  ;;  %821 = vmatmul.bf16.vlgmr.msra.gmra.mxu1 %v1252_v3  ;;  %v1285_v34 = vld [vmem:[%s1799_s16 + $0x54] sm:$0xf0] }
  0x72   : > { %870 = vmatmul.bf16.vlgmr.msra.gmra.mxu2 %v1256_v4 }
  0x75   : > { %1549 = vmatpush.bf16.msrb.mxu3 %v1813_v37  ;;  %v1284_v37 = vor.u32 %v1455_v30, %v1283_v29  ;;  %v399_v29 = vld [vmem:[#allocation2 + $0x18] sm:$0xff] }
  0x79   : > { %1550 = vmatpush.bf16.msrb.mxu3 %v1482_v40 }
  0x7d   : > { %1551 = vmatpush.bf16.msrb.mxu3 %v1481_v43  ;;  %v1457_v43 = vld [vmem:[%s1799_s16 + $0x64] sm:$0xf] }
  0x80   : > { %777 = vmatmul.bf16.gmra.mxu0 %v1260_v13  ;;  %807 = vmatmul.bf16.gmra.mxu3 %v1332_v14  ;;  %v397_v13 = vld [vmem:[#allocation2] sm:$0xff] }
  0x81   : > { %1552 = vmatpush.bf16.msrb.mxu3 %v1480_v46  ;;  %826 = vmatmul.bf16.gmra.mxu1 %v1264_v15  ;;  %v1297_v46 = vld [vmem:[%s1799_s16 + $0x6c] sm:$0xf0] }
  0x82   : > { %875 = vmatmul.bf16.gmra.mxu2 %v1268_v16  ;;  %v1300_v51 = vor.u32 %v1457_v43, %v1297_v46 }
  0x85   : > { %1553 = vmatpush.bf16.msrb.mxu3 %v1479_v49 }
  0x89   : > { %1554 = vmatpush.bf16.msrb.mxu3 %v1478_v52 }
  0x8d   : > { %1555 = vmatpush.bf16.msrb.mxu3 %v1477_v55  ;;  %v1460_v55 = vld [vmem:[%s1799_s16 + $0x7c] sm:$0xf] }
  0x8e   : > { %v1312_v63 = vor.u32 %v1460_v55, %v1309_v58 }
  0x90   : > { %782 = vmatmul.bf16.gmra.mxu0 %v1272_v25  ;;  %851 = vmatmul.bf16.vlgmr.msrb.gmra.mxu3 %v1324_v26 }
  0x91   : > { %1556 = vmatpush.bf16.msra.mxu3 %v1807_v35  ;;  %831 = vmatmul.bf16.gmra.mxu1 %v1276_v27  ;;  %v1291_v35 = vld [vmem:[%s1799_s16 + $0x50] sm:$0xf] }
  0x92   : > { %880 = vmatmul.bf16.gmra.mxu2 %v1280_v28  ;;  %v1292_v40 = vor.u32 %v1456_v36, %v1291_v35 }
  0x95   : > { %1557 = vmatpush.bf16.msra.mxu3 %v1816_v38  ;;  %v1288_v38 = vor.u32 %v1454_v31, %v1285_v34 }
  0x99   : > { %1558 = vmatpush.bf16.msra.mxu3 %v1823_v41  ;;  %v1295_v41 = vld [vmem:[%s1799_s16 + $0x60] sm:$0xf] }
  0x9a   : > { %v1296_v49 = vor.u32 %v1458_v42, %v1295_v41 }
  0x9d   : > { %1559 = vmatpush.bf16.msra.mxu3 %v1829_v44  ;;  %v1327_v44 = vld [vmem:[%s1799_s16 + $0x98] sm:$0xf] }
  0xa0   : > { %787 = vmatmul.bf16.gmra.mxu0 %v1284_v37  ;;  %856 = vmatmul.bf16.gmra.mxu3 %v1336_v39  ;;  %v400_v37 = vld [vmem:[#allocation2 + $0x50] sm:$0xff] }
  0xa1   : > { %1560 = vmatpush.bf16.msra.mxu3 %v1835_v47  ;;  %836 = vmatmul.bf16.gmra.mxu1 %v1288_v38  ;;  %v1303_v47 = vld [vmem:[%s1799_s16 + $0x68] sm:$0xf] }
  0xa2   : > { %885 = vmatmul.bf16.gmra.mxu2 %v1292_v40  ;;  %v1304_v52 = vor.u32 %v1459_v48, %v1303_v47 }
  0xa5   : > { %1561 = vmatpush.bf16.msra.mxu3 %v1841_v50  ;;  %v1328_v50 = vor.u32 %v1465_v45, %v1327_v44  ;;  %v401_v45 = vld [vmem:[#allocation2 + $0x68] sm:$0xff] }
  0xa9   : > { %1562 = vmatpush.bf16.msra.mxu3 %v1847_v53  ;;  %v1307_v53 = vld [vmem:[%s1799_s16 + $0x78] sm:$0xf] }
  0xaa   : > { %v1308_v61 = vor.u32 %v1461_v54, %v1307_v53  ;;  %v402_v53 = vld [vmem:[#allocation2 + $0x8] sm:$0xff] }
  0xad   : > { %1563 = vmatpush.bf16.msra.mxu3 %v1852_v56  ;;  %v1468_v56 = vld [vmem:[%s1799_s16 + $0xb8] sm:$0xf0] }
  0xae   : > { %v1340_v62 = vor.u32 %v1468_v56, %v1339_v57 }
  0xb0   : > { %792 = vmatmul.bf16.gmra.mxu0 %v1296_v49  ;;  %900 = vmatmul.bf16.vlgmr.msra.gmra.mxu3 %v1328_v50 }
  0xb1   : > { %841 = vmatmul.bf16.gmra.mxu1 %v1300_v51 }
  0xb2   : > { %890 = vmatmul.bf16.gmra.mxu2 %v1304_v52 }
  0xc0   : > { %797 = vmatmul.bf16.gmra.mxu0 %v1308_v61  ;;  %905 = vmatmul.bf16.gmra.mxu3 %v1340_v62  ;;  %v403_v61 = vld [vmem:[#allocation2 + $0x48] sm:$0xff] }
  0xc1   : > { %846 = vmatmul.bf16.gmra.mxu1 %v1312_v63 }
  0xc2   : > { %895 = vmatmul.bf16.gmra.mxu2 %v1316_v0 }
  0xed   : > { %v773_v1 = vpop.f32.mrf.mxu0 }
  0xee   : > { %v822_v2 = vpop.f32.mrf.mxu1 }
  0xef   : > { %v823_v3 = vadd.f32 %v822_v2, %v773_v1 }
  0xf3   : > { %v1914_v4 = vpop.f32.mrf.mxu3 }
  0xf5   : > { %v871_v6 = vpop.f32.mrf.mxu2  ;;  %v775_v8 = vpop.f32.mrf.mxu0 }
  0xf6   : > { %v872_v7 = vadd.f32 %v871_v6, %v823_v3  ;;  %v824_v9 = vpop.f32.mrf.mxu1  ;;  %v408_v6 = vld [vmem:[#allocation2 + $0x60] sm:$0xff] }
  0xf7   : > { %v825_v11 = vadd.f32 %v824_v9, %v775_v8  ;;  %v404_v8 = vld [vmem:[#allocation2 + $0x40] sm:$0xff] }
  0xf8   : > { %v911_v10 = vadd.f32 %v872_v7, %v396_v5 }
  0xfa   : > { %927 = vst [vmem:[#allocation2 + $0x30] sm:$0xff] %v911_v10 }
  0xfb   : > { %v1916_v12 = vpop.f32.mrf.mxu3 }
  0xfd   : > { %v873_v14 = vpop.f32.mrf.mxu2  ;;  %v778_v16 = vpop.f32.mrf.mxu0 }
  0xfe   : > { %v874_v15 = vadd.f32 %v873_v14, %v825_v11  ;;  %v827_v17 = vpop.f32.mrf.mxu1 }
  0xff   : > { %v828_v19 = vadd.f32 %v827_v17, %v778_v16 }
 0x100   : > { %v912_v18 = vadd.f32 %v874_v15, %v397_v13 }
 0x102   : > { %928 = vst [vmem:[#allocation2] sm:$0xff] %v912_v18 }
 0x103   : > { %v1918_v20 = vpop.f32.mrf.mxu3 }
 0x105   : > { %v876_v22 = vpop.f32.mrf.mxu2  ;;  %v780_v24 = vpop.f32.mrf.mxu0 }
 0x106   : > { %v877_v23 = vadd.f32 %v876_v22, %v828_v19  ;;  %v829_v25 = vpop.f32.mrf.mxu1  ;;  %v409_v19 = vld [vmem:[#allocation2 + $0x70] sm:$0xff]  ;;  %v405_v22 = vld [vmem:[#allocation2 + $0x20] sm:$0xff] }
 0x107   : > { %v830_v27 = vadd.f32 %v829_v25, %v780_v24 }
 0x108   : > { %v913_v26 = vadd.f32 %v877_v23, %v398_v21 }
 0x10a   : > { %929 = vst [vmem:[#allocation2 + $0x58] sm:$0xff] %v913_v26 }
 0x10b   : > { %v1920_v28 = vpop.f32.mrf.mxu3 }
 0x10d   : > { %v878_v30 = vpop.f32.mrf.mxu2  ;;  %v783_v32 = vpop.f32.mrf.mxu0 }
 0x10e   : > { %v879_v31 = vadd.f32 %v878_v30, %v830_v27  ;;  %v832_v33 = vpop.f32.mrf.mxu1 }
 0x10f   : > { %v833_v35 = vadd.f32 %v832_v33, %v783_v32  ;;  %v410_v32 = vld [vmem:[#allocation2 + $0x78] sm:$0xff] }
 0x110   : > { %v914_v34 = vadd.f32 %v879_v31, %v399_v29 }
 0x112   : > { %930 = vst [vmem:[#allocation2 + $0x18] sm:$0xff] %v914_v34  ;;  %v406_v34 = vld [vmem:[#allocation2 + $0x10] sm:$0xff] }
 0x113   : > { %v852_v36 = vpop.f32.mrf.mxu3 }
 0x114   : > { %v853_v5 = vadd.f32 %v852_v36, %v1914_v4 }
 0x115   : > { %v881_v39 = vpop.f32.mrf.mxu2  ;;  %v785_v40 = vpop.f32.mrf.mxu0 }
 0x116   : > { %v882_v38 = vadd.f32 %v881_v39, %v833_v35  ;;  %v834_v41 = vpop.f32.mrf.mxu1 }
 0x117   : > { %v835_v43 = vadd.f32 %v834_v41, %v785_v40 }
 0x118   : > { %v915_v42 = vadd.f32 %v882_v38, %v400_v37 }
 0x11a   : > { %931 = vst [vmem:[#allocation2 + $0x50] sm:$0xff] %v915_v42 }
 0x11b   : > { %v854_v44 = vpop.f32.mrf.mxu3 }
 0x11c   : > { %v855_v17 = vadd.f32 %v854_v44, %v1916_v12 }
 0x11d   : > { %v883_v46 = vpop.f32.mrf.mxu2  ;;  %v788_v48 = vpop.f32.mrf.mxu0 }
 0x11e   : > { %v884_v47 = vadd.f32 %v883_v46, %v835_v43  ;;  %v837_v49 = vpop.f32.mrf.mxu1  ;;  %v411_v43 = vld [vmem:[#allocation2 + $0x28] sm:$0xff] }
 0x11f   : > { %v838_v51 = vadd.f32 %v837_v49, %v788_v48 }
 0x120   : > { %v916_v50 = vadd.f32 %v884_v47, %v401_v45  ;;  %v407_v45 = vld [vmem:[#allocation2 + $0x38] sm:$0xff] }
 0x122   : > { %932 = vst [vmem:[#allocation2 + $0x68] sm:$0xff] %v916_v50 }
 0x123   : > { %v857_v52 = vpop.f32.mrf.mxu3 }
 0x124   : > { %v858_v31 = vadd.f32 %v857_v52, %v1918_v20 }
 0x125   : > { %v886_v54 = vpop.f32.mrf.mxu2  ;;  %v790_v57 = vpop.f32.mrf.mxu0 }
 0x126   : > { %v887_v55 = vadd.f32 %v886_v54, %v838_v51  ;;  %v839_v56 = vpop.f32.mrf.mxu1 }
 0x127   : > { %v840_v59 = vadd.f32 %v839_v56, %v790_v57 }
 0x128   : > { %v917_v58 = vadd.f32 %v887_v55, %v402_v53 }
 0x12a   : > { %933 = vst [vmem:[#allocation2 + $0x8] sm:$0xff] %v917_v58 }
 0x12b   : > { %v859_v60 = vpop.f32.mrf.mxu3 }
 0x12c   : > { %v860_v41 = vadd.f32 %v859_v60, %v1920_v28 }
 0x12d   : > { %v888_v62 = vpop.f32.mrf.mxu2  ;;  %v793_v0 = vpop.f32.mrf.mxu0 }
 0x12e   : > { %v889_v63 = vadd.f32 %v888_v62, %v840_v59  ;;  %v842_v1 = vpop.f32.mrf.mxu1 }
 0x12f   : > { %v843_v3 = vadd.f32 %v842_v1, %v793_v0 }
 0x130   : > { %v918_v2 = vadd.f32 %v889_v63, %v403_v61 }
 0x132   : > { %934 = vst [vmem:[#allocation2 + $0x48] sm:$0xff] %v918_v2 }
 0x133   : > { %v901_v7 = vpop.f32.mrf.mxu3 }
 0x134   : > { %v902_v10 = vadd.f32 %v901_v7, %v853_v5 }
 0x135   : > { %v891_v9 = vpop.f32.mrf.mxu2  ;;  %v795_v13 = vpop.f32.mrf.mxu0 }
 0x136   : > { %v892_v11 = vadd.f32 %v891_v9, %v843_v3  ;;  %v923_v14 = vadd.f32 %v902_v10, %v408_v6  ;;  %v844_v15 = vpop.f32.mrf.mxu1 }
 0x137   : > { %v845_v18 = vadd.f32 %v844_v15, %v795_v13 }
 0x138   : > { %v919_v16 = vadd.f32 %v892_v11, %v404_v8  ;;  %939 = vst [vmem:[#allocation2 + $0x60] sm:$0xff] %v923_v14 }
 0x13a   : > { %935 = vst [vmem:[#allocation2 + $0x40] sm:$0xff] %v919_v16 }
 0x13b   : > { %v903_v21 = vpop.f32.mrf.mxu3 }
 0x13c   : > { %v904_v4 = vadd.f32 %v903_v21, %v855_v17 }
 0x13d   : > { %v893_v23 = vpop.f32.mrf.mxu2  ;;  %v798_v26 = vpop.f32.mrf.mxu0 }
 0x13e   : > { %v894_v24 = vadd.f32 %v893_v23, %v845_v18  ;;  %v924_v25 = vadd.f32 %v904_v4, %v409_v19  ;;  %v847_v27 = vpop.f32.mrf.mxu1 }
 0x13f   : > { %v848_v30 = vadd.f32 %v847_v27, %v798_v26 }
 0x140   : > { %v920_v29 = vadd.f32 %v894_v24, %v405_v22  ;;  %940 = vst [vmem:[#allocation2 + $0x70] sm:$0xff] %v924_v25 }
 0x142   : > { %936 = vst [vmem:[#allocation2 + $0x20] sm:$0xff] %v920_v29 }
 0x143   : > { %v906_v33 = vpop.f32.mrf.mxu3 }
 0x144   : > { %v907_v35 = vadd.f32 %v906_v33, %v858_v31 }
 0x145   : > { %v896_v12 = vpop.f32.mrf.mxu2  ;;  %v800_v38 = vpop.f32.mrf.mxu0 }
 0x146   : > { %v897_v36 = vadd.f32 %v896_v12, %v848_v30  ;;  %v925_v37 = vadd.f32 %v907_v35, %v410_v32  ;;  %v849_v40 = vpop.f32.mrf.mxu1 }
 0x147   : > { %v850_v42 = vadd.f32 %v849_v40, %v800_v38 }
 0x148   : > { %v921_v39 = vadd.f32 %v897_v36, %v406_v34  ;;  %941 = vst [vmem:[#allocation2 + $0x78] sm:$0xff] %v925_v37 }
 0x14a   : > { %937 = vst [vmem:[#allocation2 + $0x10] sm:$0xff] %v921_v39 }
 0x14b   : > { %v908_v44 = vpop.f32.mrf.mxu3 }
 0x14c   : > { %v909_v20 = vadd.f32 %v908_v44, %v860_v41 }
 0x14d   : > { %v898_v46 = vpop.f32.mrf.mxu2 }
 0x14e   : > { %v899_v47 = vadd.f32 %v898_v46, %v850_v42  ;;  %v926_v48 = vadd.f32 %v909_v20, %v411_v43  ;;  %946 = sbr.rel (%p1437_p11) target bundleno = 389 (0x185), region = 66 }
 0x150   : > { %v922_v49 = vadd.f32 %v899_v47, %v407_v45  ;;  %942 = vst [vmem:[#allocation2 + $0x28] sm:$0xff] %v926_v48 }
 0x152   : > { %938 = vst [vmem:[#allocation2 + $0x38] sm:$0xff] %v922_v49 }
 0x153   : > { %v947_v50 = vld [vmem:[#allocation2 + $0x30] sm:$0xff]  ;;  %v948_v51 = vld [vmem:[#allocation2] sm:$0xff]  ;;  %v949_v52 = vld [vmem:[#allocation2 + $0x58] sm:$0xff] }
 0x154   : > { %v1607_v28 = vld [vmem:[%s1977_s2] ss:$0 sm:$0xff]  ;;  %v950_v53 = vld [vmem:[#allocation2 + $0x18] sm:$0xff]  ;;  %v951_v54 = vld [vmem:[#allocation2 + $0x50] sm:$0xff] }
 0x155   : > { %v952_v55 = vld [vmem:[#allocation2 + $0x68] sm:$0xff]  ;;  %v967_v56 = vadd.f32 %v1607_v28, %v947_v50  ;;  %v968_v58 = vadd.f32 %v1607_v28, %v948_v51  ;;  %v969_v59 = vadd.f32 %v1607_v28, %v949_v52  ;;  %v970_v60 = vadd.f32 %v1607_v28, %v950_v53  ;;  %v955_v10 = vld [vmem:[#allocation2 + $0x40] sm:$0xff]  ;;  %v957_v13 = vld [vmem:[#allocation2 + $0x10] sm:$0xff] }
 0x156   : > { %v953_v57 = vld [vmem:[#allocation2 + $0x8] sm:$0xff]  ;;  %v971_v62 = vadd.f32 %v1607_v28, %v951_v54  ;;  %v972_v63 = vadd.f32 %v1607_v28, %v952_v55  ;;  %v956_v11 = vld [vmem:[#allocation2 + $0x20] sm:$0xff]  ;;  %v960_v19 = vld [vmem:[#allocation2 + $0x70] sm:$0xff]  ;;  %v975_v24 = vadd.f32 %v1607_v28, %v955_v10  ;;  %v977_v26 = vadd.f32 %v1607_v28, %v957_v13 }
 0x157   : > { %v954_v61 = vld [vmem:[#allocation2 + $0x48] sm:$0xff]  ;;  %v973_v0 = vadd.f32 %v1607_v28, %v953_v57  ;;  %v1496_v1 = vpack.c.bf16 %v968_v58, %v967_v56  ;;  %v1015_v2 = vadd.f32 %v968_v58, %v967_v56  ;;  %v1036_v3 = vmul.f32 %v967_v56, %v967_v56  ;;  %v959_v18 = vld [vmem:[#allocation2 + $0x60] sm:$0xff]  ;;  %v961_v12 = vld [vmem:[#allocation2 + $0x78] sm:$0xff] }
 0x158   : > { %v1037_v5 = vmul.f32 %v968_v58, %v968_v58  ;;  %v1501_v6 = vpack.c.bf16 %v970_v60, %v969_v59  ;;  %v1038_v7 = vmul.f32 %v969_v59, %v969_v59  ;;  %v1506_v8 = vpack.c.bf16 %v972_v63, %v971_v62  ;;  %v962_v35 = vld [vmem:[#allocation2 + $0x28] sm:$0xff] }
 0x159   : > { %v974_v9 = vadd.f32 %v1607_v28, %v954_v61  ;;  %1497 = vst [vmem:[%s1978_s3] sm:$0xff] %v1496_v1   ;;  %v1016_v15 = vadd.f32 %v1015_v2, %v969_v59  ;;  %v1039_v16 = vmul.f32 %v970_v60, %v970_v60  ;;  %v958_v17 = vld [vmem:[#allocation2 + $0x38] sm:$0xff]  ;;  %v1040_v21 = vmul.f32 %v971_v62, %v971_v62 }
 0x15a   : > { %v1052_v14 = vadd.f32 %v1037_v5, %v1036_v3  ;;  %1533 = vst [vmem:[%s1978_s3 + $0x8] sm:$0xff] %v1501_v6   ;;  %v976_v25 = vadd.f32 %v1607_v28, %v956_v11  ;;  %v978_v27 = vadd.f32 %v1607_v28, %v958_v17  ;;  %v979_v29 = vadd.f32 %v1607_v28, %v959_v18 }
 0x15b   : > { %v1511_v22 = vpack.c.bf16 %v974_v9, %v973_v0  ;;  %v1017_v23 = vadd.f32 %v1016_v15, %v970_v60  ;;  %1534 = vst [vmem:[%s1978_s3 + $0x10] sm:$0xff] %v1506_v8   ;;  %v980_v30 = vadd.f32 %v1607_v28, %v960_v19  ;;  %v1041_v33 = vmul.f32 %v972_v63, %v972_v63 }
 0x15c   : > { %v1053_v4 = vadd.f32 %v1052_v14, %v1038_v7  ;;  %v1516_v34 = vpack.c.bf16 %v976_v25, %v975_v24  ;;  %v1521_v36 = vpack.c.bf16 %v978_v27, %v977_v26  ;;  %v1042_v40 = vmul.f32 %v973_v0, %v973_v0 }
 0x15d   : > { %1535 = vst [vmem:[%s1978_s3 + $0x18] sm:$0xff] %v1511_v22   ;;  %v1018_v32 = vadd.f32 %v1017_v23, %v971_v62  ;;  %v1526_v37 = vpack.c.bf16 %v980_v30, %v979_v29  ;;  %v981_v41 = vadd.f32 %v1607_v28, %v961_v12  ;;  %v982_v42 = vadd.f32 %v1607_v28, %v962_v35 }
 0x15e   : > { %v1054_v31 = vadd.f32 %v1053_v4, %v1039_v16  ;;  %1536 = vst [vmem:[%s1978_s3 + $0x20] sm:$0xff] %v1516_v34   ;;  %v1043_v45 = vmul.f32 %v974_v9, %v974_v9  ;;  %v1044_v48 = vmul.f32 %v975_v24, %v975_v24  ;;  %v1045_v51 = vmul.f32 %v976_v25, %v976_v25 }
 0x15f   : > { %v1019_v39 = vadd.f32 %v1018_v32, %v972_v63  ;;  %1537 = vst [vmem:[%s1978_s3 + $0x28] sm:$0xff] %v1521_v36   ;;  %v1531_v46 = vpack.c.bf16 %v982_v42, %v981_v41  ;;  %v1046_v53 = vmul.f32 %v977_v26, %v977_v26  ;;  %v1047_v57 = vmul.f32 %v978_v27, %v978_v27 }
 0x160   : > { %v1055_v38 = vadd.f32 %v1054_v31, %v1040_v21  ;;  %1538 = vst [vmem:[%s1978_s3 + $0x30] sm:$0xff] %v1526_v37   ;;  %v1048_v59 = vmul.f32 %v979_v29, %v979_v29  ;;  %v1049_v62 = vmul.f32 %v980_v30, %v980_v30  ;;  %v1050_v1 = vmul.f32 %v981_v41, %v981_v41 }
 0x161   : > { %v1020_v44 = vadd.f32 %v1019_v39, %v973_v0  ;;  %1539 = vst [vmem:[%s1978_s3 + $0x38] sm:$0xff] %v1531_v46   ;;  %v1051_v3 = vmul.f32 %v982_v42, %v982_v42 }
 0x162   : > { %v1056_v43 = vadd.f32 %v1055_v38, %v1041_v33 }
 0x163   : > { %v1021_v20 = vadd.f32 %v1020_v44, %v974_v9 }
 0x164   : > { %v1057_v47 = vadd.f32 %v1056_v43, %v1042_v40 }
 0x165   : > { %v1022_v50 = vadd.f32 %v1021_v20, %v975_v24 }
 0x166   : > { %v1058_v49 = vadd.f32 %v1057_v47, %v1043_v45 }
 0x167   : > { %v1023_v52 = vadd.f32 %v1022_v50, %v976_v25 }
 0x168   : > { %v1059_v28 = vadd.f32 %v1058_v49, %v1044_v48 }
 0x169   : > { %v1024_v55 = vadd.f32 %v1023_v52, %v977_v26 }
 0x16a   : > { %v1060_v54 = vadd.f32 %v1059_v28, %v1045_v51 }
 0x16b   : > { %v1025_v56 = vadd.f32 %v1024_v55, %v978_v27 }
 0x16c   : > { %v1061_v58 = vadd.f32 %v1060_v54, %v1046_v53 }
 0x16d   : > { %v1026_v61 = vadd.f32 %v1025_v56, %v979_v29 }
 0x16e   : > { %v1062_v60 = vadd.f32 %v1061_v58, %v1047_v57 }
 0x16f   : > { %v1027_v63 = vadd.f32 %v1026_v61, %v980_v30 }
 0x170   : > { %v1063_v0 = vadd.f32 %v1062_v60, %v1048_v59 }
 0x171   : > { %v1028_v2 = vadd.f32 %v1027_v63, %v981_v41 }
 0x172   : > { %v1064_v5 = vadd.f32 %v1063_v0, %v1049_v62 }
 0x173   : > { %v1029_v6 = vadd.f32 %v1028_v2, %v982_v42 }
 0x174   : > { %v1065_v7 = vadd.f32 %v1064_v5, %v1050_v1 }
 0x175   : > { %v1030_v8 = vrot.slane %v1029_v6, 4 }
 0x176   : > { %v1066_v9 = vadd.f32 %v1065_v7, %v1051_v3 }
 0x177   : > { %v1031_v10 = vadd.f32 %v1030_v8, %v1029_v6 }
 0x178   : > { %v1067_v11 = vrot.slane %v1066_v9, 4 }
 0x179   : > { %v1032_v13 = vrot.slane %v1031_v10, 2 }
 0x17a   : > { %v1068_v14 = vadd.f32 %v1067_v11, %v1066_v9 }
 0x17b   : > { %v1033_v15 = vadd.f32 %v1032_v13, %v1031_v10 }
 0x17c   : > { %v1069_v16 = vrot.slane %v1068_v14, 2 }
 0x17d   : > { %v1034_v17 = vrot.slane %v1033_v15, 1 }
 0x17e   : > { %v1070_v18 = vadd.f32 %v1069_v16, %v1068_v14 }
 0x17f   : > { %v1035_v19 = vadd.f32 %v1034_v17, %v1033_v15 }
 0x180   : > { %v1071_v21 = vrot.slane %v1070_v18, 1 }
 0x181   : > { %1073 = vst [vmem:[%s1979_s4] sm:$0x1] %v1035_v19 }
 0x182   : > { %v1072_v22 = vadd.f32 %v1071_v21, %v1070_v18 }
 0x184   : > { %1074 = vst [vmem:[%s1980_s5] sm:$0x1] %v1072_v22 }
 0x185 PF: > { %s16_s22 = sadd.s32 1, %s1646_s22   ;;  %s1981_s18 = smov %s1634_s19 }
 0x186   : > { %p13_p12 = scmp.ge.s32.totalorder %s16_s22, 5   ;;  %s1982_s19 = smov %s1714_s26 }
 0x187   : > { %s1983_s20 = smov %s1642_s21  ;;  %s1984_s21 = smov %s1986_s23 }
 0x188   :  { %15 = sbr.rel (!%p13_p12) target bundleno = 3 (0x3), region = 134 }

// kernel: yolo_forward.19
= control target key start
LH: loop header
LB: loop body
LE: loop exit
PB: predicated region body
PF: predicated region fallthrough
CT: control target
= control target key end

     0   :  { %s197_s0 = inlined_call_operand.vmem [shape: bf16[8,2,4,256], index: 0, kind: input, shape index: {}]   ;;  %s198_s1 = inlined_call_operand.vmem [shape: bf16[8,4,128], index: 1, kind: output, shape index: {}]  }
   0x1   :  { %v101_v0 = vld [vmem:[%s197_s0] sm:$0xff]   ;;  %v132_v1 = vld [vmem:[%s197_s0 + $0x8] sm:$0xff]   ;;  %v133_v2 = vld [vmem:[%s197_s0 + $0x10] sm:$0xff]  }
   0x2   :  { %v102_v3 = vunpack.c.l.bf16 %v101_v0  ;;  %v103_v4 = vunpack.c.h.bf16 %v101_v0  ;;  %v106_v5 = vunpack.c.l.bf16 %v132_v1  ;;  %v107_v6 = vunpack.c.h.bf16 %v132_v1  ;;  %v134_v7 = vld [vmem:[%s197_s0 + $0x18] sm:$0xff]   ;;  %v135_v8 = vld [vmem:[%s197_s0 + $0x20] sm:$0xff]   ;;  %v136_v9 = vld [vmem:[%s197_s0 + $0x28] sm:$0xff]  }
   0x3   :  { %v110_v10 = vunpack.c.l.bf16 %v133_v2  ;;  %v111_v11 = vunpack.c.h.bf16 %v133_v2  ;;  %v114_v12 = vunpack.c.l.bf16 %v134_v7  ;;  %v115_v13 = vunpack.c.h.bf16 %v134_v7  ;;  %v137_v14 = vld [vmem:[%s197_s0 + $0x30] sm:$0xff]   ;;  %v138_v23 = vld [vmem:[%s197_s0 + $0x38] sm:$0xff]  }
   0x4   :  { %v40_v15 = vmax.f32 %v102_v3, %v103_v4  ;;  %v41_v16 = vmax.f32 %v106_v5, %v107_v6  ;;  %v118_v17 = vunpack.c.l.bf16 %v135_v8  ;;  %v119_v18 = vunpack.c.h.bf16 %v135_v8 }
   0x5   :  { %v42_v19 = vmax.f32 %v110_v10, %v111_v11  ;;  %v43_v20 = vmax.f32 %v114_v12, %v115_v13  ;;  %v122_v21 = vunpack.c.l.bf16 %v136_v9  ;;  %v123_v22 = vunpack.c.h.bf16 %v136_v9 }
   0x6   :  { %v56_v24 = vrot.slane %v40_v15, 4  ;;  %v57_v25 = vrot.slane %v41_v16, 4  ;;  %v44_v26 = vmax.f32 %v118_v17, %v119_v18  ;;  %v126_v27 = vunpack.c.l.bf16 %v137_v14 }
   0x7   :  { %v58_v28 = vrot.slane %v42_v19, 4  ;;  %v59_v29 = vrot.slane %v43_v20, 4  ;;  %v45_v30 = vmax.f32 %v122_v21, %v123_v22  ;;  %v127_v31 = vunpack.c.h.bf16 %v137_v14 }
   0x8   :  { %v72_v32 = vmax.f32 %v40_v15, %v56_v24  ;;  %v73_v33 = vmax.f32 %v41_v16, %v57_v25  ;;  %v60_v34 = vrot.slane %v44_v26, 4  ;;  %v130_v35 = vunpack.c.l.bf16 %v138_v23 }
   0x9   :  { %v74_v36 = vmax.f32 %v42_v19, %v58_v28  ;;  %v75_v37 = vmax.f32 %v43_v20, %v59_v29  ;;  %v61_v38 = vrot.slane %v45_v30, 4  ;;  %v46_v39 = vmax.f32 %v126_v27, %v127_v31 }
   0xa   :  { %v80_v40 = vpack.c.bf16 %v72_v32, %v72_v32  ;;  %v81_v41 = vpack.c.bf16 %v73_v33, %v73_v33  ;;  %v76_v42 = vmax.f32 %v44_v26, %v60_v34  ;;  %v131_v43 = vunpack.c.h.bf16 %v138_v23 }
   0xb   :  { %v82_v44 = vpack.c.bf16 %v74_v36, %v74_v36  ;;  %v83_v45 = vpack.c.bf16 %v75_v37, %v75_v37  ;;  %v77_v46 = vmax.f32 %v45_v30, %v61_v38  ;;  %v62_v47 = vrot.slane %v46_v39, 4 }
   0xc   :  { %88 = vst [vmem:[%s198_s1] sm:$0x3] %v80_v40  ;;  %v84_v48 = vpack.c.bf16 %v76_v42, %v76_v42  ;;  %v47_v49 = vmax.f32 %v130_v35, %v131_v43 }
   0xd   :  { %89 = vst [vmem:[%s198_s1 + $0x2] sm:$0x3] %v81_v41  ;;  %v85_v50 = vpack.c.bf16 %v77_v46, %v77_v46  ;;  %v78_v51 = vmax.f32 %v46_v39, %v62_v47 }
   0xe   :  { %90 = vst [vmem:[%s198_s1 + $0x4] sm:$0x3] %v82_v44  ;;  %v63_v52 = vrot.slane %v47_v49, 4 }
   0xf   :  { %91 = vst [vmem:[%s198_s1 + $0x6] sm:$0x3] %v83_v45  ;;  %v86_v53 = vpack.c.bf16 %v78_v51, %v78_v51 }
  0x10   :  { %92 = vst [vmem:[%s198_s1 + $0x8] sm:$0x3] %v84_v48  ;;  %v79_v54 = vmax.f32 %v47_v49, %v63_v52 }
  0x11   :  { %93 = vst [vmem:[%s198_s1 + $0xa] sm:$0x3] %v85_v50 }
  0x12   :  { %94 = vst [vmem:[%s198_s1 + $0xc] sm:$0x3] %v86_v53  ;;  %v87_v55 = vpack.c.bf16 %v79_v54, %v79_v54 }
  0x14   :  { %95 = vst [vmem:[%s198_s1 + $0xe] sm:$0x3] %v87_v55 }

// kernel: yolo_forward.21
= control target key start
LH: loop header
LB: loop body
LE: loop exit
PB: predicated region body
PF: predicated region fallthrough
CT: control target
= control target key end

     0   :  { %s180_s1 = inlined_call_operand.vmem [shape: f32[1,1,128], index: 1, kind: input, shape index: {}]   ;;  %s181_s2 = inlined_call_operand.vmem [shape: f32[1,1,128], index: 2, kind: input, shape index: {}]   ;;  %s182_s3 = inlined_call_operand.vmem [shape: f32[1,128], index: 3, kind: input, shape index: {}]   ;;  %s183_s4 = inlined_call_operand.vmem [shape: f32[1,128], index: 4, kind: input, shape index: {}]   ;;  %s184_s0 = inlined_call_operand.vmem [shape: bf16[32,128], index: 0, kind: input, shape index: {}]   ;;  %s185_s5 = inlined_call_operand.vmem [shape: bf16[32,128], index: 5, kind: output, shape index: {}]  }
   0x1   :  { %v20_v0 = vld [vmem:[%s180_s1] sm:$0x1]  ;;  %v120_v12 = vld [vmem:[%s184_s0 + $0x8] sm:$0xff]  }
   0x2   :  { %v22_v1 = vld [vmem:[%s181_s2] sm:$0x1]  ;;  %v24_v2 = vmul.f32 0.03125, %v20_v0  ;;  %v108_v17 = vunpack.c.l.bf16 %v120_v12  ;;  %v109_v18 = vunpack.c.h.bf16 %v120_v12 }
   0x3   :  { %v25_v3 = vmul.f32 0.03125, %v22_v1  ;;  %v103_v10 = vld [vmem:[%s184_s0] sm:$0xff]  }
   0x4   :  { %v26_v4 = vmul.f32 %v24_v2, %v24_v2  ;;  %v104_v13 = vunpack.c.l.bf16 %v103_v10  ;;  %v105_v15 = vunpack.c.h.bf16 %v103_v10  ;;  %v38_v16 = vperm.slane %v24_v2, 0  ;;  %v122_v27 = vld [vmem:[%s182_s3] ss:$0 sm:$0xff] }
   0x5   :  { %v123_v30 = vld [vmem:[%s183_s4] ss:$0 sm:$0xff] }
   0x6   :  { %v27_v5 = vsub.f32 %v25_v3, %v26_v4  ;;  %v40_v21 = vsub.f32 %v104_v13, %v38_v16  ;;  %v41_v22 = vsub.f32 %v105_v15, %v38_v16  ;;  %v42_v23 = vsub.f32 %v108_v17, %v38_v16 }
   0x7   :  { %v43_v24 = vsub.f32 %v109_v18, %v38_v16 }
   0x8   :  { %v28_v6 = vmax.f32 %v27_v5, 0.0 }
   0xa   :  { %v44_v7 = vadd.f32 1e-05, %v28_v6 }
   0xc   :  { %124 = vrsqrt.f32 %v44_v7  ;;  %vm51_vm0 = vweird.f32 %v44_v7 }
  0x12   :  { %v125_v8 = vpop.eup %124 }
  0x13   :  { %v46_v9 = vmul.f32 %v125_v8, %v44_v7  ;;  %vm52_vm1 = vweird.f32 %v125_v8 }
  0x14   :  { %vm53_vm2 = vmor %vm51_vm0, %vm52_vm1 }
  0x15   :  { %v47_v11 = vmul.f32 %v125_v8, %v46_v9 }
  0x17   :  { %v48_v14 = vmul.f32 0.5, %v47_v11 }
  0x19   :  { %v49_v19 = vsub.f32 1.5, %v48_v14 }
  0x1b   :  { %v50_v20 = vmul.f32 %v125_v8, %v49_v19 }
  0x1d   :  { %v54_v25 = vsel %vm53_vm2, %v125_v8, %v50_v20 }
  0x1e   :  { %v56_v26 = vperm.slane %v54_v25, 0 }
  0x20   :  { %v58_v28 = vmul.f32 %v56_v26, %v40_v21  ;;  %v59_v29 = vmul.f32 %v56_v26, %v41_v22  ;;  %v60_v31 = vmul.f32 %v56_v26, %v42_v23  ;;  %v61_v32 = vmul.f32 %v56_v26, %v43_v24 }
  0x22   :  { %v66_v33 = vmul.f32 %v122_v27, %v58_v28  ;;  %v67_v34 = vmul.f32 %v122_v27, %v59_v29  ;;  %v68_v35 = vmul.f32 %v122_v27, %v60_v31  ;;  %v69_v36 = vmul.f32 %v122_v27, %v61_v32 }
  0x24   :  { %v74_v37 = vadd.f32 %v123_v30, %v66_v33  ;;  %v75_v38 = vadd.f32 %v123_v30, %v67_v34  ;;  %v76_v39 = vadd.f32 %v123_v30, %v68_v35  ;;  %v77_v40 = vadd.f32 %v123_v30, %v69_v36 }
  0x26   :  { %vm78_vm3 = vcmp.gt.f32.partialorder %v74_v37, 0.0  ;;  %vm79_vm4 = vcmp.gt.f32.partialorder %v75_v38, 0.0  ;;  %v82_v41 = vmul.f32 0.1, %v74_v37  ;;  %v83_v42 = vmul.f32 0.1, %v75_v38 }
  0x27   :  { %vm80_vm5 = vcmp.gt.f32.partialorder %v76_v39, 0.0  ;;  %vm81_vm6 = vcmp.gt.f32.partialorder %v77_v40, 0.0  ;;  %v84_v43 = vmul.f32 0.1, %v76_v39  ;;  %v85_v44 = vmul.f32 0.1, %v77_v40 }
  0x28   :  { %v86_v45 = vsel %vm78_vm3, %v74_v37, %v82_v41  ;;  %v87_v46 = vsel %vm79_vm4, %v75_v38, %v83_v42 }
  0x29   :  { %v113_v47 = vpack.c.bf16 %v87_v46, %v86_v45  ;;  %v88_v48 = vsel %vm80_vm5, %v76_v39, %v84_v43  ;;  %v89_v49 = vsel %vm81_vm6, %v77_v40, %v85_v44 }
  0x2a   :  { %v118_v50 = vpack.c.bf16 %v89_v49, %v88_v48 }
  0x2b   :  { %114 = vst [vmem:[%s185_s5] sm:$0xff] %v113_v47  }
  0x2c   :  { %121 = vst [vmem:[%s185_s5 + $0x8] sm:$0xff] %v118_v50  }

// kernel: yolo_forward.20
= control target key start
LH: loop header
LB: loop body
LE: loop exit
PB: predicated region body
PF: predicated region fallthrough
CT: control target
= control target key end

     0   :  { %s1123_s18 = smov 0   ;;  %s1125_s19 = smov 0   ;;  %s1245_s0 = inlined_call_operand.vmem [shape: bf16[32,1152], index: 0, kind: input, shape index: {}]   ;;  %s1246_s1 = inlined_call_operand.vmem [shape: bf16[1152,128], index: 1, kind: input, shape index: {}]   ;;  %s1247_s2 = inlined_call_operand.vmem [shape: f32[1,128], index: 2, kind: input, shape index: {}]   ;;  %s1248_s3 = inlined_call_operand.vmem [shape: bf16[32,128], index: 3, kind: output, shape index: {0}]   ;;  %s1249_s4 = inlined_call_operand.vmem [shape: f32[1,1,128], index: 4, kind: output, shape index: {1}]   ;;  %s1250_s5 = inlined_call_operand.vmem [shape: f32[1,1,128], index: 5, kind: output, shape index: {2}]  }
   0x1   :  { %s1127_s20 = smov 0   ;;  %s1129_s21 = smov 0  }
   0x2   :  { %s1131_s22 = smov 0  }
   0x3 LB: > { %s25_s23 = sadd.s32 1, %s1086_s21  ;;  %p44_p1 = scmp.ne.s32.totalorder %s1078_s19, %s1074_s18  ;;  %s1090_s22 = sphi %s1131_s22, %s16_s22   ;;  %s1086_s21 = sphi %s1129_s21, %s1254_s21   ;;  %s1082_s20 = sphi %s1127_s20, %s1253_s20   ;;  %s1078_s19 = sphi %s1125_s19, %s1252_s19   ;;  %s1074_s18 = sphi %s1123_s18, %s1251_s18  }
   0x4   : > { %p26_p0 = scmp.ge.s32.totalorder %s25_s23, 3  ;;  %p45_p2 = scmp.eq.s32.totalorder %s1090_s22, 0 }
   0x5   : > { %s37_s25 = sadd.s32 1, %s1078_s19  ;;  %p818_p5 = scmp.ge.s32.totalorder %s1090_s22, 3 }
   0x6   : > { %s1256_s23 = smov (%p26_p0, %s25_s23), 0  ;;  %p46_p3 = por %p45_p2, %p44_p1 }
   0x7   : > { %s33_s24 = ssub.s32 %s1086_s21, %s1256_s23  ;;  %198 = sbr.rel (%p818_p5) target bundleno = 25 (0x19), region = 20 }
   0x8   : > { %p35_p4 = scmp.eq.s32.totalorder %s33_s24, 0 }
   0xa   : > { %s1158_s26 = scalar_select %p35_p4, %s1078_s19, %s37_s25  }
   0xc   : > { %201 = sbr.rel (!%p46_p3) target bundleno = 25 (0x19), region = 24  ;;  %s203_s27 = sand.u32 (%p46_p3), 1, %s1078_s19  }
   0xd   : > { %s958_s28 = smul.u32 (%p46_p3), 12, %s1086_s21 }
   0xe   : > { %s1008_s29 = smul.u32 (%p46_p3), 48, %s203_s27 }
   0xf   : > { %s211_s7 = scalar_lea.vmem (%p46_p3), %s1245_s0, %s958_s28 }
  0x10   : > { %v226_v0 = vld [vmem:[%s211_s7] sm:$0xff] (%p46_p3)  ;;  %v230_v2 = vld [vmem:[%s211_s7 + $0x48] sm:$0xff] (%p46_p3)  ;;  %s205_s8 = scalar_lea.vmem (%p46_p3), [#allocation3], %s1008_s29  ;;  %v824_v6 = vld [vmem:[%s211_s7 + $0x50] sm:$0xf] (%p46_p3) }
  0x11   : > { %v228_v1 = vld [vmem:[%s211_s7 + $0x24] sm:$0xff]  ;;  %227 = vst [vmem:[%s205_s8] sm:$0xff] %v226_v0  ;;  %v232_v3 = vld [vmem:[%s211_s7 + $0x6c] sm:$0xff]  ;;  %v826_v7 = vld [vmem:[%s211_s7 + $0x74] sm:$0xf] }
  0x12   : > { %229 = vst [vmem:[%s205_s8 + $0xc] sm:$0xff] %v228_v1  ;;  %v820_v4 = vld [vmem:[%s211_s7 + $0x8] sm:$0xf]  ;;  %v822_v5 = vld [vmem:[%s211_s7 + $0x2c] sm:$0xf] }
  0x13   : > { %231 = vst [vmem:[%s205_s8 + $0x18] sm:$0xff] %v230_v2 }
  0x14   : > { %233 = vst [vmem:[%s205_s8 + $0x24] sm:$0xff] %v232_v3 }
  0x15   : > { %821 = vst [vmem:[%s205_s8 + $0x8] sm:$0xf] %v820_v4 }
  0x16   : > { %823 = vst [vmem:[%s205_s8 + $0x14] sm:$0xf] %v822_v5 }
  0x17   : > { %825 = vst [vmem:[%s205_s8 + $0x20] sm:$0xf] %v824_v6 }
  0x18   : > { %827 = vst [vmem:[%s205_s8 + $0x2c] sm:$0xf] %v826_v7 }
  0x19 PF: > { %p828_p6 = scmp.ge.s32.totalorder %s1090_s22, 1  ;;  %p263_p7 = scmp.lt.s32.totalorder %s1090_s22, 4 }
  0x1b   : > { %p264_p8 = pnand %p828_p6, %p263_p7 }
  0x1c   : > { %s270_s9 = sand.u32 (!%p264_p8), 1, %s1074_s18   ;;  %s310_s10 = smul.u32 (!%p264_p8), 48, %s1082_s20 }
  0x1d   : > { %267 = sbr.rel (%p264_p8) target bundleno = 265 (0x109), region = 54  ;;  %p830_p10 = scmp.ne.s32.totalorder (!%p264_p8), %s1082_s20, 0 }
  0x1e   : > { %s1009_s11 = smul.u32 (!%p264_p8), 48, %s270_s9  ;;  %p311_p9 = scmp.lt.s32.totalorder (!%p264_p8), %s310_s10, 143 }
  0x20   : > { %s1175_s16 = scalar_lea.vmem (!%p264_p8), [#allocation3], %s1009_s11 }
  0x22   : > { %s1258_s10 = smov (!%p311_p9, %s310_s10), 143  ;;  %331 = sbr.rel (%p830_p10) target bundleno = 44 (0x2c), region = 62 }
  0x23   : > { %s829_s12 = sshll.u32 %s1258_s10, 2 }
  0x24   : > { %s1173_s15 = scalar_lea.vmem %s1246_s1, %s829_s12 }
  0x27   : > { %v1092_v8 = vmov 0.0  }
  0x28   : > { %332 = vst [vmem:[#allocation2 + $0x10] sm:$0xff] %v1092_v8 }
  0x29   : > { %333 = vst [vmem:[#allocation2] sm:$0xff] %v1092_v8 }
  0x2a   : > { %334 = vst [vmem:[#allocation2 + $0x18] sm:$0xff] %v1092_v8 }
  0x2b   : > { %335 = vst [vmem:[#allocation2 + $0x8] sm:$0xff] %v1092_v8 }
  0x2c PF: > { %v972_v9 = vld [vmem:[%s1173_s15 + $0x38] sm:$0xff]  ;;  %v971_v12 = vld [vmem:[%s1173_s15 + $0x30] sm:$0xff]  ;;  %v970_v15 = vld [vmem:[%s1173_s15 + $0x28] sm:$0xff]  ;;  %p951_p11 = scmp.ne.s32.totalorder %s1082_s20, 2 }
  0x2d   : > { %v980_v10 = vld [vmem:[%s1173_s15 + $0x78] sm:$0xff]  ;;  %572 = vmatpush.bf16.msra.mxu0 %v972_v9  ;;  %v979_v13 = vld [vmem:[%s1173_s15 + $0x70] sm:$0xff]  ;;  %1000 = vmatpush.bf16.msra.mxu3 %v972_v9  ;;  %v978_v16 = vld [vmem:[%s1173_s15 + $0x68] sm:$0xff] }
  0x2e   : > { %v988_v11 = vld [vmem:[%s1173_s15 + $0xb8] sm:$0xff]  ;;  %591 = vmatpush.bf16.msra.mxu1 %v980_v10  ;;  %v987_v14 = vld [vmem:[%s1173_s15 + $0xb0] sm:$0xff]  ;;  %v986_v17 = vld [vmem:[%s1173_s15 + $0xa8] sm:$0xff] }
  0x2f   : > { %610 = vmatpush.bf16.msra.mxu2 %v988_v11  ;;  %v969_v18 = vld [vmem:[%s1173_s15 + $0x20] sm:$0xff]  ;;  %v968_v21 = vld [vmem:[%s1173_s15 + $0x18] sm:$0xff]  ;;  %v967_v24 = vld [vmem:[%s1173_s15 + $0x10] sm:$0xff] }
  0x30   : > { %v977_v19 = vld [vmem:[%s1173_s15 + $0x60] sm:$0xff]  ;;  %v976_v22 = vld [vmem:[%s1173_s15 + $0x58] sm:$0xff]  ;;  %v975_v25 = vld [vmem:[%s1173_s15 + $0x50] sm:$0xff] }
  0x31   : > { %573 = vmatpush.bf16.msra.mxu0 %v971_v12  ;;  %1001 = vmatpush.bf16.msra.mxu3 %v971_v12  ;;  %v985_v20 = vld [vmem:[%s1173_s15 + $0xa0] sm:$0xff]  ;;  %v984_v23 = vld [vmem:[%s1173_s15 + $0x98] sm:$0xff]  ;;  %v983_v26 = vld [vmem:[%s1173_s15 + $0x90] sm:$0xff] }
  0x32   : > { %592 = vmatpush.bf16.msra.mxu1 %v979_v13  ;;  %v966_v27 = vld [vmem:[%s1173_s15 + $0x8] sm:$0xff]  ;;  %v965_v30 = vld [vmem:[%s1173_s15] sm:$0xff]  ;;  %v336_v54 = vld [vmem:[#allocation2 + $0x10] sm:$0xff] }
  0x33   : > { %611 = vmatpush.bf16.msra.mxu2 %v987_v14  ;;  %v974_v28 = vld [vmem:[%s1173_s15 + $0x48] sm:$0xff]  ;;  %v973_v31 = vld [vmem:[%s1173_s15 + $0x40] sm:$0xff]  ;;  %v338_v4 = vld [vmem:[#allocation2 + $0x18] sm:$0xff] }
  0x34   : > { %v982_v29 = vld [vmem:[%s1173_s15 + $0x88] sm:$0xff]  ;;  %v981_v32 = vld [vmem:[%s1173_s15 + $0x80] sm:$0xff] }
  0x35   : > { %574 = vmatpush.bf16.msra.mxu0 %v970_v15  ;;  %1002 = vmatpush.bf16.msra.mxu3 %v970_v15  ;;  %v833_v33 = vld [vmem:[%s1175_s16] sm:$0xf]  ;;  %v960_v34 = vld [vmem:[%s1175_s16 + $0x8] sm:$0xf0]  ;;  %v959_v35 = vld [vmem:[%s1175_s16 + $0x4] sm:$0xf] }
  0x36   : > { %593 = vmatpush.bf16.msra.mxu1 %v978_v16  ;;  %v835_v36 = vld [vmem:[%s1175_s16 + $0xc] sm:$0xf0]  ;;  %v841_v37 = vld [vmem:[%s1175_s16 + $0x8] sm:$0xf]  ;;  %v961_v38 = vld [vmem:[%s1175_s16 + $0x10] sm:$0xf0]  ;;  %v834_v41 = vor.u32 %v960_v34, %v833_v33 }
  0x37   : > { %612 = vmatpush.bf16.msra.mxu2 %v986_v17  ;;  %v845_v39 = vld [vmem:[%s1175_s16 + $0x18] sm:$0xf]  ;;  %v963_v40 = vld [vmem:[%s1175_s16 + $0x20] sm:$0xf0]  ;;  %v838_v42 = vor.u32 %v959_v35, %v835_v36  ;;  %v842_v43 = vor.u32 %v961_v38, %v841_v37  ;;  %v962_v45 = vld [vmem:[%s1175_s16 + $0x1c] sm:$0xf] }
  0x38   : > { %v846_v44 = vor.u32 %v963_v40, %v845_v39  ;;  %v847_v46 = vld [vmem:[%s1175_s16 + $0x24] sm:$0xf0]  ;;  %v853_v47 = vld [vmem:[%s1175_s16 + $0x20] sm:$0xf]  ;;  %v964_v48 = vld [vmem:[%s1175_s16 + $0x28] sm:$0xf0] }
  0x39   : > { %575 = vmatpush.bf16.msra.mxu0 %v969_v18  ;;  %1003 = vmatpush.bf16.msra.mxu3 %v969_v18  ;;  %v850_v49 = vor.u32 %v962_v45, %v847_v46  ;;  %v854_v50 = vor.u32 %v964_v48, %v853_v47  ;;  %v337_v61 = vld [vmem:[#allocation2] sm:$0xff]  ;;  %v339_v11 = vld [vmem:[#allocation2 + $0x8] sm:$0xff] }
  0x3a   : > { %594 = vmatpush.bf16.msra.mxu1 %v977_v19 }
  0x3b   : > { %613 = vmatpush.bf16.msra.mxu2 %v985_v20 }
  0x3d   : > { %576 = vmatpush.bf16.msra.mxu0 %v968_v21  ;;  %1004 = vmatpush.bf16.msra.mxu3 %v968_v21 }
  0x3e   : > { %595 = vmatpush.bf16.msra.mxu1 %v976_v22 }
  0x3f   : > { %614 = vmatpush.bf16.msra.mxu2 %v984_v23 }
  0x41   : > { %577 = vmatpush.bf16.msra.mxu0 %v967_v24  ;;  %1005 = vmatpush.bf16.msra.mxu3 %v967_v24 }
  0x42   : > { %596 = vmatpush.bf16.msra.mxu1 %v975_v25 }
  0x43   : > { %615 = vmatpush.bf16.msra.mxu2 %v983_v26 }
  0x45   : > { %578 = vmatpush.bf16.msra.mxu0 %v966_v27  ;;  %1006 = vmatpush.bf16.msra.mxu3 %v966_v27 }
  0x46   : > { %597 = vmatpush.bf16.msra.mxu1 %v974_v28 }
  0x47   : > { %616 = vmatpush.bf16.msra.mxu2 %v982_v29 }
  0x49   : > { %579 = vmatpush.bf16.msra.mxu0 %v965_v30  ;;  %1007 = vmatpush.bf16.msra.mxu3 %v965_v30 }
  0x4a   : > { %598 = vmatpush.bf16.msra.mxu1 %v973_v31 }
  0x4b   : > { %617 = vmatpush.bf16.msra.mxu2 %v981_v32 }
  0x4c   : > { %580 = vmatmul.bf16.vlgmr.msra.gmra.mxu0 %v834_v41  ;;  %585 = vmatmul.bf16.vlgmr.msra.gmra.mxu3 %v846_v44 }
  0x4d   : > { %599 = vmatmul.bf16.vlgmr.msra.gmra.mxu1 %v838_v42 }
  0x4e   : > { %618 = vmatmul.bf16.vlgmr.msra.gmra.mxu2 %v842_v43 }
  0x5d   : > { %604 = vmatmul.bf16.gmra.mxu1 %v850_v49 }
  0x5e   : > { %623 = vmatmul.bf16.gmra.mxu2 %v854_v50 }
  0xc9   : > { %v581_v52 = vpop.f32.mrf.mxu0 }
  0xca   : > { %v600_v51 = vpop.f32.mrf.mxu1 }
  0xcb   : > { %v601_v53 = vadd.f32 %v600_v51, %v581_v52 }
  0xcf   : > { %v586_v2 = vpop.f32.mrf.mxu3 }
  0xd1   : > { %v619_v55 = vpop.f32.mrf.mxu2  ;;  %v583_v59 = vpop.f32.mrf.mxu0 }
  0xd2   : > { %v620_v56 = vadd.f32 %v619_v55, %v601_v53  ;;  %v602_v57 = vpop.f32.mrf.mxu1 }
  0xd3   : > { %v603_v60 = vadd.f32 %v602_v57, %v583_v59 }
  0xd4   : > { %v629_v58 = vadd.f32 %v620_v56, %v336_v54 }
  0xd6   : > { %633 = vst [vmem:[#allocation2 + $0x10] sm:$0xff] %v629_v58 }
  0xd7   : > { %v588_v9 = vpop.f32.mrf.mxu3 }
  0xd9   : > { %v621_v62 = vpop.f32.mrf.mxu2 }
  0xda   : > { %v622_v63 = vadd.f32 %v621_v62, %v603_v60  ;;  %v605_v0 = vpop.f32.mrf.mxu1 }
  0xdb   : > { %v606_v3 = vadd.f32 %v605_v0, %v586_v2 }
  0xdc   : > { %v630_v1 = vadd.f32 %v622_v63, %v337_v61 }
  0xde   : > { %634 = vst [vmem:[#allocation2] sm:$0xff] %v630_v1 }
  0xe1   : > { %v624_v5 = vpop.f32.mrf.mxu2 }
  0xe2   : > { %v625_v6 = vadd.f32 %v624_v5, %v606_v3  ;;  %v607_v8 = vpop.f32.mrf.mxu1 }
  0xe3   : > { %v608_v10 = vadd.f32 %v607_v8, %v588_v9 }
  0xe4   : > { %v631_v7 = vadd.f32 %v625_v6, %v338_v4 }
  0xe6   : > { %635 = vst [vmem:[#allocation2 + $0x18] sm:$0xff] %v631_v7 }
  0xe9   : > { %v626_v12 = vpop.f32.mrf.mxu2 }
  0xea   : > { %v627_v13 = vadd.f32 %v626_v12, %v608_v10  ;;  %640 = sbr.rel (%p951_p11) target bundleno = 265 (0x109), region = 66 }
  0xec   : > { %v632_v14 = vadd.f32 %v627_v13, %v339_v11 }
  0xee   : > { %636 = vst [vmem:[#allocation2 + $0x8] sm:$0xff] %v632_v14 }
  0xef   : > { %v641_v15 = vld [vmem:[#allocation2 + $0x10] sm:$0xff]  ;;  %v642_v16 = vld [vmem:[#allocation2] sm:$0xff]  ;;  %v643_v18 = vld [vmem:[#allocation2 + $0x18] sm:$0xff] }
  0xf0   : > { %v1051_v17 = vld [vmem:[%s1247_s2] ss:$0 sm:$0xff] }
  0xf1   : > { %v649_v20 = vadd.f32 %v1051_v17, %v641_v15  ;;  %v650_v21 = vadd.f32 %v1051_v17, %v642_v16  ;;  %v651_v22 = vadd.f32 %v1051_v17, %v643_v18 }
  0xf3   : > { %v992_v24 = vpack.c.bf16 %v650_v21, %v649_v20  ;;  %v661_v25 = vadd.f32 %v650_v21, %v649_v20  ;;  %v670_v26 = vmul.f32 %v649_v20, %v649_v20  ;;  %v671_v27 = vmul.f32 %v650_v21, %v650_v21 }
  0xf4   : > { %v672_v29 = vmul.f32 %v651_v22, %v651_v22 }
  0xf5   : > { %v644_v19 = vld [vmem:[#allocation2 + $0x8] sm:$0xff]  ;;  %993 = vst [vmem:[%s1248_s3] sm:$0xff] %v992_v24   ;;  %v662_v30 = vadd.f32 %v661_v25, %v651_v22  ;;  %v674_v32 = vadd.f32 %v671_v27, %v670_v26 }
  0xf6   : > { %v652_v23 = vadd.f32 %v1051_v17, %v644_v19 }
  0xf7   : > { %v675_v34 = vadd.f32 %v674_v32, %v672_v29 }
  0xf8   : > { %v997_v28 = vpack.c.bf16 %v652_v23, %v651_v22  ;;  %v673_v31 = vmul.f32 %v652_v23, %v652_v23  ;;  %v663_v33 = vadd.f32 %v662_v30, %v652_v23 }
  0xfa   : > { %999 = vst [vmem:[%s1248_s3 + $0x8] sm:$0xff] %v997_v28   ;;  %v664_v35 = vrot.slane %v663_v33, 4  ;;  %v676_v36 = vadd.f32 %v675_v34, %v673_v31 }
  0xfc   : > { %v665_v37 = vadd.f32 %v664_v35, %v663_v33  ;;  %v677_v38 = vrot.slane %v676_v36, 4 }
  0xfe   : > { %v666_v39 = vrot.slane %v665_v37, 2  ;;  %v678_v40 = vadd.f32 %v677_v38, %v676_v36 }
 0x100   : > { %v667_v41 = vadd.f32 %v666_v39, %v665_v37  ;;  %v679_v42 = vrot.slane %v678_v40, 2 }
 0x102   : > { %v668_v43 = vrot.slane %v667_v41, 1  ;;  %v680_v44 = vadd.f32 %v679_v42, %v678_v40 }
 0x104   : > { %v669_v45 = vadd.f32 %v668_v43, %v667_v41  ;;  %v681_v46 = vrot.slane %v680_v44, 1 }
 0x106   : > { %683 = vst [vmem:[%s1249_s4] sm:$0x1] %v669_v45  ;;  %v682_v47 = vadd.f32 %v681_v46, %v680_v44 }
 0x108   : > { %684 = vst [vmem:[%s1250_s5] sm:$0x1] %v682_v47 }
 0x109 PF: > { %s16_s22 = sadd.s32 1, %s1090_s22   ;;  %s1251_s18 = smov %s1078_s19 }
 0x10a   : > { %p13_p12 = scmp.ge.s32.totalorder %s16_s22, 5   ;;  %s1252_s19 = smov %s1158_s26 }
 0x10b   : > { %s1253_s20 = smov %s1086_s21  ;;  %s1254_s21 = smov %s1256_s23 }
 0x10c   :  { %15 = sbr.rel (!%p13_p12) target bundleno = 3 (0x3), region = 134 }

// kernel: yolo_forward.23
= control target key start
LH: loop header
LB: loop body
LE: loop exit
PB: predicated region body
PF: predicated region fallthrough
CT: control target
= control target key end

     0   :  { %s215_s1 = inlined_call_operand.vmem [shape: f32[1,1,128], index: 1, kind: input, shape index: {}]   ;;  %s216_s2 = inlined_call_operand.vmem [shape: f32[1,1,128], index: 2, kind: input, shape index: {}]   ;;  %s217_s3 = inlined_call_operand.vmem [shape: f32[1,128], index: 3, kind: input, shape index: {}]   ;;  %s218_s4 = inlined_call_operand.vmem [shape: f32[1,128], index: 4, kind: input, shape index: {}]   ;;  %s219_s0 = inlined_call_operand.vmem [shape: bf16[32,128], index: 0, kind: input, shape index: {}]   ;;  %s220_s5 = inlined_call_operand.vmem [shape: bf16[32,128], index: 5, kind: input, shape index: {}]   ;;  %s221_s6 = inlined_call_operand.vmem [shape: bf16[32,128], index: 6, kind: output, shape index: {}]  }
   0x1   :  { %v23_v0 = vld [vmem:[%s215_s1] sm:$0x1]  ;;  %v143_v12 = vld [vmem:[%s219_s0 + $0x8] sm:$0xff]  }
   0x2   :  { %v25_v1 = vld [vmem:[%s216_s2] sm:$0x1]  ;;  %v27_v2 = vmul.f32 0.03125, %v23_v0  ;;  %v123_v17 = vunpack.c.l.bf16 %v143_v12  ;;  %v124_v18 = vunpack.c.h.bf16 %v143_v12  ;;  %v144_v38 = vld [vmem:[%s220_s5 + $0x8] sm:$0xff]  }
   0x3   :  { %v28_v3 = vmul.f32 0.03125, %v25_v1  ;;  %v118_v10 = vld [vmem:[%s219_s0] sm:$0xff]   ;;  %v131_v45 = vunpack.c.l.bf16 %v144_v38  ;;  %v132_v46 = vunpack.c.h.bf16 %v144_v38 }
   0x4   :  { %v29_v4 = vmul.f32 %v27_v2, %v27_v2  ;;  %v119_v13 = vunpack.c.l.bf16 %v118_v10  ;;  %v120_v15 = vunpack.c.h.bf16 %v118_v10  ;;  %v41_v16 = vperm.slane %v27_v2, 0  ;;  %v146_v27 = vld [vmem:[%s217_s3] ss:$0 sm:$0xff] }
   0x5   :  { %v147_v30 = vld [vmem:[%s218_s4] ss:$0 sm:$0xff] }
   0x6   :  { %v30_v5 = vsub.f32 %v28_v3, %v29_v4  ;;  %v43_v21 = vsub.f32 %v119_v13, %v41_v16  ;;  %v44_v22 = vsub.f32 %v120_v15, %v41_v16  ;;  %v45_v23 = vsub.f32 %v123_v17, %v41_v16  ;;  %v126_v35 = vld [vmem:[%s220_s5] sm:$0xff]  }
   0x7   :  { %v46_v24 = vsub.f32 %v124_v18, %v41_v16  ;;  %v127_v43 = vunpack.c.l.bf16 %v126_v35  ;;  %v128_v44 = vunpack.c.h.bf16 %v126_v35 }
   0x8   :  { %v31_v6 = vmax.f32 %v30_v5, 0.0 }
   0xa   :  { %v47_v7 = vadd.f32 1e-05, %v31_v6 }
   0xc   :  { %148 = vrsqrt.f32 %v47_v7  ;;  %vm54_vm0 = vweird.f32 %v47_v7 }
  0x12   :  { %v149_v8 = vpop.eup %148 }
  0x13   :  { %v49_v9 = vmul.f32 %v149_v8, %v47_v7  ;;  %vm55_vm1 = vweird.f32 %v149_v8 }
  0x14   :  { %vm56_vm2 = vmor %vm54_vm0, %vm55_vm1 }
  0x15   :  { %v50_v11 = vmul.f32 %v149_v8, %v49_v9 }
  0x17   :  { %v51_v14 = vmul.f32 0.5, %v50_v11 }
  0x19   :  { %v52_v19 = vsub.f32 1.5, %v51_v14 }
  0x1b   :  { %v53_v20 = vmul.f32 %v149_v8, %v52_v19 }
  0x1d   :  { %v57_v25 = vsel %vm56_vm2, %v149_v8, %v53_v20 }
  0x1e   :  { %v59_v26 = vperm.slane %v57_v25, 0 }
  0x20   :  { %v61_v28 = vmul.f32 %v59_v26, %v43_v21  ;;  %v62_v29 = vmul.f32 %v59_v26, %v44_v22  ;;  %v63_v31 = vmul.f32 %v59_v26, %v45_v23  ;;  %v64_v32 = vmul.f32 %v59_v26, %v46_v24 }
  0x22   :  { %v69_v33 = vmul.f32 %v146_v27, %v61_v28  ;;  %v70_v34 = vmul.f32 %v146_v27, %v62_v29  ;;  %v71_v36 = vmul.f32 %v146_v27, %v63_v31  ;;  %v72_v37 = vmul.f32 %v146_v27, %v64_v32 }
  0x24   :  { %v77_v39 = vadd.f32 %v147_v30, %v69_v33  ;;  %v78_v40 = vadd.f32 %v147_v30, %v70_v34  ;;  %v79_v41 = vadd.f32 %v147_v30, %v71_v36  ;;  %v80_v42 = vadd.f32 %v147_v30, %v72_v37 }
  0x26   :  { %vm81_vm3 = vcmp.gt.f32.partialorder %v77_v39, 0.0  ;;  %vm82_vm4 = vcmp.gt.f32.partialorder %v78_v40, 0.0  ;;  %v85_v47 = vmul.f32 0.1, %v77_v39  ;;  %v86_v48 = vmul.f32 0.1, %v78_v40 }
  0x27   :  { %vm83_vm5 = vcmp.gt.f32.partialorder %v79_v41, 0.0  ;;  %vm84_vm6 = vcmp.gt.f32.partialorder %v80_v42, 0.0  ;;  %v87_v49 = vmul.f32 0.1, %v79_v41  ;;  %v88_v50 = vmul.f32 0.1, %v80_v42 }
  0x28   :  { %v89_v51 = vsel %vm81_vm3, %v77_v39, %v85_v47  ;;  %v90_v52 = vsel %vm82_vm4, %v78_v40, %v86_v48 }
  0x29   :  { %v101_v53 = vadd.f32 %v127_v43, %v89_v51  ;;  %v102_v54 = vadd.f32 %v128_v44, %v90_v52  ;;  %v91_v55 = vsel %vm83_vm5, %v79_v41, %v87_v49  ;;  %v92_v56 = vsel %vm84_vm6, %v80_v42, %v88_v50 }
  0x2a   :  { %v103_v57 = vadd.f32 %v131_v45, %v91_v55  ;;  %v104_v58 = vadd.f32 %v132_v46, %v92_v56 }
  0x2b   :  { %v136_v59 = vpack.c.bf16 %v102_v54, %v101_v53 }
  0x2c   :  { %v141_v60 = vpack.c.bf16 %v104_v58, %v103_v57 }
  0x2d   :  { %137 = vst [vmem:[%s221_s6] sm:$0xff] %v136_v59  }
  0x2e   :  { %145 = vst [vmem:[%s221_s6 + $0x8] sm:$0xff] %v141_v60  }

// kernel: yolo_forward.26
= control target key start
LH: loop header
LB: loop body
LE: loop exit
PB: predicated region body
PF: predicated region fallthrough
CT: control target
= control target key end

     0   :  { %s106_s0 = inlined_call_operand.vmem [shape: bf16[4,2,2,256], index: 0, kind: input, shape index: {}]   ;;  %s107_s1 = inlined_call_operand.vmem [shape: bf16[4,2,128], index: 1, kind: output, shape index: {}]  }
   0x1   :  { %v8_v0 = vld [vmem:[%s106_s0] sm:$0x3]  ;;  %v9_v1 = vld [vmem:[%s106_s0 + $0x2] sm:$0x3]  ;;  %v10_v2 = vld [vmem:[%s106_s0 + $0x4] sm:$0x3] }
   0x2   :  { %v16_v3 = vunpack.c.l.bf16 %v8_v0  ;;  %v17_v4 = vunpack.c.l.bf16 %v9_v1  ;;  %v11_v5 = vld [vmem:[%s106_s0 + $0x6] sm:$0x3]  ;;  %v18_v6 = vunpack.c.l.bf16 %v10_v2  ;;  %v12_v7 = vld [vmem:[%s106_s0 + $0x8] sm:$0x3]  ;;  %v13_v8 = vld [vmem:[%s106_s0 + $0xa] sm:$0x3] }
   0x3   :  { %v19_v9 = vunpack.c.l.bf16 %v11_v5  ;;  %v20_v10 = vunpack.c.l.bf16 %v12_v7  ;;  %v21_v11 = vunpack.c.l.bf16 %v13_v8  ;;  %v14_v12 = vld [vmem:[%s106_s0 + $0xc] sm:$0x3]  ;;  %v15_v13 = vld [vmem:[%s106_s0 + $0xe] sm:$0x3] }
   0x4   :  { %v24_v14 = vadd.f32 %v17_v4, %v16_v3  ;;  %v22_v15 = vunpack.c.l.bf16 %v14_v12  ;;  %v23_v16 = vunpack.c.l.bf16 %v15_v13 }
   0x5   :  { %v25_v17 = vadd.f32 %v19_v9, %v18_v6  ;;  %v26_v18 = vadd.f32 %v21_v11, %v20_v10 }
   0x6   :  { %v32_v19 = vrot.slane %v24_v14, 2  ;;  %v27_v20 = vadd.f32 %v23_v16, %v22_v15 }
   0x7   :  { %v33_v21 = vrot.slane %v25_v17, 2  ;;  %v34_v22 = vrot.slane %v26_v18, 2 }
   0x8   :  { %v40_v23 = vadd.f32 %v32_v19, %v24_v14  ;;  %v35_v24 = vrot.slane %v27_v20, 2 }
   0x9   :  { %v41_v25 = vadd.f32 %v33_v21, %v25_v17  ;;  %v42_v26 = vadd.f32 %v34_v22, %v26_v18 }
   0xa   :  { %v44_v27 = vmul.f32 0.25, %v40_v23  ;;  %v43_v28 = vadd.f32 %v35_v24, %v27_v20 }
   0xb   :  { %v45_v29 = vmul.f32 0.25, %v41_v25  ;;  %v46_v30 = vmul.f32 0.25, %v42_v26 }
   0xc   :  { %v48_v31 = vpack.c.bf16 %v44_v27, %v44_v27  ;;  %v47_v32 = vmul.f32 0.25, %v43_v28 }
   0xd   :  { %v49_v33 = vpack.c.bf16 %v45_v29, %v45_v29  ;;  %v50_v34 = vpack.c.bf16 %v46_v30, %v46_v30 }
   0xe   :  { %52 = vst [vmem:[%s107_s1] sm:$0x1] %v48_v31  ;;  %v51_v35 = vpack.c.bf16 %v47_v32, %v47_v32 }
   0xf   :  { %53 = vst [vmem:[%s107_s1 + $0x1] sm:$0x1] %v49_v33 }
  0x10   :  { %54 = vst [vmem:[%s107_s1 + $0x2] sm:$0x1] %v50_v34 }
  0x11   :  { %55 = vst [vmem:[%s107_s1 + $0x3] sm:$0x1] %v51_v35 }

// kernel: yolo_forward.27
= control target key start
LH: loop header
LB: loop body
LE: loop exit
PB: predicated region body
PF: predicated region fallthrough
CT: control target
= control target key end

     0   :  { %s405_s0 = inlined_call_operand.vmem [shape: bf16[2,128], index: 0, kind: input, shape index: {}]   ;;  %s406_s1 = inlined_call_operand.vmem [shape: bf16[128,128], index: 1, kind: input, shape index: {}]   ;;  %s407_s2 = inlined_call_operand.vmem [shape: f32[1,128], index: 2, kind: input, shape index: {}]   ;;  %s408_s3 = inlined_call_operand.vmem [shape: bf16[128,128], index: 3, kind: input, shape index: {}]   ;;  %s409_s4 = inlined_call_operand.vmem [shape: f32[1,128], index: 4, kind: input, shape index: {}]   ;;  %s410_s5 = inlined_call_operand.hbm [shape: f32[2,128], index: 5, kind: output, shape index: {}]  }
   0x1   :  { %v276_v0 = vld [vmem:[%s406_s1 + $0x38] sm:$0xff]  ;;  %v275_v1 = vld [vmem:[%s406_s1 + $0x30] sm:$0xff]  ;;  %v274_v4 = vld [vmem:[%s406_s1 + $0x28] sm:$0xff] }
   0x2   :  { %90 = vmatpush.bf16.msra.mxu0 %v276_v0  ;;  %v284_v2 = vld [vmem:[%s408_s3 + $0x38] sm:$0xff]  ;;  %v283_v3 = vld [vmem:[%s408_s3 + $0x30] sm:$0xff] }
   0x3   :  { %175 = vmatpush.bf16.msra.mxu1 %v284_v2 }
   0x6   :  { %91 = vmatpush.bf16.msra.mxu0 %v275_v1 }
   0x7   :  { %10 = vsyncpa [#allocation3], 0  ;;  %176 = vmatpush.bf16.msra.mxu1 %v283_v3  ;;  %v282_v5 = vld [vmem:[%s408_s3 + $0x28] sm:$0xff]  ;;  %v273_v6 = vld [vmem:[%s406_s1 + $0x20] sm:$0xff]  ;;  %s314_s29 = smov [#allocation2]   ;;  %s196_s7 = sshll.u32 %s410_s5, 4  ;;  %s197_s7 = int_to_ptr.hbm [resolvable:$true] %s196_s7 }
   0x8   :  { %v281_v7 = vld [vmem:[%s408_s3 + $0x20] sm:$0xff]  ;;  %v272_v8 = vld [vmem:[%s406_s1 + $0x18] sm:$0xff]  ;;  %v271_v10 = vld [vmem:[%s406_s1 + $0x10] sm:$0xff]  ;;  %s194_s30 = sshll.u32 %s314_s29, 4  ;;  %s195_s30 = int_to_ptr.vmem [resolvable:$true] %s194_s30 }
   0x9   :  { %v280_v9 = vld [vmem:[%s408_s3 + $0x18] sm:$0xff]  ;;  %v279_v11 = vld [vmem:[%s408_s3 + $0x10] sm:$0xff]  ;;  %v270_v12 = vld [vmem:[%s406_s1 + $0x8] sm:$0xff] }
   0xa   :  { %92 = vmatpush.bf16.msra.mxu0 %v274_v4  ;;  %v269_v13 = vld [vmem:[%s406_s1] sm:$0xff]  ;;  %v278_v15 = vld [vmem:[%s408_s3 + $0x8] sm:$0xff] }
   0xb   :  { %177 = vmatpush.bf16.msra.mxu1 %v282_v5  ;;  %v21_v14 = vld [vmem:[%s405_s0] sm:$0x1] }
   0xc   :  { %v277_v16 = vld [vmem:[%s408_s3] sm:$0xff] }
   0xd   :  { %v286_v17 = vld [vmem:[%s407_s2] ss:$0 sm:$0xff] }
   0xe   :  { %93 = vmatpush.bf16.msra.mxu0 %v273_v6  ;;  %v287_v24 = vld [vmem:[%s409_s4] ss:$0 sm:$0xff] }
   0xf   :  { %178 = vmatpush.bf16.msra.mxu1 %v281_v7 }
  0x12   :  { %94 = vmatpush.bf16.msra.mxu0 %v272_v8 }
  0x13   :  { %179 = vmatpush.bf16.msra.mxu1 %v280_v9 }
  0x16   :  { %95 = vmatpush.bf16.msra.mxu0 %v271_v10 }
  0x17   :  { %180 = vmatpush.bf16.msra.mxu1 %v279_v11 }
  0x1a   :  { %96 = vmatpush.bf16.msra.mxu0 %v270_v12 }
  0x1b   :  { %181 = vmatpush.bf16.msra.mxu1 %v278_v15 }
  0x1e   :  { %97 = vmatpush.bf16.msra.mxu0 %v269_v13 }
  0x1f   :  { %182 = vmatpush.bf16.msra.mxu1 %v277_v16 }
  0x21   :  { %98 = vmatmul.bf16.vlgmr.msra.gmra.mxu0 %v21_v14 }
  0x9e   :  { %v99_v18 = vpop.f32.mrf.mxu0 }
  0x9f   :  { %v100_v19 = vadd.f32 %v286_v17, %v99_v18 }
  0xa1   :  { %v104_v20 = vmul.f32 0.1, %v100_v19  ;;  %vm103_vm0 = vcmp.gt.f32.partialorder %v100_v19, 0.0 }
  0xa3   :  { %v105_v21 = vsel %vm103_vm0, %v100_v19, %v104_v20 }
  0xa4   :  { %v106_v22 = vpack.c.bf16 %v105_v21, %v105_v21 }
  0xa6   :  { %v101_v23 = vpop.f32.mrf.mxu0  ;;  %183 = vmatmul.bf16.vlgmr.msra.gmra.mxu1 %v106_v22 }
 0x123   :  { %v184_v25 = vpop.f32.mrf.mxu1 }
 0x124   :  { %v185_v26 = vadd.f32 %v287_v24, %v184_v25 }
 0x126   :  { %188 = vst [vmem:[#allocation2] sm:$0x3] %v185_v26 }
 0x127   :  { %199 = dma.vmem_to_hbm [thread:$0]  %s195_s30, 32, %s197_s7, [#allocation3]  }
 0x12b   :  { %v186_v27 = vpop.f32.mrf.mxu1 }
 0x12c   :  { %312 = dma.done.wait [#allocation3], 32  }
 0x12d   :  { %313 = vsyncadd [#allocation3], 4294967264 }
 0x12e   :  { %204 = vsyncpa [#allocation3], 1 }

</bundles_post_ra>
